<compile_context>
chip_gen: v5e
topology: v5e:2x2
jax: 0.10.0
libtpu: 0.0.40
codegen_flags: <defaults>
</compile_context>

<pallas_src>
import functools

import numpy as np
import jax
import jax.numpy as jnp
from jax.experimental import pallas as pl
from jax.experimental.pallas import tpu as pltpu


# ----------------------------------------------------------------------------
# Static schedules / trace-time helpers
# ----------------------------------------------------------------------------
def _deconv_tap_schedule():
    # ConvTranspose2d(k=4, s=2, p=1): output parity (py, px); for each parity the two
    # contributing (input offset d, kernel index k) pairs per spatial dim:
    #   even output (o = 2m)   : (i = m,   k = 1), (i = m - 1, k = 3)
    #   odd  output (o = 2m+1) : (i = m,   k = 2), (i = m + 1, k = 0)
    taps_even = ((0, 1), (-1, 3))
    taps_odd = ((0, 2), (1, 0))
    sched = []
    for py in range(2):
        for px in range(2):
            taps = []
            for dy, ky in (taps_even if py == 0 else taps_odd):
                for dx, kx in (taps_even if px == 0 else taps_odd):
                    taps.append((dy, dx, ky, kx))
            sched.append(((py, px), taps))
    return sched


_DECONV_SCHED = _deconv_tap_schedule()


def _lane_roll(a, k):
    """b[:, p] = a[:, (p + k) % M] for static k (lane-axis rotation via 2-slice concat).

    Wrapped values only ever land on padding-ring / unused positions downstream."""
    m = a.shape[-1]
    k = k % m
    if k == 0:
        return a
    return jnp.concatenate([a[:, k:], a[:, :k]], axis=1)


def _conv3x3(a, w_ref, b_ref, wp):
    """3x3 'same' conv + bias + relu on a channel-major, flat-padded activation.

    a: (Cin, M) bf16 with a zero ring of width 1; w_ref: (9, Cout, Cin) bf16, tap t = di*3+dj;
    returns (Cout, M) f32 (values only meaningful at interior lanes)."""
    acc = None
    for t in range(9):
        di, dj = t // 3, t % 3
        contrib = jnp.dot(w_ref[t], _lane_roll(a, (di - 1) * wp + (dj - 1)),
                          preferred_element_type=jnp.float32)
        acc = contrib if acc is None else acc + contrib
    return jnp.maximum(acc + b_ref[...], 0.0)


def _pool2x2_max(y, wp):
    """At every 2x2 anchor lane p the result is max(y[p], y[p+1], y[p+wp], y[p+wp+1])."""
    return jnp.maximum(jnp.maximum(y, _lane_roll(y, 1)),
                       jnp.maximum(_lane_roll(y, wp), _lane_roll(y, wp + 1)))


def _deconv_phases(a, w_ref, b_ref, s_ref, *, wp_in, act):
    """ConvTranspose2d(k=4, s=2, p=1) via 4 sub-pixel phase GEMMs + scatter GEMMs.

    a: (Cin, Min) bf16 flat-padded with zero ring; w_ref: (16, Cout, Cin) bf16 (4 taps per
    phase); s_ref: (4, Min, Mout) f32 0/1 scatter matrices; returns (Cout, Mout) f32."""
    c_out = w_ref.shape[1]
    m_out = s_ref.shape[2]
    rolled = {(dy, dx): _lane_roll(a, dy * wp_in + dx)
              for dy in (-1, 0, 1) for dx in (-1, 0, 1)}
    out = jnp.zeros((c_out, m_out), jnp.float32)
    for ph, (_, taps) in enumerate(_DECONV_SCHED):
        acc = None
        for t, (dy, dx, _ky, _kx) in enumerate(taps):
            contrib = jnp.dot(w_ref[ph * 4 + t], rolled[(dy, dx)],
                              preferred_element_type=jnp.float32)
            acc = contrib if acc is None else acc + contrib
        val = acc + b_ref[...]
        val = jnp.maximum(val, 0.0) if act == "relu" else jnp.tanh(val)
        out = out + jnp.dot(val, s_ref[ph], preferred_element_type=jnp.float32)
    return out


# ----------------------------------------------------------------------------
# Fused Pallas kernels
# ----------------------------------------------------------------------------
def _encoder_kernel(x_ref, w1_ref, b1_ref, s1_ref, w2_ref, b2_ref,
                    wfc_ref, bfc_ref, wd1_ref, bd1_ref, o_ref, *, wp1, wp2):
    """Per-sample: conv1+pool1 -> conv2+pool2 -> fc -> decoder layer 1 (dense)."""
    a0 = x_ref[0]                                              # (Cin, (im+2)^2) bf16
    y1 = _conv3x3(a0, w1_ref, b1_ref, wp1)                     # (C1, M0) f32
    a1 = jnp.dot(_pool2x2_max(y1, wp1), s1_ref[...],           # fused pool + compaction
                 preferred_element_type=jnp.float32)           # (C1, M1) f32, zero ring
    y2 = _conv3x3(a1.astype(jnp.bfloat16), w2_ref, b2_ref, wp2)
    p2 = _pool2x2_max(y2, wp2).astype(jnp.bfloat16)            # (C2, M1) bf16
    z = bfc_ref[...]                                           # (1, nz) f32
    for c in range(p2.shape[0]):                               # fc folded with pool-2 anchors
        z = z + jnp.dot(p2[c:c + 1, :], wfc_ref[c], preferred_element_type=jnp.float32)
    d1 = jnp.dot(z.astype(jnp.bfloat16), wd1_ref[...],         # ConvT(nz->Cd1,k4,s1,p0) on 1x1
                 preferred_element_type=jnp.float32) + bd1_ref[...]
    o_ref[0] = jnp.maximum(d1, 0.0).astype(o_ref.dtype)        # (1, Cd1*36)


def _decoder_kernel(a1_ref, wt2_ref, bt2_ref, st2_ref, wt3_ref, bt3_ref, st3_ref,
                    o_ref, *, wp_a, wp_b):
    """Per-sample: two stride-2 ConvTranspose layers (phase GEMMs), relu then tanh."""
    a1 = a1_ref[0]                                             # (Cd1, 36) bf16
    a2 = _deconv_phases(a1, wt2_ref, bt2_ref, st2_ref, wp_in=wp_a, act="relu")   # (Cd2, 100)
    y = _deconv_phases(a2.astype(jnp.bfloat16), wt3_ref, bt3_ref, st3_ref,
                       wp_in=wp_b, act="tanh")                 # (nc, im*im)
    o_ref[0] = y.astype(o_ref.dtype)


# ----------------------------------------------------------------------------
# pallas_call wrappers
# ----------------------------------------------------------------------------
def _encoder_call(pp, x_flat):
    b, cin, m0 = x_flat.shape
    _, c1, _ = pp["w1t"].shape
    c2 = pp["w2t"].shape[1]
    m1 = pp["s1"].shape[1]
    nz = pp["bfc"].shape[1]
    n_d1 = pp["wd1"].shape[1]
    wp1, wp2 = int(round(m0 ** 0.5)), int(round(m1 ** 0.5))
    c2map = lambda i: (0, 0)
    c3map = lambda i: (0, 0, 0)
    return pl.pallas_call(
        functools.partial(_encoder_kernel, wp1=wp1, wp2=wp2),
        out_shape=jax.ShapeDtypeStruct((b, 1, n_d1), jnp.bfloat16),
        grid=(b,),
        in_specs=[
            pl.BlockSpec((1, cin, m0), lambda i: (i, 0, 0)),
            pl.BlockSpec((9, c1, cin), c3map),
            pl.BlockSpec((c1, 1), c2map),
            pl.BlockSpec((m0, m1), c2map),
            pl.BlockSpec((9, c2, c1), c3map),
            pl.BlockSpec((c2, 1), c2map),
            pl.BlockSpec((c2, m1, nz), c3map),
            pl.BlockSpec((1, nz), c2map),
            pl.BlockSpec((nz, n_d1), c2map),
            pl.BlockSpec((1, n_d1), c2map),
        ],
        out_specs=pl.BlockSpec((1, 1, n_d1), lambda i: (i, 0, 0)),
        compiler_params=pltpu.CompilerParams(dimension_semantics=("parallel",)),
    )(x_flat, pp["w1t"], pp["b1"], pp["s1"], pp["w2t"], pp["b2"],
      pp["wfc"], pp["bfc"], pp["wd1"], pp["bd1"])


def _decoder_call(pp, a1):
    b, cd1, m_in = a1.shape
    cd2 = pp["wt2"].shape[1]
    nc = pp["wt3"].shape[1]
    m_mid = pp["st2"].shape[2]
    m_out = pp["st3"].shape[2]
    wp_a, wp_b = int(round(m_in ** 0.5)), int(round(m_mid ** 0.5))
    c2map = lambda i: (0, 0)
    c3map = lambda i: (0, 0, 0)
    return pl.pallas_call(
        functools.partial(_decoder_kernel, wp_a=wp_a, wp_b=wp_b),
        out_shape=jax.ShapeDtypeStruct((b, nc, m_out), jnp.float32),
        grid=(b,),
        in_specs=[
            pl.BlockSpec((1, cd1, m_in), lambda i: (i, 0, 0)),
            pl.BlockSpec((16, cd2, cd1), c3map),
            pl.BlockSpec((cd2, 1), c2map),
            pl.BlockSpec((4, m_in, m_mid), c3map),
            pl.BlockSpec((16, nc, cd2), c3map),
            pl.BlockSpec((nc, 1), c2map),
            pl.BlockSpec((4, m_mid, m_out), c3map),
        ],
        out_specs=pl.BlockSpec((1, nc, m_out), lambda i: (i, 0, 0)),
        compiler_params=pltpu.CompilerParams(dimension_semantics=("parallel",)),
    )(a1, pp["wt2"], pp["bt2"], pp["st2"], pp["wt3"], pp["bt3"], pp["st3"])


def autoencoder_forward(pp, x_nchw):
    """x: (B, nc, im, im) float32 NCHW -> (B, nc, im, im) float32 NCHW."""
    b, cin, h, w = x_nchw.shape
    xp = jnp.pad(x_nchw, ((0, 0), (0, 0), (1, 1), (1, 1)))         # zero ring for conv1
    x_flat = xp.reshape(b, cin, (h + 2) * (w + 2)).astype(jnp.bfloat16)
    d1 = _encoder_call(pp, x_flat)                                  # (B, 1, Cd1*36) bf16
    cd1 = pp["wt2"].shape[2]
    a1 = d1.reshape(b, cd1, d1.shape[-1] // cd1)                    # free metadata reshape
    y = _decoder_call(pp, a1)                                       # (B, nc, im*im) f32
    nc_out = y.shape[1]
    im = int(round(y.shape[2] ** 0.5))
    return y.reshape(b, nc_out, im, im)                             # already NCHW


# ----------------------------------------------------------------------------
# Parameters (PyTorch layouts) and one-time packing into kernel GEMM layouts
# ----------------------------------------------------------------------------
def init_torch_params(key, *, im_size, nz, ngf, nc):
    """Stand-in VggEncoder / SubDecoder weights in PyTorch layouts."""
    ngf_dec = int(ngf * 1.7)
    c1, c2 = 8, 16
    feat = c2 * (im_size // 4) ** 2
    ks = jax.random.split(key, 12)
    n = lambda k, shape, s: s * jax.random.normal(k, shape, jnp.float32)
    return {
        "e_c1_w": n(ks[0], (c1, nc, 3, 3), 0.25), "e_c1_b": n(ks[1], (c1,), 0.05),
        "e_c2_w": n(ks[2], (c2, c1, 3, 3), 0.15), "e_c2_b": n(ks[3], (c2,), 0.05),
        "e_fc_w": n(ks[4], (feat, nz), 0.06),     "e_fc_b": n(ks[5], (nz,), 0.05),
        "d_t1_w": n(ks[6], (nz, 2 * ngf_dec, 4, 4), 0.10),
        "d_t1_b": n(ks[7], (2 * ngf_dec,), 0.05),
        "d_t2_w": n(ks[8], (2 * ngf_dec, ngf_dec, 4, 4), 0.08),
        "d_t2_b": n(ks[9], (ngf_dec,), 0.05),
        "d_t3_w": n(ks[10], (ngf_dec, nc, 4, 4), 0.12),
        "d_t3_b": n(ks[11], (nc,), 0.05),
    }


def prepare_params(p, *, im_size, nz):
    """Pre-transform all weights once into the fused kernels' GEMM layouts."""
    c1, cin = p["e_c1_w"].shape[:2]
    c2 = p["e_c2_w"].shape[0]
    cd1 = p["d_t1_w"].shape[1]
    cd2 = p["d_t2_w"].shape[1]
    nc = p["d_t3_w"].shape[1]
    h1, h2, h3 = im_size, im_size // 2, im_size // 4
    wp1, wp2, wpd1, wpd2 = h1 + 2, h2 + 2, h3 + 2, h2 + 2
    m0, m1, md1 = wp1 * wp1, wp2 * wp2, wpd1 * wpd1

    # 3x3 conv taps -> (9, Cout, Cin), tap t = di*3 + dj
    w1t = jnp.transpose(p["e_c1_w"], (2, 3, 0, 1)).reshape(9, c1, cin)
    w2t = jnp.transpose(p["e_c2_w"], (2, 3, 0, 1)).reshape(9, c2, c1)

    # pool-1 compaction: anchor (2y+1, 2x+1) on the wp1 grid -> (y+1, x+1) on wp2 grid
    s1 = np.zeros((m0, m1), np.float32)
    for y in range(h2):
        for x in range(h2):
            s1[(2 * y + 1) * wp1 + (2 * x + 1), (y + 1) * wp2 + (x + 1)] = 1.0

    # FC weight folded with the pool-2 anchor selection: (C2, m1, nz)
    wfc4 = np.asarray(p["e_fc_w"], np.float32).reshape(c2, h3, h3, nz)
    wfc_fold = np.zeros((c2, m1, nz), np.float32)
    for y in range(h3):
        for x in range(h3):
            wfc_fold[:, (2 * y + 1) * wp2 + (2 * x + 1), :] = wfc4[:, y, x, :]

    # d_t1 (ConvT k4 s1 p0 on 1x1 input) == dense GEMM into the padded (Cd1, 6*6) layout
    wt1 = np.asarray(p["d_t1_w"], np.float32)                       # (nz, Cd1, 4, 4)
    bt1 = np.asarray(p["d_t1_b"], np.float32)
    wd1 = np.zeros((nz, cd1, md1), np.float32)
    bd1 = np.zeros((cd1, md1), np.float32)
    for ky in range(4):
        for kx in range(4):
            q = (ky + 1) * wpd1 + (kx + 1)
            wd1[:, :, q] = wt1[:, :, ky, kx]
            bd1[:, q] = bt1
    wd1 = wd1.reshape(nz, cd1 * md1)
    bd1 = bd1.reshape(1, cd1 * md1)

    def pack_phase_w(w_torch):
        w = np.asarray(w_torch, np.float32)                         # (Cin, Cout, 4, 4)
        out = np.zeros((16, w.shape[1], w.shape[0]), np.float32)
        for ph, (_, taps) in enumerate(_DECONV_SCHED):
            for t, (_dy, _dx, ky, kx) in enumerate(taps):
                out[ph * 4 + t] = w[:, :, ky, kx].T
        return out

    def scatter_mats(h_in, wp_in, wp_out, out_off):
        mats = np.zeros((4, wp_in * wp_in, wp_out * wp_out), np.float32)
        for ph, ((py, px), _) in enumerate(_DECONV_SCHED):
            for my in range(h_in):
                for mx in range(h_in):
                    pi = (my + 1) * wp_in + (mx + 1)
                    po = (2 * my + py + out_off) * wp_out + (2 * mx + px + out_off)
                    mats[ph, pi, po] = 1.0
        return mats

    return dict(
        w1t=w1t.astype(jnp.bfloat16),
        b1=p["e_c1_b"].reshape(c1, 1).astype(jnp.float32),
        s1=jnp.asarray(s1),
        w2t=w2t.astype(jnp.bfloat16),
        b2=p["e_c2_b"].reshape(c2, 1).astype(jnp.float32),
        wfc=jnp.asarray(wfc_fold).astype(jnp.bfloat16),
        bfc=p["e_fc_b"].reshape(1, nz).astype(jnp.float32),
        wd1=jnp.asarray(wd1).astype(jnp.bfloat16),
        bd1=jnp.asarray(bd1),
        wt2=jnp.asarray(pack_phase_w(p["d_t2_w"])).astype(jnp.bfloat16),
        bt2=p["d_t2_b"].reshape(cd2, 1).astype(jnp.float32),
        st2=jnp.asarray(scatter_mats(h3, wpd1, wpd2, 1)),           # (4, 36, 100)
        wt3=jnp.asarray(pack_phase_w(p["d_t3_w"])).astype(jnp.bfloat16),
        bt3=p["d_t3_b"].reshape(nc, 1).astype(jnp.float32),
        st3=jnp.asarray(scatter_mats(h2, wpd2, im_size, 0)),        # (4, 100, 256)
    )


# ----------------------------------------------------------------------------
# float64 numpy reference of the same stand-in architecture (PyTorch semantics)
# ----------------------------------------------------------------------------
def _reference_forward(p, x):
    x = np.asarray(x, np.float64)

    def conv3x3_relu(a, w, b):
        bsz, _, h, wd = a.shape
        o = w.shape[0]
        w = np.asarray(w, np.float64)
        ap = np.pad(a, ((0, 0), (0, 0), (1, 1), (1, 1)))
        out = np.zeros((bsz, o, h, wd))
        for di in range(3):
            for dj in range(3):
                out += np.einsum("bchw,oc->bohw", ap[:, :, di:di + h, dj:dj + wd],
                                 w[:, :, di, dj])
        return np.maximum(out + np.asarray(b, np.float64)[None, :, None, None], 0.0)

    def pool2x2(a):
        bsz, c, h, wd = a.shape
        return a.reshape(bsz, c, h // 2, 2, wd // 2, 2).max(axis=(3, 5))

    def conv_t(a, w, b, stride, pad, act):
        w = np.asarray(w, np.float64)
        b = np.asarray(b, np.float64)
        bsz, _, h, wd = a.shape
        co, k = w.shape[1], w.shape[2]
        ho = (h - 1) * stride - 2 * pad + k
        wo = (wd - 1) * stride - 2 * pad + k
        out = np.zeros((bsz, co, ho, wo))
        for iy in range(h):
            for ix in range(wd):
                for ky in range(k):
                    for kx in range(k):
                        oy, ox = iy * stride - pad + ky, ix * stride - pad + kx
                        if 0 <= oy < ho and 0 <= ox < wo:
                            out[:, :, oy, ox] += a[:, :, iy, ix] @ w[:, :, ky, kx]
        out += b[None, :, None, None]
        return np.maximum(out, 0.0) if act == "relu" else np.tanh(out)

    h = pool2x2(conv3x3_relu(x, p["e_c1_w"], p["e_c1_b"]))
    h = pool2x2(conv3x3_relu(h, p["e_c2_w"], p["e_c2_b"]))
    z = h.reshape(h.shape[0], -1) @ np.asarray(p["e_fc_w"], np.float64) \
        + np.asarray(p["e_fc_b"], np.float64)
    d = z[:, :, None, None]
    d = conv_t(d, p["d_t1_w"], p["d_t1_b"], 1, 0, "relu")
    d = conv_t(d, p["d_t2_w"], p["d_t2_b"], 2, 1, "relu")
    d = conv_t(d, p["d_t3_w"], p["d_t3_b"], 2, 1, "tanh")
    return d


# ----------------------------------------------------------------------------
if __name__ == "__main__":
    IM_SIZE, NZ, NGF, NC = 16, 32, 8, 4
    key = jax.random.PRNGKey(0)
    kp, kx = jax.random.split(key)
    torch_params = init_torch_params(kp, im_size=IM_SIZE, nz=NZ, ngf=NGF, nc=NC)
    packed = prepare_params(torch_params, im_size=IM_SIZE, nz=NZ)
    x = jax.random.normal(kx, (2, NC, IM_SIZE, IM_SIZE), jnp.float32)   # NCHW like PyTorch

    fwd = jax.jit(autoencoder_forward)
    y = fwd(packed, x)
    jax.block_until_ready(y)

    assert y.shape == (2, NC, IM_SIZE, IM_SIZE), y.shape
    assert bool(jnp.all(jnp.isfinite(y)))

    y_ref = _reference_forward(torch_params, np.asarray(x))
    err = float(np.max(np.abs(np.asarray(y, np.float64) - y_ref)))
    assert err < 0.1, f"max abs error vs float64 reference: {err}"
    print("KERNEL_OK")
</pallas_src>

<mosaic_0001>
module attributes {stable_mosaic.version = 11 : i64} {
  func.func @_encoder_kernel(%arg0: i32, %arg1: memref<1x4x324xbf16, #tpu.memory_space<vmem>>, %arg2: memref<9x8x4xbf16, #tpu.memory_space<vmem>>, %arg3: memref<8x1xf32, #tpu.memory_space<vmem>>, %arg4: memref<324x100xf32, #tpu.memory_space<vmem>>, %arg5: memref<9x16x8xbf16, #tpu.memory_space<vmem>>, %arg6: memref<16x1xf32, #tpu.memory_space<vmem>>, %arg7: memref<16x100x32xbf16, #tpu.memory_space<vmem>>, %arg8: memref<1x32xf32, #tpu.memory_space<vmem>>, %arg9: memref<32x936xbf16, #tpu.memory_space<vmem>>, %arg10: memref<1x936xf32, #tpu.memory_space<vmem>>, %arg11: memref<1x1x936xbf16, #tpu.memory_space<vmem>>) attributes {dimension_semantics = [#tpu.dimension_semantics<parallel>], iteration_bounds = array<i64: 2>, scalar_prefetch = 0 : i64, scratch_operands = 0 : i64, tpu.core_type = #tpu.core_type<tc>, window_params = [{transform_indices = @transform_0, window_bounds = array<i64: 1, 4, 324>}, {pipeline_mode = #tpu.pipeline_mode<synchronous>, transform_indices = @transform_1, window_bounds = array<i64: 9, 8, 4>}, {pipeline_mode = #tpu.pipeline_mode<synchronous>, transform_indices = @transform_2, window_bounds = array<i64: 8, 1>}, {pipeline_mode = #tpu.pipeline_mode<synchronous>, transform_indices = @transform_3, window_bounds = array<i64: 324, 100>}, {pipeline_mode = #tpu.pipeline_mode<synchronous>, transform_indices = @transform_4, window_bounds = array<i64: 9, 16, 8>}, {pipeline_mode = #tpu.pipeline_mode<synchronous>, transform_indices = @transform_5, window_bounds = array<i64: 16, 1>}, {pipeline_mode = #tpu.pipeline_mode<synchronous>, transform_indices = @transform_6, window_bounds = array<i64: 16, 100, 32>}, {pipeline_mode = #tpu.pipeline_mode<synchronous>, transform_indices = @transform_7, window_bounds = array<i64: 1, 32>}, {pipeline_mode = #tpu.pipeline_mode<synchronous>, transform_indices = @transform_8, window_bounds = array<i64: 32, 936>}, {pipeline_mode = #tpu.pipeline_mode<synchronous>, transform_indices = @transform_9, window_bounds = array<i64: 1, 936>}, {transform_indices = @transform_10, window_bounds = array<i64: 1, 1, 936>}]} {
    %c0 = arith.constant 0 : index
    %c0_0 = arith.constant 0 : index
    %c0_1 = arith.constant 0 : index
    %0 = vector.load %arg1[%c0, %c0_0, %c0_1] : memref<1x4x324xbf16, #tpu.memory_space<vmem>>, vector<1x4x324xbf16>
    %1 = vector.shape_cast %0 : vector<1x4x324xbf16> to vector<4x324xbf16>
    %c0_2 = arith.constant 0 : index
    %c0_3 = arith.constant 0 : index
    %c0_4 = arith.constant 0 : index
    %2 = vector.load %arg2[%c0_2, %c0_3, %c0_4] : memref<9x8x4xbf16, #tpu.memory_space<vmem>>, vector<1x8x4xbf16>
    %3 = vector.shape_cast %2 : vector<1x8x4xbf16> to vector<8x4xbf16>
    %4 = vector.extract_strided_slice %1 {offsets = [0, 305], sizes = [4, 19], strides = [1, 1]} : vector<4x324xbf16> to vector<4x19xbf16>
    %5 = vector.extract_strided_slice %1 {offsets = [0, 0], sizes = [4, 305], strides = [1, 1]} : vector<4x324xbf16> to vector<4x305xbf16>
    %6 = tpu.concatenate %4, %5 in 1 : vector<4x19xbf16>, vector<4x305xbf16> -> vector<4x324xbf16>
    %cst = arith.constant dense<0.000000e+00> : vector<8x324xf32>
    %7 = tpu.matmul %3, %6, %cst {dimension_numbers = #tpu.dot_dimension_numbers<[1], [0], [0], [1], [0, 0, 1, 1], [], []>} : vector<8x4xbf16>, vector<4x324xbf16>, vector<8x324xf32> -> vector<8x324xf32>
    %c1 = arith.constant 1 : index
    %c0_5 = arith.constant 0 : index
    %c0_6 = arith.constant 0 : index
    %8 = vector.load %arg2[%c1, %c0_5, %c0_6] : memref<9x8x4xbf16, #tpu.memory_space<vmem>>, vector<1x8x4xbf16>
    %9 = vector.shape_cast %8 : vector<1x8x4xbf16> to vector<8x4xbf16>
    %10 = vector.extract_strided_slice %1 {offsets = [0, 306], sizes = [4, 18], strides = [1, 1]} : vector<4x324xbf16> to vector<4x18xbf16>
    %11 = vector.extract_strided_slice %1 {offsets = [0, 0], sizes = [4, 306], strides = [1, 1]} : vector<4x324xbf16> to vector<4x306xbf16>
    %12 = tpu.concatenate %10, %11 in 1 : vector<4x18xbf16>, vector<4x306xbf16> -> vector<4x324xbf16>
    %cst_7 = arith.constant dense<0.000000e+00> : vector<8x324xf32>
    %13 = tpu.matmul %9, %12, %cst_7 {dimension_numbers = #tpu.dot_dimension_numbers<[1], [0], [0], [1], [0, 0, 1, 1], [], []>} : vector<8x4xbf16>, vector<4x324xbf16>, vector<8x324xf32> -> vector<8x324xf32>
    %14 = arith.addf %7, %13 : vector<8x324xf32>
    %c2 = arith.constant 2 : index
    %c0_8 = arith.constant 0 : index
    %c0_9 = arith.constant 0 : index
    %15 = vector.load %arg2[%c2, %c0_8, %c0_9] : memref<9x8x4xbf16, #tpu.memory_space<vmem>>, vector<1x8x4xbf16>
    %16 = vector.shape_cast %15 : vector<1x8x4xbf16> to vector<8x4xbf16>
    %17 = vector.extract_strided_slice %1 {offsets = [0, 307], sizes = [4, 17], strides = [1, 1]} : vector<4x324xbf16> to vector<4x17xbf16>
    %18 = vector.extract_strided_slice %1 {offsets = [0, 0], sizes = [4, 307], strides = [1, 1]} : vector<4x324xbf16> to vector<4x307xbf16>
    %19 = tpu.concatenate %17, %18 in 1 : vector<4x17xbf16>, vector<4x307xbf16> -> vector<4x324xbf16>
    %cst_10 = arith.constant dense<0.000000e+00> : vector<8x324xf32>
    %20 = tpu.matmul %16, %19, %cst_10 {dimension_numbers = #tpu.dot_dimension_numbers<[1], [0], [0], [1], [0, 0, 1, 1], [], []>} : vector<8x4xbf16>, vector<4x324xbf16>, vector<8x324xf32> -> vector<8x324xf32>
    %21 = arith.addf %14, %20 : vector<8x324xf32>
    %c3 = arith.constant 3 : index
    %c0_11 = arith.constant 0 : index
    %c0_12 = arith.constant 0 : index
    %22 = vector.load %arg2[%c3, %c0_11, %c0_12] : memref<9x8x4xbf16, #tpu.memory_space<vmem>>, vector<1x8x4xbf16>
    %23 = vector.shape_cast %22 : vector<1x8x4xbf16> to vector<8x4xbf16>
    %24 = vector.extract_strided_slice %1 {offsets = [0, 323], sizes = [4, 1], strides = [1, 1]} : vector<4x324xbf16> to vector<4x1xbf16>
    %25 = vector.extract_strided_slice %1 {offsets = [0, 0], sizes = [4, 323], strides = [1, 1]} : vector<4x324xbf16> to vector<4x323xbf16>
    %26 = tpu.concatenate %24, %25 in 1 : vector<4x1xbf16>, vector<4x323xbf16> -> vector<4x324xbf16>
    %cst_13 = arith.constant dense<0.000000e+00> : vector<8x324xf32>
    %27 = tpu.matmul %23, %26, %cst_13 {dimension_numbers = #tpu.dot_dimension_numbers<[1], [0], [0], [1], [0, 0, 1, 1], [], []>} : vector<8x4xbf16>, vector<4x324xbf16>, vector<8x324xf32> -> vector<8x324xf32>
    %28 = arith.addf %21, %27 : vector<8x324xf32>
    %c4 = arith.constant 4 : index
    %c0_14 = arith.constant 0 : index
    %c0_15 = arith.constant 0 : index
    %29 = vector.load %arg2[%c4, %c0_14, %c0_15] : memref<9x8x4xbf16, #tpu.memory_space<vmem>>, vector<1x8x4xbf16>
    %30 = vector.shape_cast %29 : vector<1x8x4xbf16> to vector<8x4xbf16>
    %cst_16 = arith.constant dense<0.000000e+00> : vector<8x324xf32>
    %31 = tpu.matmul %30, %1, %cst_16 {dimension_numbers = #tpu.dot_dimension_numbers<[1], [0], [0], [1], [0, 0, 1, 1], [], []>} : vector<8x4xbf16>, vector<4x324xbf16>, vector<8x324xf32> -> vector<8x324xf32>
    %32 = arith.addf %28, %31 : vector<8x324xf32>
    %c5 = arith.constant 5 : index
    %c0_17 = arith.constant 0 : index
    %c0_18 = arith.constant 0 : index
    %33 = vector.load %arg2[%c5, %c0_17, %c0_18] : memref<9x8x4xbf16, #tpu.memory_space<vmem>>, vector<1x8x4xbf16>
    %34 = vector.shape_cast %33 : vector<1x8x4xbf16> to vector<8x4xbf16>
    %35 = vector.extract_strided_slice %1 {offsets = [0, 1], sizes = [4, 323], strides = [1, 1]} : vector<4x324xbf16> to vector<4x323xbf16>
    %36 = vector.extract_strided_slice %1 {offsets = [0, 0], sizes = [4, 1], strides = [1, 1]} : vector<4x324xbf16> to vector<4x1xbf16>
    %37 = tpu.concatenate %35, %36 in 1 : vector<4x323xbf16>, vector<4x1xbf16> -> vector<4x324xbf16>
    %cst_19 = arith.constant dense<0.000000e+00> : vector<8x324xf32>
    %38 = tpu.matmul %34, %37, %cst_19 {dimension_numbers = #tpu.dot_dimension_numbers<[1], [0], [0], [1], [0, 0, 1, 1], [], []>} : vector<8x4xbf16>, vector<4x324xbf16>, vector<8x324xf32> -> vector<8x324xf32>
    %39 = arith.addf %32, %38 : vector<8x324xf32>
    %c6 = arith.constant 6 : index
    %c0_20 = arith.constant 0 : index
    %c0_21 = arith.constant 0 : index
    %40 = vector.load %arg2[%c6, %c0_20, %c0_21] : memref<9x8x4xbf16, #tpu.memory_space<vmem>>, vector<1x8x4xbf16>
    %41 = vector.shape_cast %40 : vector<1x8x4xbf16> to vector<8x4xbf16>
    %42 = vector.extract_strided_slice %1 {offsets = [0, 17], sizes = [4, 307], strides = [1, 1]} : vector<4x324xbf16> to vector<4x307xbf16>
    %43 = vector.extract_strided_slice %1 {offsets = [0, 0], sizes = [4, 17], strides = [1, 1]} : vector<4x324xbf16> to vector<4x17xbf16>
    %44 = tpu.concatenate %42, %43 in 1 : vector<4x307xbf16>, vector<4x17xbf16> -> vector<4x324xbf16>
    %cst_22 = arith.constant dense<0.000000e+00> : vector<8x324xf32>
    %45 = tpu.matmul %41, %44, %cst_22 {dimension_numbers = #tpu.dot_dimension_numbers<[1], [0], [0], [1], [0, 0, 1, 1], [], []>} : vector<8x4xbf16>, vector<4x324xbf16>, vector<8x324xf32> -> vector<8x324xf32>
    %46 = arith.addf %39, %45 : vector<8x324xf32>
    %c7 = arith.constant 7 : index
    %c0_23 = arith.constant 0 : index
    %c0_24 = arith.constant 0 : index
    %47 = vector.load %arg2[%c7, %c0_23, %c0_24] : memref<9x8x4xbf16, #tpu.memory_space<vmem>>, vector<1x8x4xbf16>
    %48 = vector.shape_cast %47 : vector<1x8x4xbf16> to vector<8x4xbf16>
    %49 = vector.extract_strided_slice %1 {offsets = [0, 18], sizes = [4, 306], strides = [1, 1]} : vector<4x324xbf16> to vector<4x306xbf16>
    %50 = vector.extract_strided_slice %1 {offsets = [0, 0], sizes = [4, 18], strides = [1, 1]} : vector<4x324xbf16> to vector<4x18xbf16>
    %51 = tpu.concatenate %49, %50 in 1 : vector<4x306xbf16>, vector<4x18xbf16> -> vector<4x324xbf16>
    %cst_25 = arith.constant dense<0.000000e+00> : vector<8x324xf32>
    %52 = tpu.matmul %48, %51, %cst_25 {dimension_numbers = #tpu.dot_dimension_numbers<[1], [0], [0], [1], [0, 0, 1, 1], [], []>} : vector<8x4xbf16>, vector<4x324xbf16>, vector<8x324xf32> -> vector<8x324xf32>
    %53 = arith.addf %46, %52 : vector<8x324xf32>
    %c8 = arith.constant 8 : index
    %c0_26 = arith.constant 0 : index
    %c0_27 = arith.constant 0 : index
    %54 = vector.load %arg2[%c8, %c0_26, %c0_27] : memref<9x8x4xbf16, #tpu.memory_space<vmem>>, vector<1x8x4xbf16>
    %55 = vector.shape_cast %54 : vector<1x8x4xbf16> to vector<8x4xbf16>
    %56 = vector.extract_strided_slice %1 {offsets = [0, 19], sizes = [4, 305], strides = [1, 1]} : vector<4x324xbf16> to vector<4x305xbf16>
    %57 = vector.extract_strided_slice %1 {offsets = [0, 0], sizes = [4, 19], strides = [1, 1]} : vector<4x324xbf16> to vector<4x19xbf16>
    %58 = tpu.concatenate %56, %57 in 1 : vector<4x305xbf16>, vector<4x19xbf16> -> vector<4x324xbf16>
    %cst_28 = arith.constant dense<0.000000e+00> : vector<8x324xf32>
    %59 = tpu.matmul %55, %58, %cst_28 {dimension_numbers = #tpu.dot_dimension_numbers<[1], [0], [0], [1], [0, 0, 1, 1], [], []>} : vector<8x4xbf16>, vector<4x324xbf16>, vector<8x324xf32> -> vector<8x324xf32>
    %60 = arith.addf %53, %59 : vector<8x324xf32>
    %c0_29 = arith.constant 0 : index
    %c0_30 = arith.constant 0 : index
    %61 = vector.load %arg3[%c0_29, %c0_30] : memref<8x1xf32, #tpu.memory_space<vmem>>, vector<8x1xf32>
    %62 = vector.broadcast %61 : vector<8x1xf32> to vector<8x324xf32>
    %63 = arith.addf %60, %62 : vector<8x324xf32>
    %cst_31 = arith.constant 0.000000e+00 : f32
    %64 = vector.broadcast %cst_31 : f32 to vector<8x324xf32>
    %65 = arith.maximumf %63, %64 : vector<8x324xf32>
    %66 = vector.extract_strided_slice %65 {offsets = [0, 1], sizes = [8, 323], strides = [1, 1]} : vector<8x324xf32> to vector<8x323xf32>
    %67 = vector.extract_strided_slice %65 {offsets = [0, 0], sizes = [8, 1], strides = [1, 1]} : vector<8x324xf32> to vector<8x1xf32>
    %68 = tpu.concatenate %66, %67 in 1 : vector<8x323xf32>, vector<8x1xf32> -> vector<8x324xf32>
    %69 = arith.maximumf %65, %68 : vector<8x324xf32>
    %70 = vector.extract_strided_slice %65 {offsets = [0, 18], sizes = [8, 306], strides = [1, 1]} : vector<8x324xf32> to vector<8x306xf32>
    %71 = vector.extract_strided_slice %65 {offsets = [0, 0], sizes = [8, 18], strides = [1, 1]} : vector<8x324xf32> to vector<8x18xf32>
    %72 = tpu.concatenate %70, %71 in 1 : vector<8x306xf32>, vector<8x18xf32> -> vector<8x324xf32>
    %73 = vector.extract_strided_slice %65 {offsets = [0, 19], sizes = [8, 305], strides = [1, 1]} : vector<8x324xf32> to vector<8x305xf32>
    %74 = vector.extract_strided_slice %65 {offsets = [0, 0], sizes = [8, 19], strides = [1, 1]} : vector<8x324xf32> to vector<8x19xf32>
    %75 = tpu.concatenate %73, %74 in 1 : vector<8x305xf32>, vector<8x19xf32> -> vector<8x324xf32>
    %76 = arith.maximumf %72, %75 : vector<8x324xf32>
    %77 = arith.maximumf %69, %76 : vector<8x324xf32>
    %c0_32 = arith.constant 0 : index
    %c0_33 = arith.constant 0 : index
    %78 = vector.load %arg4[%c0_32, %c0_33] : memref<324x100xf32, #tpu.memory_space<vmem>>, vector<324x100xf32>
    %cst_34 = arith.constant dense<0.000000e+00> : vector<8x100xf32>
    %79 = tpu.matmul %77, %78, %cst_34 {dimension_numbers = #tpu.dot_dimension_numbers<[1], [0], [0], [1], [0, 0, 1, 1], [], []>} : vector<8x324xf32>, vector<324x100xf32>, vector<8x100xf32> -> vector<8x100xf32>
    %80 = arith.truncf %79 : vector<8x100xf32> to vector<8x100xbf16>
    %c0_35 = arith.constant 0 : index
    %c0_36 = arith.constant 0 : index
    %c0_37 = arith.constant 0 : index
    %81 = vector.load %arg5[%c0_35, %c0_36, %c0_37] : memref<9x16x8xbf16, #tpu.memory_space<vmem>>, vector<1x16x8xbf16>
    %82 = vector.shape_cast %81 : vector<1x16x8xbf16> to vector<16x8xbf16>
    %83 = vector.extract_strided_slice %80 {offsets = [0, 89], sizes = [8, 11], strides = [1, 1]} : vector<8x100xbf16> to vector<8x11xbf16>
    %84 = vector.extract_strided_slice %80 {offsets = [0, 0], sizes = [8, 89], strides = [1, 1]} : vector<8x100xbf16> to vector<8x89xbf16>
    %85 = tpu.concatenate %83, %84 in 1 : vector<8x11xbf16>, vector<8x89xbf16> -> vector<8x100xbf16>
    %cst_38 = arith.constant dense<0.000000e+00> : vector<16x100xf32>
    %86 = tpu.matmul %82, %85, %cst_38 {dimension_numbers = #tpu.dot_dimension_numbers<[1], [0], [0], [1], [0, 0, 1, 1], [], []>} : vector<16x8xbf16>, vector<8x100xbf16>, vector<16x100xf32> -> vector<16x100xf32>
    %c1_39 = arith.constant 1 : index
    %c0_40 = arith.constant 0 : index
    %c0_41 = arith.constant 0 : index
    %87 = vector.load %arg5[%c1_39, %c0_40, %c0_41] : memref<9x16x8xbf16, #tpu.memory_space<vmem>>, vector<1x16x8xbf16>
    %88 = vector.shape_cast %87 : vector<1x16x8xbf16> to vector<16x8xbf16>
    %89 = vector.extract_strided_slice %80 {offsets = [0, 90], sizes = [8, 10], strides = [1, 1]} : vector<8x100xbf16> to vector<8x10xbf16>
    %90 = vector.extract_strided_slice %80 {offsets = [0, 0], sizes = [8, 90], strides = [1, 1]} : vector<8x100xbf16> to vector<8x90xbf16>
    %91 = tpu.concatenate %89, %90 in 1 : vector<8x10xbf16>, vector<8x90xbf16> -> vector<8x100xbf16>
    %cst_42 = arith.constant dense<0.000000e+00> : vector<16x100xf32>
    %92 = tpu.matmul %88, %91, %cst_42 {dimension_numbers = #tpu.dot_dimension_numbers<[1], [0], [0], [1], [0, 0, 1, 1], [], []>} : vector<16x8xbf16>, vector<8x100xbf16>, vector<16x100xf32> -> vector<16x100xf32>
    %93 = arith.addf %86, %92 : vector<16x100xf32>
    %c2_43 = arith.constant 2 : index
    %c0_44 = arith.constant 0 : index
    %c0_45 = arith.constant 0 : index
    %94 = vector.load %arg5[%c2_43, %c0_44, %c0_45] : memref<9x16x8xbf16, #tpu.memory_space<vmem>>, vector<1x16x8xbf16>
    %95 = vector.shape_cast %94 : vector<1x16x8xbf16> to vector<16x8xbf16>
    %96 = vector.extract_strided_slice %80 {offsets = [0, 91], sizes = [8, 9], strides = [1, 1]} : vector<8x100xbf16> to vector<8x9xbf16>
    %97 = vector.extract_strided_slice %80 {offsets = [0, 0], sizes = [8, 91], strides = [1, 1]} : vector<8x100xbf16> to vector<8x91xbf16>
    %98 = tpu.concatenate %96, %97 in 1 : vector<8x9xbf16>, vector<8x91xbf16> -> vector<8x100xbf16>
    %cst_46 = arith.constant dense<0.000000e+00> : vector<16x100xf32>
    %99 = tpu.matmul %95, %98, %cst_46 {dimension_numbers = #tpu.dot_dimension_numbers<[1], [0], [0], [1], [0, 0, 1, 1], [], []>} : vector<16x8xbf16>, vector<8x100xbf16>, vector<16x100xf32> -> vector<16x100xf32>
    %100 = arith.addf %93, %99 : vector<16x100xf32>
    %c3_47 = arith.constant 3 : index
    %c0_48 = arith.constant 0 : index
    %c0_49 = arith.constant 0 : index
    %101 = vector.load %arg5[%c3_47, %c0_48, %c0_49] : memref<9x16x8xbf16, #tpu.memory_space<vmem>>, vector<1x16x8xbf16>
    %102 = vector.shape_cast %101 : vector<1x16x8xbf16> to vector<16x8xbf16>
    %103 = vector.extract_strided_slice %80 {offsets = [0, 99], sizes = [8, 1], strides = [1, 1]} : vector<8x100xbf16> to vector<8x1xbf16>
    %104 = vector.extract_strided_slice %80 {offsets = [0, 0], sizes = [8, 99], strides = [1, 1]} : vector<8x100xbf16> to vector<8x99xbf16>
    %105 = tpu.concatenate %103, %104 in 1 : vector<8x1xbf16>, vector<8x99xbf16> -> vector<8x100xbf16>
    %cst_50 = arith.constant dense<0.000000e+00> : vector<16x100xf32>
    %106 = tpu.matmul %102, %105, %cst_50 {dimension_numbers = #tpu.dot_dimension_numbers<[1], [0], [0], [1], [0, 0, 1, 1], [], []>} : vector<16x8xbf16>, vector<8x100xbf16>, vector<16x100xf32> -> vector<16x100xf32>
    %107 = arith.addf %100, %106 : vector<16x100xf32>
    %c4_51 = arith.constant 4 : index
    %c0_52 = arith.constant 0 : index
    %c0_53 = arith.constant 0 : index
    %108 = vector.load %arg5[%c4_51, %c0_52, %c0_53] : memref<9x16x8xbf16, #tpu.memory_space<vmem>>, vector<1x16x8xbf16>
    %109 = vector.shape_cast %108 : vector<1x16x8xbf16> to vector<16x8xbf16>
    %cst_54 = arith.constant dense<0.000000e+00> : vector<16x100xf32>
    %110 = tpu.matmul %109, %80, %cst_54 {dimension_numbers = #tpu.dot_dimension_numbers<[1], [0], [0], [1], [0, 0, 1, 1], [], []>} : vector<16x8xbf16>, vector<8x100xbf16>, vector<16x100xf32> -> vector<16x100xf32>
    %111 = arith.addf %107, %110 : vector<16x100xf32>
    %c5_55 = arith.constant 5 : index
    %c0_56 = arith.constant 0 : index
    %c0_57 = arith.constant 0 : index
    %112 = vector.load %arg5[%c5_55, %c0_56, %c0_57] : memref<9x16x8xbf16, #tpu.memory_space<vmem>>, vector<1x16x8xbf16>
    %113 = vector.shape_cast %112 : vector<1x16x8xbf16> to vector<16x8xbf16>
    %114 = vector.extract_strided_slice %80 {offsets = [0, 1], sizes = [8, 99], strides = [1, 1]} : vector<8x100xbf16> to vector<8x99xbf16>
    %115 = vector.extract_strided_slice %80 {offsets = [0, 0], sizes = [8, 1], strides = [1, 1]} : vector<8x100xbf16> to vector<8x1xbf16>
    %116 = tpu.concatenate %114, %115 in 1 : vector<8x99xbf16>, vector<8x1xbf16> -> vector<8x100xbf16>
    %cst_58 = arith.constant dense<0.000000e+00> : vector<16x100xf32>
    %117 = tpu.matmul %113, %116, %cst_58 {dimension_numbers = #tpu.dot_dimension_numbers<[1], [0], [0], [1], [0, 0, 1, 1], [], []>} : vector<16x8xbf16>, vector<8x100xbf16>, vector<16x100xf32> -> vector<16x100xf32>
    %118 = arith.addf %111, %117 : vector<16x100xf32>
    %c6_59 = arith.constant 6 : index
    %c0_60 = arith.constant 0 : index
    %c0_61 = arith.constant 0 : index
    %119 = vector.load %arg5[%c6_59, %c0_60, %c0_61] : memref<9x16x8xbf16, #tpu.memory_space<vmem>>, vector<1x16x8xbf16>
    %120 = vector.shape_cast %119 : vector<1x16x8xbf16> to vector<16x8xbf16>
    %121 = vector.extract_strided_slice %80 {offsets = [0, 9], sizes = [8, 91], strides = [1, 1]} : vector<8x100xbf16> to vector<8x91xbf16>
    %122 = vector.extract_strided_slice %80 {offsets = [0, 0], sizes = [8, 9], strides = [1, 1]} : vector<8x100xbf16> to vector<8x9xbf16>
    %123 = tpu.concatenate %121, %122 in 1 : vector<8x91xbf16>, vector<8x9xbf16> -> vector<8x100xbf16>
    %cst_62 = arith.constant dense<0.000000e+00> : vector<16x100xf32>
    %124 = tpu.matmul %120, %123, %cst_62 {dimension_numbers = #tpu.dot_dimension_numbers<[1], [0], [0], [1], [0, 0, 1, 1], [], []>} : vector<16x8xbf16>, vector<8x100xbf16>, vector<16x100xf32> -> vector<16x100xf32>
    %125 = arith.addf %118, %124 : vector<16x100xf32>
    %c7_63 = arith.constant 7 : index
    %c0_64 = arith.constant 0 : index
    %c0_65 = arith.constant 0 : index
    %126 = vector.load %arg5[%c7_63, %c0_64, %c0_65] : memref<9x16x8xbf16, #tpu.memory_space<vmem>>, vector<1x16x8xbf16>
    %127 = vector.shape_cast %126 : vector<1x16x8xbf16> to vector<16x8xbf16>
    %128 = vector.extract_strided_slice %80 {offsets = [0, 10], sizes = [8, 90], strides = [1, 1]} : vector<8x100xbf16> to vector<8x90xbf16>
    %129 = vector.extract_strided_slice %80 {offsets = [0, 0], sizes = [8, 10], strides = [1, 1]} : vector<8x100xbf16> to vector<8x10xbf16>
    %130 = tpu.concatenate %128, %129 in 1 : vector<8x90xbf16>, vector<8x10xbf16> -> vector<8x100xbf16>
    %cst_66 = arith.constant dense<0.000000e+00> : vector<16x100xf32>
    %131 = tpu.matmul %127, %130, %cst_66 {dimension_numbers = #tpu.dot_dimension_numbers<[1], [0], [0], [1], [0, 0, 1, 1], [], []>} : vector<16x8xbf16>, vector<8x100xbf16>, vector<16x100xf32> -> vector<16x100xf32>
    %132 = arith.addf %125, %131 : vector<16x100xf32>
    %c8_67 = arith.constant 8 : index
    %c0_68 = arith.constant 0 : index
    %c0_69 = arith.constant 0 : index
    %133 = vector.load %arg5[%c8_67, %c0_68, %c0_69] : memref<9x16x8xbf16, #tpu.memory_space<vmem>>, vector<1x16x8xbf16>
    %134 = vector.shape_cast %133 : vector<1x16x8xbf16> to vector<16x8xbf16>
    %135 = vector.extract_strided_slice %80 {offsets = [0, 11], sizes = [8, 89], strides = [1, 1]} : vector<8x100xbf16> to vector<8x89xbf16>
    %136 = vector.extract_strided_slice %80 {offsets = [0, 0], sizes = [8, 11], strides = [1, 1]} : vector<8x100xbf16> to vector<8x11xbf16>
    %137 = tpu.concatenate %135, %136 in 1 : vector<8x89xbf16>, vector<8x11xbf16> -> vector<8x100xbf16>
    %cst_70 = arith.constant dense<0.000000e+00> : vector<16x100xf32>
    %138 = tpu.matmul %134, %137, %cst_70 {dimension_numbers = #tpu.dot_dimension_numbers<[1], [0], [0], [1], [0, 0, 1, 1], [], []>} : vector<16x8xbf16>, vector<8x100xbf16>, vector<16x100xf32> -> vector<16x100xf32>
    %139 = arith.addf %132, %138 : vector<16x100xf32>
    %c0_71 = arith.constant 0 : index
    %c0_72 = arith.constant 0 : index
    %140 = vector.load %arg6[%c0_71, %c0_72] : memref<16x1xf32, #tpu.memory_space<vmem>>, vector<16x1xf32>
    %141 = vector.broadcast %140 : vector<16x1xf32> to vector<16x100xf32>
    %142 = arith.addf %139, %141 : vector<16x100xf32>
    %cst_73 = arith.constant 0.000000e+00 : f32
    %143 = vector.broadcast %cst_73 : f32 to vector<16x100xf32>
    %144 = arith.maximumf %142, %143 : vector<16x100xf32>
    %145 = vector.extract_strided_slice %144 {offsets = [0, 1], sizes = [16, 99], strides = [1, 1]} : vector<16x100xf32> to vector<16x99xf32>
    %146 = vector.extract_strided_slice %144 {offsets = [0, 0], sizes = [16, 1], strides = [1, 1]} : vector<16x100xf32> to vector<16x1xf32>
    %147 = tpu.concatenate %145, %146 in 1 : vector<16x99xf32>, vector<16x1xf32> -> vector<16x100xf32>
    %148 = arith.maximumf %144, %147 : vector<16x100xf32>
    %149 = vector.extract_strided_slice %144 {offsets = [0, 10], sizes = [16, 90], strides = [1, 1]} : vector<16x100xf32> to vector<16x90xf32>
    %150 = vector.extract_strided_slice %144 {offsets = [0, 0], sizes = [16, 10], strides = [1, 1]} : vector<16x100xf32> to vector<16x10xf32>
    %151 = tpu.concatenate %149, %150 in 1 : vector<16x90xf32>, vector<16x10xf32> -> vector<16x100xf32>
    %152 = vector.extract_strided_slice %144 {offsets = [0, 11], sizes = [16, 89], strides = [1, 1]} : vector<16x100xf32> to vector<16x89xf32>
    %153 = vector.extract_strided_slice %144 {offsets = [0, 0], sizes = [16, 11], strides = [1, 1]} : vector<16x100xf32> to vector<16x11xf32>
    %154 = tpu.concatenate %152, %153 in 1 : vector<16x89xf32>, vector<16x11xf32> -> vector<16x100xf32>
    %155 = arith.maximumf %151, %154 : vector<16x100xf32>
    %156 = arith.maximumf %148, %155 : vector<16x100xf32>
    %157 = arith.truncf %156 : vector<16x100xf32> to vector<16x100xbf16>
    %c0_74 = arith.constant 0 : index
    %c0_75 = arith.constant 0 : index
    %158 = vector.load %arg8[%c0_74, %c0_75] : memref<1x32xf32, #tpu.memory_space<vmem>>, vector<1x32xf32>
    %159 = vector.extract_strided_slice %157 {offsets = [0, 0], sizes = [1, 100], strides = [1, 1]} : vector<16x100xbf16> to vector<1x100xbf16>
    %c0_76 = arith.constant 0 : index
    %c0_77 = arith.constant 0 : index
    %c0_78 = arith.constant 0 : index
    %160 = vector.load %arg7[%c0_76, %c0_77, %c0_78] : memref<16x100x32xbf16, #tpu.memory_space<vmem>>, vector<1x100x32xbf16>
    %161 = vector.shape_cast %160 : vector<1x100x32xbf16> to vector<100x32xbf16>
    %cst_79 = arith.constant dense<0.000000e+00> : vector<1x32xf32>
    %162 = tpu.matmul %159, %161, %cst_79 {dimension_numbers = #tpu.dot_dimension_numbers<[1], [0], [0], [1], [0, 0, 1, 1], [], []>} : vector<1x100xbf16>, vector<100x32xbf16>, vector<1x32xf32> -> vector<1x32xf32>
    %163 = arith.addf %158, %162 : vector<1x32xf32>
    %164 = vector.extract_strided_slice %157 {offsets = [1, 0], sizes = [1, 100], strides = [1, 1]} : vector<16x100xbf16> to vector<1x100xbf16>
    %c1_80 = arith.constant 1 : index
    %c0_81 = arith.constant 0 : index
    %c0_82 = arith.constant 0 : index
    %165 = vector.load %arg7[%c1_80, %c0_81, %c0_82] : memref<16x100x32xbf16, #tpu.memory_space<vmem>>, vector<1x100x32xbf16>
    %166 = vector.shape_cast %165 : vector<1x100x32xbf16> to vector<100x32xbf16>
    %cst_83 = arith.constant dense<0.000000e+00> : vector<1x32xf32>
    %167 = tpu.matmul %164, %166, %cst_83 {dimension_numbers = #tpu.dot_dimension_numbers<[1], [0], [0], [1], [0, 0, 1, 1], [], []>} : vector<1x100xbf16>, vector<100x32xbf16>, vector<1x32xf32> -> vector<1x32xf32>
    %168 = arith.addf %163, %167 : vector<1x32xf32>
    %169 = vector.extract_strided_slice %157 {offsets = [2, 0], sizes = [1, 100], strides = [1, 1]} : vector<16x100xbf16> to vector<1x100xbf16>
    %c2_84 = arith.constant 2 : index
    %c0_85 = arith.constant 0 : index
    %c0_86 = arith.constant 0 : index
    %170 = vector.load %arg7[%c2_84, %c0_85, %c0_86] : memref<16x100x32xbf16, #tpu.memory_space<vmem>>, vector<1x100x32xbf16>
    %171 = vector.shape_cast %170 : vector<1x100x32xbf16> to vector<100x32xbf16>
    %cst_87 = arith.constant dense<0.000000e+00> : vector<1x32xf32>
    %172 = tpu.matmul %169, %171, %cst_87 {dimension_numbers = #tpu.dot_dimension_numbers<[1], [0], [0], [1], [0, 0, 1, 1], [], []>} : vector<1x100xbf16>, vector<100x32xbf16>, vector<1x32xf32> -> vector<1x32xf32>
    %173 = arith.addf %168, %172 : vector<1x32xf32>
    %174 = vector.extract_strided_slice %157 {offsets = [3, 0], sizes = [1, 100], strides = [1, 1]} : vector<16x100xbf16> to vector<1x100xbf16>
    %c3_88 = arith.constant 3 : index
    %c0_89 = arith.constant 0 : index
    %c0_90 = arith.constant 0 : index
    %175 = vector.load %arg7[%c3_88, %c0_89, %c0_90] : memref<16x100x32xbf16, #tpu.memory_space<vmem>>, vector<1x100x32xbf16>
    %176 = vector.shape_cast %175 : vector<1x100x32xbf16> to vector<100x32xbf16>
    %cst_91 = arith.constant dense<0.000000e+00> : vector<1x32xf32>
    %177 = tpu.matmul %174, %176, %cst_91 {dimension_numbers = #tpu.dot_dimension_numbers<[1], [0], [0], [1], [0, 0, 1, 1], [], []>} : vector<1x100xbf16>, vector<100x32xbf16>, vector<1x32xf32> -> vector<1x32xf32>
    %178 = arith.addf %173, %177 : vector<1x32xf32>
    %179 = vector.extract_strided_slice %157 {offsets = [4, 0], sizes = [1, 100], strides = [1, 1]} : vector<16x100xbf16> to vector<1x100xbf16>
    %c4_92 = arith.constant 4 : index
    %c0_93 = arith.constant 0 : index
    %c0_94 = arith.constant 0 : index
    %180 = vector.load %arg7[%c4_92, %c0_93, %c0_94] : memref<16x100x32xbf16, #tpu.memory_space<vmem>>, vector<1x100x32xbf16>
    %181 = vector.shape_cast %180 : vector<1x100x32xbf16> to vector<100x32xbf16>
    %cst_95 = arith.constant dense<0.000000e+00> : vector<1x32xf32>
    %182 = tpu.matmul %179, %181, %cst_95 {dimension_numbers = #tpu.dot_dimension_numbers<[1], [0], [0], [1], [0, 0, 1, 1], [], []>} : vector<1x100xbf16>, vector<100x32xbf16>, vector<1x32xf32> -> vector<1x32xf32>
    %183 = arith.addf %178, %182 : vector<1x32xf32>
    %184 = vector.extract_strided_slice %157 {offsets = [5, 0], sizes = [1, 100], strides = [1, 1]} : vector<16x100xbf16> to vector<1x100xbf16>
    %c5_96 = arith.constant 5 : index
    %c0_97 = arith.constant 0 : index
    %c0_98 = arith.constant 0 : index
    %185 = vector.load %arg7[%c5_96, %c0_97, %c0_98] : memref<16x100x32xbf16, #tpu.memory_space<vmem>>, vector<1x100x32xbf16>
    %186 = vector.shape_cast %185 : vector<1x100x32xbf16> to vector<100x32xbf16>
    %cst_99 = arith.constant dense<0.000000e+00> : vector<1x32xf32>
    %187 = tpu.matmul %184, %186, %cst_99 {dimension_numbers = #tpu.dot_dimension_numbers<[1], [0], [0], [1], [0, 0, 1, 1], [], []>} : vector<1x100xbf16>, vector<100x32xbf16>, vector<1x32xf32> -> vector<1x32xf32>
    %188 = arith.addf %183, %187 : vector<1x32xf32>
    %189 = vector.extract_strided_slice %157 {offsets = [6, 0], sizes = [1, 100], strides = [1, 1]} : vector<16x100xbf16> to vector<1x100xbf16>
    %c6_100 = arith.constant 6 : index
    %c0_101 = arith.constant 0 : index
    %c0_102 = arith.constant 0 : index
    %190 = vector.load %arg7[%c6_100, %c0_101, %c0_102] : memref<16x100x32xbf16, #tpu.memory_space<vmem>>, vector<1x100x32xbf16>
    %191 = vector.shape_cast %190 : vector<1x100x32xbf16> to vector<100x32xbf16>
    %cst_103 = arith.constant dense<0.000000e+00> : vector<1x32xf32>
    %192 = tpu.matmul %189, %191, %cst_103 {dimension_numbers = #tpu.dot_dimension_numbers<[1], [0], [0], [1], [0, 0, 1, 1], [], []>} : vector<1x100xbf16>, vector<100x32xbf16>, vector<1x32xf32> -> vector<1x32xf32>
    %193 = arith.addf %188, %192 : vector<1x32xf32>
    %194 = vector.extract_strided_slice %157 {offsets = [7, 0], sizes = [1, 100], strides = [1, 1]} : vector<16x100xbf16> to vector<1x100xbf16>
    %c7_104 = arith.constant 7 : index
    %c0_105 = arith.constant 0 : index
    %c0_106 = arith.constant 0 : index
    %195 = vector.load %arg7[%c7_104, %c0_105, %c0_106] : memref<16x100x32xbf16, #tpu.memory_space<vmem>>, vector<1x100x32xbf16>
    %196 = vector.shape_cast %195 : vector<1x100x32xbf16> to vector<100x32xbf16>
    %cst_107 = arith.constant dense<0.000000e+00> : vector<1x32xf32>
    %197 = tpu.matmul %194, %196, %cst_107 {dimension_numbers = #tpu.dot_dimension_numbers<[1], [0], [0], [1], [0, 0, 1, 1], [], []>} : vector<1x100xbf16>, vector<100x32xbf16>, vector<1x32xf32> -> vector<1x32xf32>
    %198 = arith.addf %193, %197 : vector<1x32xf32>
    %199 = vector.extract_strided_slice %157 {offsets = [8, 0], sizes = [1, 100], strides = [1, 1]} : vector<16x100xbf16> to vector<1x100xbf16>
    %c8_108 = arith.constant 8 : index
    %c0_109 = arith.constant 0 : index
    %c0_110 = arith.constant 0 : index
    %200 = vector.load %arg7[%c8_108, %c0_109, %c0_110] : memref<16x100x32xbf16, #tpu.memory_space<vmem>>, vector<1x100x32xbf16>
    %201 = vector.shape_cast %200 : vector<1x100x32xbf16> to vector<100x32xbf16>
    %cst_111 = arith.constant dense<0.000000e+00> : vector<1x32xf32>
    %202 = tpu.matmul %199, %201, %cst_111 {dimension_numbers = #tpu.dot_dimension_numbers<[1], [0], [0], [1], [0, 0, 1, 1], [], []>} : vector<1x100xbf16>, vector<100x32xbf16>, vector<1x32xf32> -> vector<1x32xf32>
    %203 = arith.addf %198, %202 : vector<1x32xf32>
    %204 = vector.extract_strided_slice %157 {offsets = [9, 0], sizes = [1, 100], strides = [1, 1]} : vector<16x100xbf16> to vector<1x100xbf16>
    %c9 = arith.constant 9 : index
    %c0_112 = arith.constant 0 : index
    %c0_113 = arith.constant 0 : index
    %205 = vector.load %arg7[%c9, %c0_112, %c0_113] : memref<16x100x32xbf16, #tpu.memory_space<vmem>>, vector<1x100x32xbf16>
    %206 = vector.shape_cast %205 : vector<1x100x32xbf16> to vector<100x32xbf16>
    %cst_114 = arith.constant dense<0.000000e+00> : vector<1x32xf32>
    %207 = tpu.matmul %204, %206, %cst_114 {dimension_numbers = #tpu.dot_dimension_numbers<[1], [0], [0], [1], [0, 0, 1, 1], [], []>} : vector<1x100xbf16>, vector<100x32xbf16>, vector<1x32xf32> -> vector<1x32xf32>
    %208 = arith.addf %203, %207 : vector<1x32xf32>
    %209 = vector.extract_strided_slice %157 {offsets = [10, 0], sizes = [1, 100], strides = [1, 1]} : vector<16x100xbf16> to vector<1x100xbf16>
    %c10 = arith.constant 10 : index
    %c0_115 = arith.constant 0 : index
    %c0_116 = arith.constant 0 : index
    %210 = vector.load %arg7[%c10, %c0_115, %c0_116] : memref<16x100x32xbf16, #tpu.memory_space<vmem>>, vector<1x100x32xbf16>
    %211 = vector.shape_cast %210 : vector<1x100x32xbf16> to vector<100x32xbf16>
    %cst_117 = arith.constant dense<0.000000e+00> : vector<1x32xf32>
    %212 = tpu.matmul %209, %211, %cst_117 {dimension_numbers = #tpu.dot_dimension_numbers<[1], [0], [0], [1], [0, 0, 1, 1], [], []>} : vector<1x100xbf16>, vector<100x32xbf16>, vector<1x32xf32> -> vector<1x32xf32>
    %213 = arith.addf %208, %212 : vector<1x32xf32>
    %214 = vector.extract_strided_slice %157 {offsets = [11, 0], sizes = [1, 100], strides = [1, 1]} : vector<16x100xbf16> to vector<1x100xbf16>
    %c11 = arith.constant 11 : index
    %c0_118 = arith.constant 0 : index
    %c0_119 = arith.constant 0 : index
    %215 = vector.load %arg7[%c11, %c0_118, %c0_119] : memref<16x100x32xbf16, #tpu.memory_space<vmem>>, vector<1x100x32xbf16>
    %216 = vector.shape_cast %215 : vector<1x100x32xbf16> to vector<100x32xbf16>
    %cst_120 = arith.constant dense<0.000000e+00> : vector<1x32xf32>
    %217 = tpu.matmul %214, %216, %cst_120 {dimension_numbers = #tpu.dot_dimension_numbers<[1], [0], [0], [1], [0, 0, 1, 1], [], []>} : vector<1x100xbf16>, vector<100x32xbf16>, vector<1x32xf32> -> vector<1x32xf32>
    %218 = arith.addf %213, %217 : vector<1x32xf32>
    %219 = vector.extract_strided_slice %157 {offsets = [12, 0], sizes = [1, 100], strides = [1, 1]} : vector<16x100xbf16> to vector<1x100xbf16>
    %c12 = arith.constant 12 : index
    %c0_121 = arith.constant 0 : index
    %c0_122 = arith.constant 0 : index
    %220 = vector.load %arg7[%c12, %c0_121, %c0_122] : memref<16x100x32xbf16, #tpu.memory_space<vmem>>, vector<1x100x32xbf16>
    %221 = vector.shape_cast %220 : vector<1x100x32xbf16> to vector<100x32xbf16>
    %cst_123 = arith.constant dense<0.000000e+00> : vector<1x32xf32>
    %222 = tpu.matmul %219, %221, %cst_123 {dimension_numbers = #tpu.dot_dimension_numbers<[1], [0], [0], [1], [0, 0, 1, 1], [], []>} : vector<1x100xbf16>, vector<100x32xbf16>, vector<1x32xf32> -> vector<1x32xf32>
    %223 = arith.addf %218, %222 : vector<1x32xf32>
    %224 = vector.extract_strided_slice %157 {offsets = [13, 0], sizes = [1, 100], strides = [1, 1]} : vector<16x100xbf16> to vector<1x100xbf16>
    %c13 = arith.constant 13 : index
    %c0_124 = arith.constant 0 : index
    %c0_125 = arith.constant 0 : index
    %225 = vector.load %arg7[%c13, %c0_124, %c0_125] : memref<16x100x32xbf16, #tpu.memory_space<vmem>>, vector<1x100x32xbf16>
    %226 = vector.shape_cast %225 : vector<1x100x32xbf16> to vector<100x32xbf16>
    %cst_126 = arith.constant dense<0.000000e+00> : vector<1x32xf32>
    %227 = tpu.matmul %224, %226, %cst_126 {dimension_numbers = #tpu.dot_dimension_numbers<[1], [0], [0], [1], [0, 0, 1, 1], [], []>} : vector<1x100xbf16>, vector<100x32xbf16>, vector<1x32xf32> -> vector<1x32xf32>
    %228 = arith.addf %223, %227 : vector<1x32xf32>
    %229 = vector.extract_strided_slice %157 {offsets = [14, 0], sizes = [1, 100], strides = [1, 1]} : vector<16x100xbf16> to vector<1x100xbf16>
    %c14 = arith.constant 14 : index
    %c0_127 = arith.constant 0 : index
    %c0_128 = arith.constant 0 : index
    %230 = vector.load %arg7[%c14, %c0_127, %c0_128] : memref<16x100x32xbf16, #tpu.memory_space<vmem>>, vector<1x100x32xbf16>
    %231 = vector.shape_cast %230 : vector<1x100x32xbf16> to vector<100x32xbf16>
    %cst_129 = arith.constant dense<0.000000e+00> : vector<1x32xf32>
    %232 = tpu.matmul %229, %231, %cst_129 {dimension_numbers = #tpu.dot_dimension_numbers<[1], [0], [0], [1], [0, 0, 1, 1], [], []>} : vector<1x100xbf16>, vector<100x32xbf16>, vector<1x32xf32> -> vector<1x32xf32>
    %233 = arith.addf %228, %232 : vector<1x32xf32>
    %234 = vector.extract_strided_slice %157 {offsets = [15, 0], sizes = [1, 100], strides = [1, 1]} : vector<16x100xbf16> to vector<1x100xbf16>
    %c15 = arith.constant 15 : index
    %c0_130 = arith.constant 0 : index
    %c0_131 = arith.constant 0 : index
    %235 = vector.load %arg7[%c15, %c0_130, %c0_131] : memref<16x100x32xbf16, #tpu.memory_space<vmem>>, vector<1x100x32xbf16>
    %236 = vector.shape_cast %235 : vector<1x100x32xbf16> to vector<100x32xbf16>
    %cst_132 = arith.constant dense<0.000000e+00> : vector<1x32xf32>
    %237 = tpu.matmul %234, %236, %cst_132 {dimension_numbers = #tpu.dot_dimension_numbers<[1], [0], [0], [1], [0, 0, 1, 1], [], []>} : vector<1x100xbf16>, vector<100x32xbf16>, vector<1x32xf32> -> vector<1x32xf32>
    %238 = arith.addf %233, %237 : vector<1x32xf32>
    %239 = arith.truncf %238 : vector<1x32xf32> to vector<1x32xbf16>
    %c0_133 = arith.constant 0 : index
    %c0_134 = arith.constant 0 : index
    %240 = vector.load %arg9[%c0_133, %c0_134] : memref<32x936xbf16, #tpu.memory_space<vmem>>, vector<32x936xbf16>
    %cst_135 = arith.constant dense<0.000000e+00> : vector<1x936xf32>
    %241 = tpu.matmul %239, %240, %cst_135 {dimension_numbers = #tpu.dot_dimension_numbers<[1], [0], [0], [1], [0, 0, 1, 1], [], []>} : vector<1x32xbf16>, vector<32x936xbf16>, vector<1x936xf32> -> vector<1x936xf32>
    %c0_136 = arith.constant 0 : index
    %c0_137 = arith.constant 0 : index
    %242 = vector.load %arg10[%c0_136, %c0_137] : memref<1x936xf32, #tpu.memory_space<vmem>>, vector<1x936xf32>
    %243 = arith.addf %241, %242 : vector<1x936xf32>
    %cst_138 = arith.constant 0.000000e+00 : f32
    %244 = vector.broadcast %cst_138 : f32 to vector<1x936xf32>
    %245 = arith.maximumf %243, %244 : vector<1x936xf32>
    %246 = arith.truncf %245 : vector<1x936xf32> to vector<1x936xbf16>
    %c0_139 = arith.constant 0 : index
    %c0_140 = arith.constant 0 : index
    %c0_141 = arith.constant 0 : index
    %247 = vector.load %arg11[%c0_139, %c0_140, %c0_141] : memref<1x1x936xbf16, #tpu.memory_space<vmem>>, vector<1x1x936xbf16>
    %248 = vector.shape_cast %247 : vector<1x1x936xbf16> to vector<1x936xbf16>
    %249 = vector.shape_cast %246 : vector<1x936xbf16> to vector<1x1x936xbf16>
    tpu.vector_store %arg11[%c0_139, %c0_140, %c0_141], %249 {strides = array<i32>} : memref<1x1x936xbf16, #tpu.memory_space<vmem>>, vector<1x1x936xbf16>,
    return
  }
  func.func @transform_0(%arg0: i32) -> (i32, i32, i32) {
    %c0_i32 = arith.constant 0 : i32
    %c0_i32_0 = arith.constant 0 : i32
    %c0_i32_1 = arith.constant 0 : i32
    return %arg0, %c0_i32, %c0_i32_0 : i32, i32, i32
  }
  func.func @transform_1(%arg0: i32) -> (i32, i32, i32) {
    %c0_i32 = arith.constant 0 : i32
    %c0_i32_0 = arith.constant 0 : i32
    %c0_i32_1 = arith.constant 0 : i32
    %c0_i32_2 = arith.constant 0 : i32
    return %c0_i32, %c0_i32_0, %c0_i32_1 : i32, i32, i32
  }
  func.func @transform_2(%arg0: i32) -> (i32, i32) {
    %c0_i32 = arith.constant 0 : i32
    %c0_i32_0 = arith.constant 0 : i32
    %c0_i32_1 = arith.constant 0 : i32
    return %c0_i32, %c0_i32_0 : i32, i32
  }
  func.func @transform_3(%arg0: i32) -> (i32, i32) {
    %c0_i32 = arith.constant 0 : i32
    %c0_i32_0 = arith.constant 0 : i32
    %c0_i32_1 = arith.constant 0 : i32
    return %c0_i32, %c0_i32_0 : i32, i32
  }
  func.func @transform_4(%arg0: i32) -> (i32, i32, i32) {
    %c0_i32 = arith.constant 0 : i32
    %c0_i32_0 = arith.constant 0 : i32
    %c0_i32_1 = arith.constant 0 : i32
    %c0_i32_2 = arith.constant 0 : i32
    return %c0_i32, %c0_i32_0, %c0_i32_1 : i32, i32, i32
  }
  func.func @transform_5(%arg0: i32) -> (i32, i32) {
    %c0_i32 = arith.constant 0 : i32
    %c0_i32_0 = arith.constant 0 : i32
    %c0_i32_1 = arith.constant 0 : i32
    return %c0_i32, %c0_i32_0 : i32, i32
  }
  func.func @transform_6(%arg0: i32) -> (i32, i32, i32) {
    %c0_i32 = arith.constant 0 : i32
    %c0_i32_0 = arith.constant 0 : i32
    %c0_i32_1 = arith.constant 0 : i32
    %c0_i32_2 = arith.constant 0 : i32
    return %c0_i32, %c0_i32_0, %c0_i32_1 : i32, i32, i32
  }
  func.func @transform_7(%arg0: i32) -> (i32, i32) {
    %c0_i32 = arith.constant 0 : i32
    %c0_i32_0 = arith.constant 0 : i32
    %c0_i32_1 = arith.constant 0 : i32
    return %c0_i32, %c0_i32_0 : i32, i32
  }
  func.func @transform_8(%arg0: i32) -> (i32, i32) {
    %c0_i32 = arith.constant 0 : i32
    %c0_i32_0 = arith.constant 0 : i32
    %c0_i32_1 = arith.constant 0 : i32
    return %c0_i32, %c0_i32_0 : i32, i32
  }
  func.func @transform_9(%arg0: i32) -> (i32, i32) {
    %c0_i32 = arith.constant 0 : i32
    %c0_i32_0 = arith.constant 0 : i32
    %c0_i32_1 = arith.constant 0 : i32
    return %c0_i32, %c0_i32_0 : i32, i32
  }
  func.func @transform_10(%arg0: i32) -> (i32, i32, i32) {
    %c0_i32 = arith.constant 0 : i32
    %c0_i32_0 = arith.constant 0 : i32
    %c0_i32_1 = arith.constant 0 : i32
    return %arg0, %c0_i32, %c0_i32_0 : i32, i32, i32
  }
}

module attributes {stable_mosaic.version = 11 : i64} {
  func.func @_decoder_kernel(%arg0: i32, %arg1: memref<1x26x36xbf16, #tpu.memory_space<vmem>>, %arg2: memref<16x13x26xbf16, #tpu.memory_space<vmem>>, %arg3: memref<13x1xf32, #tpu.memory_space<vmem>>, %arg4: memref<4x36x100xf32, #tpu.memory_space<vmem>>, %arg5: memref<16x4x13xbf16, #tpu.memory_space<vmem>>, %arg6: memref<4x1xf32, #tpu.memory_space<vmem>>, %arg7: memref<4x100x256xf32, #tpu.memory_space<vmem>>, %arg8: memref<1x4x256xf32, #tpu.memory_space<vmem>>) attributes {dimension_semantics = [#tpu.dimension_semantics<parallel>], iteration_bounds = array<i64: 2>, scalar_prefetch = 0 : i64, scratch_operands = 0 : i64, tpu.core_type = #tpu.core_type<tc>, window_params = [{transform_indices = @transform_0, window_bounds = array<i64: 1, 26, 36>}, {pipeline_mode = #tpu.pipeline_mode<synchronous>, transform_indices = @transform_1, window_bounds = array<i64: 16, 13, 26>}, {pipeline_mode = #tpu.pipeline_mode<synchronous>, transform_indices = @transform_2, window_bounds = array<i64: 13, 1>}, {pipeline_mode = #tpu.pipeline_mode<synchronous>, transform_indices = @transform_3, window_bounds = array<i64: 4, 36, 100>}, {pipeline_mode = #tpu.pipeline_mode<synchronous>, transform_indices = @transform_4, window_bounds = array<i64: 16, 4, 13>}, {pipeline_mode = #tpu.pipeline_mode<synchronous>, transform_indices = @transform_5, window_bounds = array<i64: 4, 1>}, {pipeline_mode = #tpu.pipeline_mode<synchronous>, transform_indices = @transform_6, window_bounds = array<i64: 4, 100, 256>}, {transform_indices = @transform_7, window_bounds = array<i64: 1, 4, 256>}]} {
    %c0 = arith.constant 0 : index
    %c0_0 = arith.constant 0 : index
    %c0_1 = arith.constant 0 : index
    %0 = vector.load %arg1[%c0, %c0_0, %c0_1] : memref<1x26x36xbf16, #tpu.memory_space<vmem>>, vector<1x26x36xbf16>
    %1 = vector.shape_cast %0 : vector<1x26x36xbf16> to vector<26x36xbf16>
    %2 = vector.extract_strided_slice %1 {offsets = [0, 29], sizes = [26, 7], strides = [1, 1]} : vector<26x36xbf16> to vector<26x7xbf16>
    %3 = vector.extract_strided_slice %1 {offsets = [0, 0], sizes = [26, 29], strides = [1, 1]} : vector<26x36xbf16> to vector<26x29xbf16>
    %4 = tpu.concatenate %2, %3 in 1 : vector<26x7xbf16>, vector<26x29xbf16> -> vector<26x36xbf16>
    %5 = vector.extract_strided_slice %1 {offsets = [0, 30], sizes = [26, 6], strides = [1, 1]} : vector<26x36xbf16> to vector<26x6xbf16>
    %6 = vector.extract_strided_slice %1 {offsets = [0, 0], sizes = [26, 30], strides = [1, 1]} : vector<26x36xbf16> to vector<26x30xbf16>
    %7 = tpu.concatenate %5, %6 in 1 : vector<26x6xbf16>, vector<26x30xbf16> -> vector<26x36xbf16>
    %8 = vector.extract_strided_slice %1 {offsets = [0, 31], sizes = [26, 5], strides = [1, 1]} : vector<26x36xbf16> to vector<26x5xbf16>
    %9 = vector.extract_strided_slice %1 {offsets = [0, 0], sizes = [26, 31], strides = [1, 1]} : vector<26x36xbf16> to vector<26x31xbf16>
    %10 = tpu.concatenate %8, %9 in 1 : vector<26x5xbf16>, vector<26x31xbf16> -> vector<26x36xbf16>
    %11 = vector.extract_strided_slice %1 {offsets = [0, 35], sizes = [26, 1], strides = [1, 1]} : vector<26x36xbf16> to vector<26x1xbf16>
    %12 = vector.extract_strided_slice %1 {offsets = [0, 0], sizes = [26, 35], strides = [1, 1]} : vector<26x36xbf16> to vector<26x35xbf16>
    %13 = tpu.concatenate %11, %12 in 1 : vector<26x1xbf16>, vector<26x35xbf16> -> vector<26x36xbf16>
    %14 = vector.extract_strided_slice %1 {offsets = [0, 1], sizes = [26, 35], strides = [1, 1]} : vector<26x36xbf16> to vector<26x35xbf16>
    %15 = vector.extract_strided_slice %1 {offsets = [0, 0], sizes = [26, 1], strides = [1, 1]} : vector<26x36xbf16> to vector<26x1xbf16>
    %16 = tpu.concatenate %14, %15 in 1 : vector<26x35xbf16>, vector<26x1xbf16> -> vector<26x36xbf16>
    %17 = vector.extract_strided_slice %1 {offsets = [0, 5], sizes = [26, 31], strides = [1, 1]} : vector<26x36xbf16> to vector<26x31xbf16>
    %18 = vector.extract_strided_slice %1 {offsets = [0, 0], sizes = [26, 5], strides = [1, 1]} : vector<26x36xbf16> to vector<26x5xbf16>
    %19 = tpu.concatenate %17, %18 in 1 : vector<26x31xbf16>, vector<26x5xbf16> -> vector<26x36xbf16>
    %20 = vector.extract_strided_slice %1 {offsets = [0, 6], sizes = [26, 30], strides = [1, 1]} : vector<26x36xbf16> to vector<26x30xbf16>
    %21 = vector.extract_strided_slice %1 {offsets = [0, 0], sizes = [26, 6], strides = [1, 1]} : vector<26x36xbf16> to vector<26x6xbf16>
    %22 = tpu.concatenate %20, %21 in 1 : vector<26x30xbf16>, vector<26x6xbf16> -> vector<26x36xbf16>
    %23 = vector.extract_strided_slice %1 {offsets = [0, 7], sizes = [26, 29], strides = [1, 1]} : vector<26x36xbf16> to vector<26x29xbf16>
    %24 = vector.extract_strided_slice %1 {offsets = [0, 0], sizes = [26, 7], strides = [1, 1]} : vector<26x36xbf16> to vector<26x7xbf16>
    %25 = tpu.concatenate %23, %24 in 1 : vector<26x29xbf16>, vector<26x7xbf16> -> vector<26x36xbf16>
    %cst = arith.constant 0.000000e+00 : f32
    %26 = vector.broadcast %cst : f32 to vector<13x100xf32>
    %c0_2 = arith.constant 0 : index
    %c0_3 = arith.constant 0 : index
    %c0_4 = arith.constant 0 : index
    %27 = vector.load %arg2[%c0_2, %c0_3, %c0_4] : memref<16x13x26xbf16, #tpu.memory_space<vmem>>, vector<1x13x26xbf16>
    %28 = vector.shape_cast %27 : vector<1x13x26xbf16> to vector<13x26xbf16>
    %cst_5 = arith.constant dense<0.000000e+00> : vector<13x36xf32>
    %29 = tpu.matmul %28, %1, %cst_5 {dimension_numbers = #tpu.dot_dimension_numbers<[1], [0], [0], [1], [0, 0, 1, 1], [], []>} : vector<13x26xbf16>, vector<26x36xbf16>, vector<13x36xf32> -> vector<13x36xf32>
    %c1 = arith.constant 1 : index
    %c0_6 = arith.constant 0 : index
    %c0_7 = arith.constant 0 : index
    %30 = vector.load %arg2[%c1, %c0_6, %c0_7] : memref<16x13x26xbf16, #tpu.memory_space<vmem>>, vector<1x13x26xbf16>
    %31 = vector.shape_cast %30 : vector<1x13x26xbf16> to vector<13x26xbf16>
    %cst_8 = arith.constant dense<0.000000e+00> : vector<13x36xf32>
    %32 = tpu.matmul %31, %13, %cst_8 {dimension_numbers = #tpu.dot_dimension_numbers<[1], [0], [0], [1], [0, 0, 1, 1], [], []>} : vector<13x26xbf16>, vector<26x36xbf16>, vector<13x36xf32> -> vector<13x36xf32>
    %33 = arith.addf %29, %32 : vector<13x36xf32>
    %c2 = arith.constant 2 : index
    %c0_9 = arith.constant 0 : index
    %c0_10 = arith.constant 0 : index
    %34 = vector.load %arg2[%c2, %c0_9, %c0_10] : memref<16x13x26xbf16, #tpu.memory_space<vmem>>, vector<1x13x26xbf16>
    %35 = vector.shape_cast %34 : vector<1x13x26xbf16> to vector<13x26xbf16>
    %cst_11 = arith.constant dense<0.000000e+00> : vector<13x36xf32>
    %36 = tpu.matmul %35, %7, %cst_11 {dimension_numbers = #tpu.dot_dimension_numbers<[1], [0], [0], [1], [0, 0, 1, 1], [], []>} : vector<13x26xbf16>, vector<26x36xbf16>, vector<13x36xf32> -> vector<13x36xf32>
    %37 = arith.addf %33, %36 : vector<13x36xf32>
    %c3 = arith.constant 3 : index
    %c0_12 = arith.constant 0 : index
    %c0_13 = arith.constant 0 : index
    %38 = vector.load %arg2[%c3, %c0_12, %c0_13] : memref<16x13x26xbf16, #tpu.memory_space<vmem>>, vector<1x13x26xbf16>
    %39 = vector.shape_cast %38 : vector<1x13x26xbf16> to vector<13x26xbf16>
    %cst_14 = arith.constant dense<0.000000e+00> : vector<13x36xf32>
    %40 = tpu.matmul %39, %4, %cst_14 {dimension_numbers = #tpu.dot_dimension_numbers<[1], [0], [0], [1], [0, 0, 1, 1], [], []>} : vector<13x26xbf16>, vector<26x36xbf16>, vector<13x36xf32> -> vector<13x36xf32>
    %41 = arith.addf %37, %40 : vector<13x36xf32>
    %c0_15 = arith.constant 0 : index
    %c0_16 = arith.constant 0 : index
    %42 = vector.load %arg3[%c0_15, %c0_16] : memref<13x1xf32, #tpu.memory_space<vmem>>, vector<13x1xf32>
    %43 = vector.broadcast %42 : vector<13x1xf32> to vector<13x36xf32>
    %44 = arith.addf %41, %43 : vector<13x36xf32>
    %cst_17 = arith.constant 0.000000e+00 : f32
    %45 = vector.broadcast %cst_17 : f32 to vector<13x36xf32>
    %46 = arith.maximumf %44, %45 : vector<13x36xf32>
    %c0_18 = arith.constant 0 : index
    %c0_19 = arith.constant 0 : index
    %c0_20 = arith.constant 0 : index
    %47 = vector.load %arg4[%c0_18, %c0_19, %c0_20] : memref<4x36x100xf32, #tpu.memory_space<vmem>>, vector<1x36x100xf32>
    %48 = vector.shape_cast %47 : vector<1x36x100xf32> to vector<36x100xf32>
    %cst_21 = arith.constant dense<0.000000e+00> : vector<13x100xf32>
    %49 = tpu.matmul %46, %48, %cst_21 {dimension_numbers = #tpu.dot_dimension_numbers<[1], [0], [0], [1], [0, 0, 1, 1], [], []>} : vector<13x36xf32>, vector<36x100xf32>, vector<13x100xf32> -> vector<13x100xf32>
    %50 = arith.addf %26, %49 : vector<13x100xf32>
    %c4 = arith.constant 4 : index
    %c0_22 = arith.constant 0 : index
    %c0_23 = arith.constant 0 : index
    %51 = vector.load %arg2[%c4, %c0_22, %c0_23] : memref<16x13x26xbf16, #tpu.memory_space<vmem>>, vector<1x13x26xbf16>
    %52 = vector.shape_cast %51 : vector<1x13x26xbf16> to vector<13x26xbf16>
    %cst_24 = arith.constant dense<0.000000e+00> : vector<13x36xf32>
    %53 = tpu.matmul %52, %1, %cst_24 {dimension_numbers = #tpu.dot_dimension_numbers<[1], [0], [0], [1], [0, 0, 1, 1], [], []>} : vector<13x26xbf16>, vector<26x36xbf16>, vector<13x36xf32> -> vector<13x36xf32>
    %c5 = arith.constant 5 : index
    %c0_25 = arith.constant 0 : index
    %c0_26 = arith.constant 0 : index
    %54 = vector.load %arg2[%c5, %c0_25, %c0_26] : memref<16x13x26xbf16, #tpu.memory_space<vmem>>, vector<1x13x26xbf16>
    %55 = vector.shape_cast %54 : vector<1x13x26xbf16> to vector<13x26xbf16>
    %cst_27 = arith.constant dense<0.000000e+00> : vector<13x36xf32>
    %56 = tpu.matmul %55, %16, %cst_27 {dimension_numbers = #tpu.dot_dimension_numbers<[1], [0], [0], [1], [0, 0, 1, 1], [], []>} : vector<13x26xbf16>, vector<26x36xbf16>, vector<13x36xf32> -> vector<13x36xf32>
    %57 = arith.addf %53, %56 : vector<13x36xf32>
    %c6 = arith.constant 6 : index
    %c0_28 = arith.constant 0 : index
    %c0_29 = arith.constant 0 : index
    %58 = vector.load %arg2[%c6, %c0_28, %c0_29] : memref<16x13x26xbf16, #tpu.memory_space<vmem>>, vector<1x13x26xbf16>
    %59 = vector.shape_cast %58 : vector<1x13x26xbf16> to vector<13x26xbf16>
    %cst_30 = arith.constant dense<0.000000e+00> : vector<13x36xf32>
    %60 = tpu.matmul %59, %7, %cst_30 {dimension_numbers = #tpu.dot_dimension_numbers<[1], [0], [0], [1], [0, 0, 1, 1], [], []>} : vector<13x26xbf16>, vector<26x36xbf16>, vector<13x36xf32> -> vector<13x36xf32>
    %61 = arith.addf %57, %60 : vector<13x36xf32>
    %c7 = arith.constant 7 : index
    %c0_31 = arith.constant 0 : index
    %c0_32 = arith.constant 0 : index
    %62 = vector.load %arg2[%c7, %c0_31, %c0_32] : memref<16x13x26xbf16, #tpu.memory_space<vmem>>, vector<1x13x26xbf16>
    %63 = vector.shape_cast %62 : vector<1x13x26xbf16> to vector<13x26xbf16>
    %cst_33 = arith.constant dense<0.000000e+00> : vector<13x36xf32>
    %64 = tpu.matmul %63, %10, %cst_33 {dimension_numbers = #tpu.dot_dimension_numbers<[1], [0], [0], [1], [0, 0, 1, 1], [], []>} : vector<13x26xbf16>, vector<26x36xbf16>, vector<13x36xf32> -> vector<13x36xf32>
    %65 = arith.addf %61, %64 : vector<13x36xf32>
    %c0_34 = arith.constant 0 : index
    %c0_35 = arith.constant 0 : index
    %66 = vector.load %arg3[%c0_34, %c0_35] : memref<13x1xf32, #tpu.memory_space<vmem>>, vector<13x1xf32>
    %67 = vector.broadcast %66 : vector<13x1xf32> to vector<13x36xf32>
    %68 = arith.addf %65, %67 : vector<13x36xf32>
    %cst_36 = arith.constant 0.000000e+00 : f32
    %69 = vector.broadcast %cst_36 : f32 to vector<13x36xf32>
    %70 = arith.maximumf %68, %69 : vector<13x36xf32>
    %c1_37 = arith.constant 1 : index
    %c0_38 = arith.constant 0 : index
    %c0_39 = arith.constant 0 : index
    %71 = vector.load %arg4[%c1_37, %c0_38, %c0_39] : memref<4x36x100xf32, #tpu.memory_space<vmem>>, vector<1x36x100xf32>
    %72 = vector.shape_cast %71 : vector<1x36x100xf32> to vector<36x100xf32>
    %cst_40 = arith.constant dense<0.000000e+00> : vector<13x100xf32>
    %73 = tpu.matmul %70, %72, %cst_40 {dimension_numbers = #tpu.dot_dimension_numbers<[1], [0], [0], [1], [0, 0, 1, 1], [], []>} : vector<13x36xf32>, vector<36x100xf32>, vector<13x100xf32> -> vector<13x100xf32>
    %74 = arith.addf %50, %73 : vector<13x100xf32>
    %c8 = arith.constant 8 : index
    %c0_41 = arith.constant 0 : index
    %c0_42 = arith.constant 0 : index
    %75 = vector.load %arg2[%c8, %c0_41, %c0_42] : memref<16x13x26xbf16, #tpu.memory_space<vmem>>, vector<1x13x26xbf16>
    %76 = vector.shape_cast %75 : vector<1x13x26xbf16> to vector<13x26xbf16>
    %cst_43 = arith.constant dense<0.000000e+00> : vector<13x36xf32>
    %77 = tpu.matmul %76, %1, %cst_43 {dimension_numbers = #tpu.dot_dimension_numbers<[1], [0], [0], [1], [0, 0, 1, 1], [], []>} : vector<13x26xbf16>, vector<26x36xbf16>, vector<13x36xf32> -> vector<13x36xf32>
    %c9 = arith.constant 9 : index
    %c0_44 = arith.constant 0 : index
    %c0_45 = arith.constant 0 : index
    %78 = vector.load %arg2[%c9, %c0_44, %c0_45] : memref<16x13x26xbf16, #tpu.memory_space<vmem>>, vector<1x13x26xbf16>
    %79 = vector.shape_cast %78 : vector<1x13x26xbf16> to vector<13x26xbf16>
    %cst_46 = arith.constant dense<0.000000e+00> : vector<13x36xf32>
    %80 = tpu.matmul %79, %13, %cst_46 {dimension_numbers = #tpu.dot_dimension_numbers<[1], [0], [0], [1], [0, 0, 1, 1], [], []>} : vector<13x26xbf16>, vector<26x36xbf16>, vector<13x36xf32> -> vector<13x36xf32>
    %81 = arith.addf %77, %80 : vector<13x36xf32>
    %c10 = arith.constant 10 : index
    %c0_47 = arith.constant 0 : index
    %c0_48 = arith.constant 0 : index
    %82 = vector.load %arg2[%c10, %c0_47, %c0_48] : memref<16x13x26xbf16, #tpu.memory_space<vmem>>, vector<1x13x26xbf16>
    %83 = vector.shape_cast %82 : vector<1x13x26xbf16> to vector<13x26xbf16>
    %cst_49 = arith.constant dense<0.000000e+00> : vector<13x36xf32>
    %84 = tpu.matmul %83, %22, %cst_49 {dimension_numbers = #tpu.dot_dimension_numbers<[1], [0], [0], [1], [0, 0, 1, 1], [], []>} : vector<13x26xbf16>, vector<26x36xbf16>, vector<13x36xf32> -> vector<13x36xf32>
    %85 = arith.addf %81, %84 : vector<13x36xf32>
    %c11 = arith.constant 11 : index
    %c0_50 = arith.constant 0 : index
    %c0_51 = arith.constant 0 : index
    %86 = vector.load %arg2[%c11, %c0_50, %c0_51] : memref<16x13x26xbf16, #tpu.memory_space<vmem>>, vector<1x13x26xbf16>
    %87 = vector.shape_cast %86 : vector<1x13x26xbf16> to vector<13x26xbf16>
    %cst_52 = arith.constant dense<0.000000e+00> : vector<13x36xf32>
    %88 = tpu.matmul %87, %19, %cst_52 {dimension_numbers = #tpu.dot_dimension_numbers<[1], [0], [0], [1], [0, 0, 1, 1], [], []>} : vector<13x26xbf16>, vector<26x36xbf16>, vector<13x36xf32> -> vector<13x36xf32>
    %89 = arith.addf %85, %88 : vector<13x36xf32>
    %c0_53 = arith.constant 0 : index
    %c0_54 = arith.constant 0 : index
    %90 = vector.load %arg3[%c0_53, %c0_54] : memref<13x1xf32, #tpu.memory_space<vmem>>, vector<13x1xf32>
    %91 = vector.broadcast %90 : vector<13x1xf32> to vector<13x36xf32>
    %92 = arith.addf %89, %91 : vector<13x36xf32>
    %cst_55 = arith.constant 0.000000e+00 : f32
    %93 = vector.broadcast %cst_55 : f32 to vector<13x36xf32>
    %94 = arith.maximumf %92, %93 : vector<13x36xf32>
    %c2_56 = arith.constant 2 : index
    %c0_57 = arith.constant 0 : index
    %c0_58 = arith.constant 0 : index
    %95 = vector.load %arg4[%c2_56, %c0_57, %c0_58] : memref<4x36x100xf32, #tpu.memory_space<vmem>>, vector<1x36x100xf32>
    %96 = vector.shape_cast %95 : vector<1x36x100xf32> to vector<36x100xf32>
    %cst_59 = arith.constant dense<0.000000e+00> : vector<13x100xf32>
    %97 = tpu.matmul %94, %96, %cst_59 {dimension_numbers = #tpu.dot_dimension_numbers<[1], [0], [0], [1], [0, 0, 1, 1], [], []>} : vector<13x36xf32>, vector<36x100xf32>, vector<13x100xf32> -> vector<13x100xf32>
    %98 = arith.addf %74, %97 : vector<13x100xf32>
    %c12 = arith.constant 12 : index
    %c0_60 = arith.constant 0 : index
    %c0_61 = arith.constant 0 : index
    %99 = vector.load %arg2[%c12, %c0_60, %c0_61] : memref<16x13x26xbf16, #tpu.memory_space<vmem>>, vector<1x13x26xbf16>
    %100 = vector.shape_cast %99 : vector<1x13x26xbf16> to vector<13x26xbf16>
    %cst_62 = arith.constant dense<0.000000e+00> : vector<13x36xf32>
    %101 = tpu.matmul %100, %1, %cst_62 {dimension_numbers = #tpu.dot_dimension_numbers<[1], [0], [0], [1], [0, 0, 1, 1], [], []>} : vector<13x26xbf16>, vector<26x36xbf16>, vector<13x36xf32> -> vector<13x36xf32>
    %c13 = arith.constant 13 : index
    %c0_63 = arith.constant 0 : index
    %c0_64 = arith.constant 0 : index
    %102 = vector.load %arg2[%c13, %c0_63, %c0_64] : memref<16x13x26xbf16, #tpu.memory_space<vmem>>, vector<1x13x26xbf16>
    %103 = vector.shape_cast %102 : vector<1x13x26xbf16> to vector<13x26xbf16>
    %cst_65 = arith.constant dense<0.000000e+00> : vector<13x36xf32>
    %104 = tpu.matmul %103, %16, %cst_65 {dimension_numbers = #tpu.dot_dimension_numbers<[1], [0], [0], [1], [0, 0, 1, 1], [], []>} : vector<13x26xbf16>, vector<26x36xbf16>, vector<13x36xf32> -> vector<13x36xf32>
    %105 = arith.addf %101, %104 : vector<13x36xf32>
    %c14 = arith.constant 14 : index
    %c0_66 = arith.constant 0 : index
    %c0_67 = arith.constant 0 : index
    %106 = vector.load %arg2[%c14, %c0_66, %c0_67] : memref<16x13x26xbf16, #tpu.memory_space<vmem>>, vector<1x13x26xbf16>
    %107 = vector.shape_cast %106 : vector<1x13x26xbf16> to vector<13x26xbf16>
    %cst_68 = arith.constant dense<0.000000e+00> : vector<13x36xf32>
    %108 = tpu.matmul %107, %22, %cst_68 {dimension_numbers = #tpu.dot_dimension_numbers<[1], [0], [0], [1], [0, 0, 1, 1], [], []>} : vector<13x26xbf16>, vector<26x36xbf16>, vector<13x36xf32> -> vector<13x36xf32>
    %109 = arith.addf %105, %108 : vector<13x36xf32>
    %c15 = arith.constant 15 : index
    %c0_69 = arith.constant 0 : index
    %c0_70 = arith.constant 0 : index
    %110 = vector.load %arg2[%c15, %c0_69, %c0_70] : memref<16x13x26xbf16, #tpu.memory_space<vmem>>, vector<1x13x26xbf16>
    %111 = vector.shape_cast %110 : vector<1x13x26xbf16> to vector<13x26xbf16>
    %cst_71 = arith.constant dense<0.000000e+00> : vector<13x36xf32>
    %112 = tpu.matmul %111, %25, %cst_71 {dimension_numbers = #tpu.dot_dimension_numbers<[1], [0], [0], [1], [0, 0, 1, 1], [], []>} : vector<13x26xbf16>, vector<26x36xbf16>, vector<13x36xf32> -> vector<13x36xf32>
    %113 = arith.addf %109, %112 : vector<13x36xf32>
    %c0_72 = arith.constant 0 : index
    %c0_73 = arith.constant 0 : index
    %114 = vector.load %arg3[%c0_72, %c0_73] : memref<13x1xf32, #tpu.memory_space<vmem>>, vector<13x1xf32>
    %115 = vector.broadcast %114 : vector<13x1xf32> to vector<13x36xf32>
    %116 = arith.addf %113, %115 : vector<13x36xf32>
    %cst_74 = arith.constant 0.000000e+00 : f32
    %117 = vector.broadcast %cst_74 : f32 to vector<13x36xf32>
    %118 = arith.maximumf %116, %117 : vector<13x36xf32>
    %c3_75 = arith.constant 3 : index
    %c0_76 = arith.constant 0 : index
    %c0_77 = arith.constant 0 : index
    %119 = vector.load %arg4[%c3_75, %c0_76, %c0_77] : memref<4x36x100xf32, #tpu.memory_space<vmem>>, vector<1x36x100xf32>
    %120 = vector.shape_cast %119 : vector<1x36x100xf32> to vector<36x100xf32>
    %cst_78 = arith.constant dense<0.000000e+00> : vector<13x100xf32>
    %121 = tpu.matmul %118, %120, %cst_78 {dimension_numbers = #tpu.dot_dimension_numbers<[1], [0], [0], [1], [0, 0, 1, 1], [], []>} : vector<13x36xf32>, vector<36x100xf32>, vector<13x100xf32> -> vector<13x100xf32>
    %122 = arith.addf %98, %121 : vector<13x100xf32>
    %123 = arith.truncf %122 : vector<13x100xf32> to vector<13x100xbf16>
    %124 = vector.extract_strided_slice %123 {offsets = [0, 89], sizes = [13, 11], strides = [1, 1]} : vector<13x100xbf16> to vector<13x11xbf16>
    %125 = vector.extract_strided_slice %123 {offsets = [0, 0], sizes = [13, 89], strides = [1, 1]} : vector<13x100xbf16> to vector<13x89xbf16>
    %126 = tpu.concatenate %124, %125 in 1 : vector<13x11xbf16>, vector<13x89xbf16> -> vector<13x100xbf16>
    %127 = vector.extract_strided_slice %123 {offsets = [0, 90], sizes = [13, 10], strides = [1, 1]} : vector<13x100xbf16> to vector<13x10xbf16>
    %128 = vector.extract_strided_slice %123 {offsets = [0, 0], sizes = [13, 90], strides = [1, 1]} : vector<13x100xbf16> to vector<13x90xbf16>
    %129 = tpu.concatenate %127, %128 in 1 : vector<13x10xbf16>, vector<13x90xbf16> -> vector<13x100xbf16>
    %130 = vector.extract_strided_slice %123 {offsets = [0, 91], sizes = [13, 9], strides = [1, 1]} : vector<13x100xbf16> to vector<13x9xbf16>
    %131 = vector.extract_strided_slice %123 {offsets = [0, 0], sizes = [13, 91], strides = [1, 1]} : vector<13x100xbf16> to vector<13x91xbf16>
    %132 = tpu.concatenate %130, %131 in 1 : vector<13x9xbf16>, vector<13x91xbf16> -> vector<13x100xbf16>
    %133 = vector.extract_strided_slice %123 {offsets = [0, 99], sizes = [13, 1], strides = [1, 1]} : vector<13x100xbf16> to vector<13x1xbf16>
    %134 = vector.extract_strided_slice %123 {offsets = [0, 0], sizes = [13, 99], strides = [1, 1]} : vector<13x100xbf16> to vector<13x99xbf16>
    %135 = tpu.concatenate %133, %134 in 1 : vector<13x1xbf16>, vector<13x99xbf16> -> vector<13x100xbf16>
    %136 = vector.extract_strided_slice %123 {offsets = [0, 1], sizes = [13, 99], strides = [1, 1]} : vector<13x100xbf16> to vector<13x99xbf16>
    %137 = vector.extract_strided_slice %123 {offsets = [0, 0], sizes = [13, 1], strides = [1, 1]} : vector<13x100xbf16> to vector<13x1xbf16>
    %138 = tpu.concatenate %136, %137 in 1 : vector<13x99xbf16>, vector<13x1xbf16> -> vector<13x100xbf16>
    %139 = vector.extract_strided_slice %123 {offsets = [0, 9], sizes = [13, 91], strides = [1, 1]} : vector<13x100xbf16> to vector<13x91xbf16>
    %140 = vector.extract_strided_slice %123 {offsets = [0, 0], sizes = [13, 9], strides = [1, 1]} : vector<13x100xbf16> to vector<13x9xbf16>
    %141 = tpu.concatenate %139, %140 in 1 : vector<13x91xbf16>, vector<13x9xbf16> -> vector<13x100xbf16>
    %142 = vector.extract_strided_slice %123 {offsets = [0, 10], sizes = [13, 90], strides = [1, 1]} : vector<13x100xbf16> to vector<13x90xbf16>
    %143 = vector.extract_strided_slice %123 {offsets = [0, 0], sizes = [13, 10], strides = [1, 1]} : vector<13x100xbf16> to vector<13x10xbf16>
    %144 = tpu.concatenate %142, %143 in 1 : vector<13x90xbf16>, vector<13x10xbf16> -> vector<13x100xbf16>
    %145 = vector.extract_strided_slice %123 {offsets = [0, 11], sizes = [13, 89], strides = [1, 1]} : vector<13x100xbf16> to vector<13x89xbf16>
    %146 = vector.extract_strided_slice %123 {offsets = [0, 0], sizes = [13, 11], strides = [1, 1]} : vector<13x100xbf16> to vector<13x11xbf16>
    %147 = tpu.concatenate %145, %146 in 1 : vector<13x89xbf16>, vector<13x11xbf16> -> vector<13x100xbf16>
    %cst_79 = arith.constant 0.000000e+00 : f32
    %148 = vector.broadcast %cst_79 : f32 to vector<4x256xf32>
    %c0_80 = arith.constant 0 : index
    %c0_81 = arith.constant 0 : index
    %c0_82 = arith.constant 0 : index
    %149 = vector.load %arg5[%c0_80, %c0_81, %c0_82] : memref<16x4x13xbf16, #tpu.memory_space<vmem>>, vector<1x4x13xbf16>
    %150 = vector.shape_cast %149 : vector<1x4x13xbf16> to vector<4x13xbf16>
    %cst_83 = arith.constant dense<0.000000e+00> : vector<4x100xf32>
    %151 = tpu.matmul %150, %123, %cst_83 {dimension_numbers = #tpu.dot_dimension_numbers<[1], [0], [0], [1], [0, 0, 1, 1], [], []>} : vector<4x13xbf16>, vector<13x100xbf16>, vector<4x100xf32> -> vector<4x100xf32>
    %c1_84 = arith.constant 1 : index
    %c0_85 = arith.constant 0 : index
    %c0_86 = arith.constant 0 : index
    %152 = vector.load %arg5[%c1_84, %c0_85, %c0_86] : memref<16x4x13xbf16, #tpu.memory_space<vmem>>, vector<1x4x13xbf16>
    %153 = vector.shape_cast %152 : vector<1x4x13xbf16> to vector<4x13xbf16>
    %cst_87 = arith.constant dense<0.000000e+00> : vector<4x100xf32>
    %154 = tpu.matmul %153, %135, %cst_87 {dimension_numbers = #tpu.dot_dimension_numbers<[1], [0], [0], [1], [0, 0, 1, 1], [], []>} : vector<4x13xbf16>, vector<13x100xbf16>, vector<4x100xf32> -> vector<4x100xf32>
    %155 = arith.addf %151, %154 : vector<4x100xf32>
    %c2_88 = arith.constant 2 : index
    %c0_89 = arith.constant 0 : index
    %c0_90 = arith.constant 0 : index
    %156 = vector.load %arg5[%c2_88, %c0_89, %c0_90] : memref<16x4x13xbf16, #tpu.memory_space<vmem>>, vector<1x4x13xbf16>
    %157 = vector.shape_cast %156 : vector<1x4x13xbf16> to vector<4x13xbf16>
    %cst_91 = arith.constant dense<0.000000e+00> : vector<4x100xf32>
    %158 = tpu.matmul %157, %129, %cst_91 {dimension_numbers = #tpu.dot_dimension_numbers<[1], [0], [0], [1], [0, 0, 1, 1], [], []>} : vector<4x13xbf16>, vector<13x100xbf16>, vector<4x100xf32> -> vector<4x100xf32>
    %159 = arith.addf %155, %158 : vector<4x100xf32>
    %c3_92 = arith.constant 3 : index
    %c0_93 = arith.constant 0 : index
    %c0_94 = arith.constant 0 : index
    %160 = vector.load %arg5[%c3_92, %c0_93, %c0_94] : memref<16x4x13xbf16, #tpu.memory_space<vmem>>, vector<1x4x13xbf16>
    %161 = vector.shape_cast %160 : vector<1x4x13xbf16> to vector<4x13xbf16>
    %cst_95 = arith.constant dense<0.000000e+00> : vector<4x100xf32>
    %162 = tpu.matmul %161, %126, %cst_95 {dimension_numbers = #tpu.dot_dimension_numbers<[1], [0], [0], [1], [0, 0, 1, 1], [], []>} : vector<4x13xbf16>, vector<13x100xbf16>, vector<4x100xf32> -> vector<4x100xf32>
    %163 = arith.addf %159, %162 : vector<4x100xf32>
    %c0_96 = arith.constant 0 : index
    %c0_97 = arith.constant 0 : index
    %164 = vector.load %arg6[%c0_96, %c0_97] : memref<4x1xf32, #tpu.memory_space<vmem>>, vector<4x1xf32>
    %165 = vector.broadcast %164 : vector<4x1xf32> to vector<4x100xf32>
    %166 = arith.addf %163, %165 : vector<4x100xf32>
    %167 = math.tanh %166 : vector<4x100xf32>
    %c0_98 = arith.constant 0 : index
    %c0_99 = arith.constant 0 : index
    %c0_100 = arith.constant 0 : index
    %168 = vector.load %arg7[%c0_98, %c0_99, %c0_100] : memref<4x100x256xf32, #tpu.memory_space<vmem>>, vector<1x100x256xf32>
    %169 = vector.shape_cast %168 : vector<1x100x256xf32> to vector<100x256xf32>
    %cst_101 = arith.constant dense<0.000000e+00> : vector<4x256xf32>
    %170 = tpu.matmul %167, %169, %cst_101 {dimension_numbers = #tpu.dot_dimension_numbers<[1], [0], [0], [1], [0, 0, 1, 1], [], []>} : vector<4x100xf32>, vector<100x256xf32>, vector<4x256xf32> -> vector<4x256xf32>
    %171 = arith.addf %148, %170 : vector<4x256xf32>
    %c4_102 = arith.constant 4 : index
    %c0_103 = arith.constant 0 : index
    %c0_104 = arith.constant 0 : index
    %172 = vector.load %arg5[%c4_102, %c0_103, %c0_104] : memref<16x4x13xbf16, #tpu.memory_space<vmem>>, vector<1x4x13xbf16>
    %173 = vector.shape_cast %172 : vector<1x4x13xbf16> to vector<4x13xbf16>
    %cst_105 = arith.constant dense<0.000000e+00> : vector<4x100xf32>
    %174 = tpu.matmul %173, %123, %cst_105 {dimension_numbers = #tpu.dot_dimension_numbers<[1], [0], [0], [1], [0, 0, 1, 1], [], []>} : vector<4x13xbf16>, vector<13x100xbf16>, vector<4x100xf32> -> vector<4x100xf32>
    %c5_106 = arith.constant 5 : index
    %c0_107 = arith.constant 0 : index
    %c0_108 = arith.constant 0 : index
    %175 = vector.load %arg5[%c5_106, %c0_107, %c0_108] : memref<16x4x13xbf16, #tpu.memory_space<vmem>>, vector<1x4x13xbf16>
    %176 = vector.shape_cast %175 : vector<1x4x13xbf16> to vector<4x13xbf16>
    %cst_109 = arith.constant dense<0.000000e+00> : vector<4x100xf32>
    %177 = tpu.matmul %176, %138, %cst_109 {dimension_numbers = #tpu.dot_dimension_numbers<[1], [0], [0], [1], [0, 0, 1, 1], [], []>} : vector<4x13xbf16>, vector<13x100xbf16>, vector<4x100xf32> -> vector<4x100xf32>
    %178 = arith.addf %174, %177 : vector<4x100xf32>
    %c6_110 = arith.constant 6 : index
    %c0_111 = arith.constant 0 : index
    %c0_112 = arith.constant 0 : index
    %179 = vector.load %arg5[%c6_110, %c0_111, %c0_112] : memref<16x4x13xbf16, #tpu.memory_space<vmem>>, vector<1x4x13xbf16>
    %180 = vector.shape_cast %179 : vector<1x4x13xbf16> to vector<4x13xbf16>
    %cst_113 = arith.constant dense<0.000000e+00> : vector<4x100xf32>
    %181 = tpu.matmul %180, %129, %cst_113 {dimension_numbers = #tpu.dot_dimension_numbers<[1], [0], [0], [1], [0, 0, 1, 1], [], []>} : vector<4x13xbf16>, vector<13x100xbf16>, vector<4x100xf32> -> vector<4x100xf32>
    %182 = arith.addf %178, %181 : vector<4x100xf32>
    %c7_114 = arith.constant 7 : index
    %c0_115 = arith.constant 0 : index
    %c0_116 = arith.constant 0 : index
    %183 = vector.load %arg5[%c7_114, %c0_115, %c0_116] : memref<16x4x13xbf16, #tpu.memory_space<vmem>>, vector<1x4x13xbf16>
    %184 = vector.shape_cast %183 : vector<1x4x13xbf16> to vector<4x13xbf16>
    %cst_117 = arith.constant dense<0.000000e+00> : vector<4x100xf32>
    %185 = tpu.matmul %184, %132, %cst_117 {dimension_numbers = #tpu.dot_dimension_numbers<[1], [0], [0], [1], [0, 0, 1, 1], [], []>} : vector<4x13xbf16>, vector<13x100xbf16>, vector<4x100xf32> -> vector<4x100xf32>
    %186 = arith.addf %182, %185 : vector<4x100xf32>
    %c0_118 = arith.constant 0 : index
    %c0_119 = arith.constant 0 : index
    %187 = vector.load %arg6[%c0_118, %c0_119] : memref<4x1xf32, #tpu.memory_space<vmem>>, vector<4x1xf32>
    %188 = vector.broadcast %187 : vector<4x1xf32> to vector<4x100xf32>
    %189 = arith.addf %186, %188 : vector<4x100xf32>
    %190 = math.tanh %189 : vector<4x100xf32>
    %c1_120 = arith.constant 1 : index
    %c0_121 = arith.constant 0 : index
    %c0_122 = arith.constant 0 : index
    %191 = vector.load %arg7[%c1_120, %c0_121, %c0_122] : memref<4x100x256xf32, #tpu.memory_space<vmem>>, vector<1x100x256xf32>
    %192 = vector.shape_cast %191 : vector<1x100x256xf32> to vector<100x256xf32>
    %cst_123 = arith.constant dense<0.000000e+00> : vector<4x256xf32>
    %193 = tpu.matmul %190, %192, %cst_123 {dimension_numbers = #tpu.dot_dimension_numbers<[1], [0], [0], [1], [0, 0, 1, 1], [], []>} : vector<4x100xf32>, vector<100x256xf32>, vector<4x256xf32> -> vector<4x256xf32>
    %194 = arith.addf %171, %193 : vector<4x256xf32>
    %c8_124 = arith.constant 8 : index
    %c0_125 = arith.constant 0 : index
    %c0_126 = arith.constant 0 : index
    %195 = vector.load %arg5[%c8_124, %c0_125, %c0_126] : memref<16x4x13xbf16, #tpu.memory_space<vmem>>, vector<1x4x13xbf16>
    %196 = vector.shape_cast %195 : vector<1x4x13xbf16> to vector<4x13xbf16>
    %cst_127 = arith.constant dense<0.000000e+00> : vector<4x100xf32>
    %197 = tpu.matmul %196, %123, %cst_127 {dimension_numbers = #tpu.dot_dimension_numbers<[1], [0], [0], [1], [0, 0, 1, 1], [], []>} : vector<4x13xbf16>, vector<13x100xbf16>, vector<4x100xf32> -> vector<4x100xf32>
    %c9_128 = arith.constant 9 : index
    %c0_129 = arith.constant 0 : index
    %c0_130 = arith.constant 0 : index
    %198 = vector.load %arg5[%c9_128, %c0_129, %c0_130] : memref<16x4x13xbf16, #tpu.memory_space<vmem>>, vector<1x4x13xbf16>
    %199 = vector.shape_cast %198 : vector<1x4x13xbf16> to vector<4x13xbf16>
    %cst_131 = arith.constant dense<0.000000e+00> : vector<4x100xf32>
    %200 = tpu.matmul %199, %135, %cst_131 {dimension_numbers = #tpu.dot_dimension_numbers<[1], [0], [0], [1], [0, 0, 1, 1], [], []>} : vector<4x13xbf16>, vector<13x100xbf16>, vector<4x100xf32> -> vector<4x100xf32>
    %201 = arith.addf %197, %200 : vector<4x100xf32>
    %c10_132 = arith.constant 10 : index
    %c0_133 = arith.constant 0 : index
    %c0_134 = arith.constant 0 : index
    %202 = vector.load %arg5[%c10_132, %c0_133, %c0_134] : memref<16x4x13xbf16, #tpu.memory_space<vmem>>, vector<1x4x13xbf16>
    %203 = vector.shape_cast %202 : vector<1x4x13xbf16> to vector<4x13xbf16>
    %cst_135 = arith.constant dense<0.000000e+00> : vector<4x100xf32>
    %204 = tpu.matmul %203, %144, %cst_135 {dimension_numbers = #tpu.dot_dimension_numbers<[1], [0], [0], [1], [0, 0, 1, 1], [], []>} : vector<4x13xbf16>, vector<13x100xbf16>, vector<4x100xf32> -> vector<4x100xf32>
    %205 = arith.addf %201, %204 : vector<4x100xf32>
    %c11_136 = arith.constant 11 : index
    %c0_137 = arith.constant 0 : index
    %c0_138 = arith.constant 0 : index
    %206 = vector.load %arg5[%c11_136, %c0_137, %c0_138] : memref<16x4x13xbf16, #tpu.memory_space<vmem>>, vector<1x4x13xbf16>
    %207 = vector.shape_cast %206 : vector<1x4x13xbf16> to vector<4x13xbf16>
    %cst_139 = arith.constant dense<0.000000e+00> : vector<4x100xf32>
    %208 = tpu.matmul %207, %141, %cst_139 {dimension_numbers = #tpu.dot_dimension_numbers<[1], [0], [0], [1], [0, 0, 1, 1], [], []>} : vector<4x13xbf16>, vector<13x100xbf16>, vector<4x100xf32> -> vector<4x100xf32>
    %209 = arith.addf %205, %208 : vector<4x100xf32>
    %c0_140 = arith.constant 0 : index
    %c0_141 = arith.constant 0 : index
    %210 = vector.load %arg6[%c0_140, %c0_141] : memref<4x1xf32, #tpu.memory_space<vmem>>, vector<4x1xf32>
    %211 = vector.broadcast %210 : vector<4x1xf32> to vector<4x100xf32>
    %212 = arith.addf %209, %211 : vector<4x100xf32>
    %213 = math.tanh %212 : vector<4x100xf32>
    %c2_142 = arith.constant 2 : index
    %c0_143 = arith.constant 0 : index
    %c0_144 = arith.constant 0 : index
    %214 = vector.load %arg7[%c2_142, %c0_143, %c0_144] : memref<4x100x256xf32, #tpu.memory_space<vmem>>, vector<1x100x256xf32>
    %215 = vector.shape_cast %214 : vector<1x100x256xf32> to vector<100x256xf32>
    %cst_145 = arith.constant dense<0.000000e+00> : vector<4x256xf32>
    %216 = tpu.matmul %213, %215, %cst_145 {dimension_numbers = #tpu.dot_dimension_numbers<[1], [0], [0], [1], [0, 0, 1, 1], [], []>} : vector<4x100xf32>, vector<100x256xf32>, vector<4x256xf32> -> vector<4x256xf32>
    %217 = arith.addf %194, %216 : vector<4x256xf32>
    %c12_146 = arith.constant 12 : index
    %c0_147 = arith.constant 0 : index
    %c0_148 = arith.constant 0 : index
    %218 = vector.load %arg5[%c12_146, %c0_147, %c0_148] : memref<16x4x13xbf16, #tpu.memory_space<vmem>>, vector<1x4x13xbf16>
    %219 = vector.shape_cast %218 : vector<1x4x13xbf16> to vector<4x13xbf16>
    %cst_149 = arith.constant dense<0.000000e+00> : vector<4x100xf32>
    %220 = tpu.matmul %219, %123, %cst_149 {dimension_numbers = #tpu.dot_dimension_numbers<[1], [0], [0], [1], [0, 0, 1, 1], [], []>} : vector<4x13xbf16>, vector<13x100xbf16>, vector<4x100xf32> -> vector<4x100xf32>
    %c13_150 = arith.constant 13 : index
    %c0_151 = arith.constant 0 : index
    %c0_152 = arith.constant 0 : index
    %221 = vector.load %arg5[%c13_150, %c0_151, %c0_152] : memref<16x4x13xbf16, #tpu.memory_space<vmem>>, vector<1x4x13xbf16>
    %222 = vector.shape_cast %221 : vector<1x4x13xbf16> to vector<4x13xbf16>
    %cst_153 = arith.constant dense<0.000000e+00> : vector<4x100xf32>
    %223 = tpu.matmul %222, %138, %cst_153 {dimension_numbers = #tpu.dot_dimension_numbers<[1], [0], [0], [1], [0, 0, 1, 1], [], []>} : vector<4x13xbf16>, vector<13x100xbf16>, vector<4x100xf32> -> vector<4x100xf32>
    %224 = arith.addf %220, %223 : vector<4x100xf32>
    %c14_154 = arith.constant 14 : index
    %c0_155 = arith.constant 0 : index
    %c0_156 = arith.constant 0 : index
    %225 = vector.load %arg5[%c14_154, %c0_155, %c0_156] : memref<16x4x13xbf16, #tpu.memory_space<vmem>>, vector<1x4x13xbf16>
    %226 = vector.shape_cast %225 : vector<1x4x13xbf16> to vector<4x13xbf16>
    %cst_157 = arith.constant dense<0.000000e+00> : vector<4x100xf32>
    %227 = tpu.matmul %226, %144, %cst_157 {dimension_numbers = #tpu.dot_dimension_numbers<[1], [0], [0], [1], [0, 0, 1, 1], [], []>} : vector<4x13xbf16>, vector<13x100xbf16>, vector<4x100xf32> -> vector<4x100xf32>
    %228 = arith.addf %224, %227 : vector<4x100xf32>
    %c15_158 = arith.constant 15 : index
    %c0_159 = arith.constant 0 : index
    %c0_160 = arith.constant 0 : index
    %229 = vector.load %arg5[%c15_158, %c0_159, %c0_160] : memref<16x4x13xbf16, #tpu.memory_space<vmem>>, vector<1x4x13xbf16>
    %230 = vector.shape_cast %229 : vector<1x4x13xbf16> to vector<4x13xbf16>
    %cst_161 = arith.constant dense<0.000000e+00> : vector<4x100xf32>
    %231 = tpu.matmul %230, %147, %cst_161 {dimension_numbers = #tpu.dot_dimension_numbers<[1], [0], [0], [1], [0, 0, 1, 1], [], []>} : vector<4x13xbf16>, vector<13x100xbf16>, vector<4x100xf32> -> vector<4x100xf32>
    %232 = arith.addf %228, %231 : vector<4x100xf32>
    %c0_162 = arith.constant 0 : index
    %c0_163 = arith.constant 0 : index
    %233 = vector.load %arg6[%c0_162, %c0_163] : memref<4x1xf32, #tpu.memory_space<vmem>>, vector<4x1xf32>
    %234 = vector.broadcast %233 : vector<4x1xf32> to vector<4x100xf32>
    %235 = arith.addf %232, %234 : vector<4x100xf32>
    %236 = math.tanh %235 : vector<4x100xf32>
    %c3_164 = arith.constant 3 : index
    %c0_165 = arith.constant 0 : index
    %c0_166 = arith.constant 0 : index
    %237 = vector.load %arg7[%c3_164, %c0_165, %c0_166] : memref<4x100x256xf32, #tpu.memory_space<vmem>>, vector<1x100x256xf32>
    %238 = vector.shape_cast %237 : vector<1x100x256xf32> to vector<100x256xf32>
    %cst_167 = arith.constant dense<0.000000e+00> : vector<4x256xf32>
    %239 = tpu.matmul %236, %238, %cst_167 {dimension_numbers = #tpu.dot_dimension_numbers<[1], [0], [0], [1], [0, 0, 1, 1], [], []>} : vector<4x100xf32>, vector<100x256xf32>, vector<4x256xf32> -> vector<4x256xf32>
    %240 = arith.addf %217, %239 : vector<4x256xf32>
    %c0_168 = arith.constant 0 : index
    %c0_169 = arith.constant 0 : index
    %c0_170 = arith.constant 0 : index
    %241 = vector.load %arg8[%c0_168, %c0_169, %c0_170] : memref<1x4x256xf32, #tpu.memory_space<vmem>>, vector<1x4x256xf32>
    %242 = vector.shape_cast %241 : vector<1x4x256xf32> to vector<4x256xf32>
    %243 = vector.shape_cast %240 : vector<4x256xf32> to vector<1x4x256xf32>
    tpu.vector_store %arg8[%c0_168, %c0_169, %c0_170], %243 {strides = array<i32>} : memref<1x4x256xf32, #tpu.memory_space<vmem>>, vector<1x4x256xf32>,
    return
  }
  func.func @transform_0(%arg0: i32) -> (i32, i32, i32) {
    %c0_i32 = arith.constant 0 : i32
    %c0_i32_0 = arith.constant 0 : i32
    %c0_i32_1 = arith.constant 0 : i32
    return %arg0, %c0_i32, %c0_i32_0 : i32, i32, i32
  }
  func.func @transform_1(%arg0: i32) -> (i32, i32, i32) {
    %c0_i32 = arith.constant 0 : i32
    %c0_i32_0 = arith.constant 0 : i32
    %c0_i32_1 = arith.constant 0 : i32
    %c0_i32_2 = arith.constant 0 : i32
    return %c0_i32, %c0_i32_0, %c0_i32_1 : i32, i32, i32
  }
  func.func @transform_2(%arg0: i32) -> (i32, i32) {
    %c0_i32 = arith.constant 0 : i32
    %c0_i32_0 = arith.constant 0 : i32
    %c0_i32_1 = arith.constant 0 : i32
    return %c0_i32, %c0_i32_0 : i32, i32
  }
  func.func @transform_3(%arg0: i32) -> (i32, i32, i32) {
    %c0_i32 = arith.constant 0 : i32
    %c0_i32_0 = arith.constant 0 : i32
    %c0_i32_1 = arith.constant 0 : i32
    %c0_i32_2 = arith.constant 0 : i32
    return %c0_i32, %c0_i32_0, %c0_i32_1 : i32, i32, i32
  }
  func.func @transform_4(%arg0: i32) -> (i32, i32, i32) {
    %c0_i32 = arith.constant 0 : i32
    %c0_i32_0 = arith.constant 0 : i32
    %c0_i32_1 = arith.constant 0 : i32
    %c0_i32_2 = arith.constant 0 : i32
    return %c0_i32, %c0_i32_0, %c0_i32_1 : i32, i32, i32
  }
  func.func @transform_5(%arg0: i32) -> (i32, i32) {
    %c0_i32 = arith.constant 0 : i32
    %c0_i32_0 = arith.constant 0 : i32
    %c0_i32_1 = arith.constant 0 : i32
    return %c0_i32, %c0_i32_0 : i32, i32
  }
  func.func @transform_6(%arg0: i32) -> (i32, i32, i32) {
    %c0_i32 = arith.constant 0 : i32
    %c0_i32_0 = arith.constant 0 : i32
    %c0_i32_1 = arith.constant 0 : i32
    %c0_i32_2 = arith.constant 0 : i32
    return %c0_i32, %c0_i32_0, %c0_i32_1 : i32, i32, i32
  }
  func.func @transform_7(%arg0: i32) -> (i32, i32, i32) {
    %c0_i32 = arith.constant 0 : i32
    %c0_i32_0 = arith.constant 0 : i32
    %c0_i32_1 = arith.constant 0 : i32
    return %arg0, %c0_i32, %c0_i32_0 : i32, i32, i32
  }
}

</mosaic_0001>

<bundles_post_ra>
// kernel: autoencoder_forward.3
= control target key start
LH: loop header
LB: loop body
LE: loop exit
PB: predicated region body
PF: predicated region fallthrough
CT: control target
= control target key end

     0   :  { %s2253_s24 = smov 0   ;;  %s3036_s0 = inlined_call_operand.vmem [shape: bf16[2,26,36], index: 0, kind: input, shape index: {}]   ;;  %s3037_s1 = inlined_call_operand.vmem [shape: bf16[16,13,26], index: 1, kind: input, shape index: {}]   ;;  %s3038_s2 = inlined_call_operand.vmem [shape: f32[13,1], index: 2, kind: input, shape index: {}]   ;;  %s3039_s3 = inlined_call_operand.vmem [shape: f32[4,36,100], index: 3, kind: input, shape index: {}]   ;;  %s3040_s4 = inlined_call_operand.vmem [shape: bf16[16,4,13], index: 4, kind: input, shape index: {}]   ;;  %s3041_s5 = inlined_call_operand.vmem [shape: f32[4,1], index: 5, kind: input, shape index: {}]   ;;  %s3042_s6 = inlined_call_operand.vmem [shape: f32[4,100,256], index: 6, kind: input, shape index: {}]   ;;  %s3043_s7 = inlined_call_operand.vmem [shape: f32[2,4,256], index: 7, kind: output, shape index: {}]  }
   0x1 LB: > { %s1816_s25 = sadd.s32 4294967295, %s2181_s24   ;;  %p1820_p0 = scmp.ge.s32.totalorder %s2181_s24, 1  ;;  %s2181_s24 = sphi %s2253_s24, %s17_s24  }
   0x2   : > { %p237_p1 = scmp.lt.s32.totalorder %s2181_s24, 3 }
   0x4   : > { %p238_p2 = pnand %p1820_p0, %p237_p1 }
   0x5   : > { %p269_p3 = scmp.lt.s32.totalorder (!%p238_p2), %s1816_s25, 1  ;;  %s2183_s30 = smov (!%p238_p2), 99  }
   0x6   : > { %241 = sbr.rel (%p238_p2) target bundleno = 1367 (0x557), region = 48  ;;  %s2184_s8 = smov (!%p238_p2), 98  }
   0x7   : > { %s2185_s9 = smov (!%p238_p2), 93   ;;  %s2186_s10 = smov (!%p238_p2), 7  }
   0x8   : > { %s2187_s11 = smov (!%p238_p2), 6   ;;  %s2188_s12 = smov (!%p238_p2), 1  }
   0x9   : > { %s2189_s13 = smov (!%p238_p2), 5   ;;  %s2190_s14 = smov (!%p238_p2), 97  }
   0xa   : > { %s2191_s15 = smov (!%p238_p2), 127   ;;  %s2192_s16 = smov (!%p238_p2), 35  }
   0xb   : > { %s3045_s25 = smov (!%p269_p3, %s1816_s25), 1  ;;  %s2193_s17 = smov 122   ;;  %vm350_vm0 = vcmask 7168   ;;  %vm436_vm1 = vcmask 1044480   ;;  %v1842_v9 = vld [vmem:[%s3037_s1] sm:$0xf] }
   0xc   : > { %s2097_s26 = sshll.u32 %s3045_s25, 4  ;;  %s2194_s18 = smov 123   ;;  %v2101_v10 = vld [vmem:[%s3037_s1] sm:$0x70]  ;;  %vm432_vm2 = vcmask 211968   ;;  %vm318_vm3 = vcmask 48128  }
   0xd   : > { %s273_s29 = scalar_lea.vmem %s3036_s0, %s2097_s26  ;;  %s2195_s19 = smov 30   ;;  %v1843_v11 = vor.u32 %v2101_v10, %v1842_v9  ;;  %vm302_vm4 = vcmask 56320   ;;  %v1870_v21 = vld [vmem:[%s3037_s1 + $0x20] sm:$0xf]  ;;  %v2105_v22 = vld [vmem:[%s3037_s1 + $0x20] sm:$0x70] }
   0xe   : > { %v1831_v0 = vld [vmem:[%s273_s29 + $0x8] sm:$0xf]  ;;  %v2100_v1 = vld [vmem:[%s273_s29 + $0x8] sm:$0x10]  ;;  %v2277_v3 = vld [vmem:[%s273_s29] sm:$0xff]  ;;  %v1871_v23 = vor.u32 %v2105_v22, %v1870_v21  ;;  %v2196_v31 = vmov 0  }
   0xf   : > { %v2267_v2 = vor.u32 %v2100_v1, %v1831_v0  ;;  %v1849_v24 = vld [vmem:[%s3037_s1 + $0x10] sm:$0xf]  ;;  %v2103_v25 = vld [vmem:[%s3037_s1 + $0x10] sm:$0x70]  ;;  %2166 = vset.pattern.permute.xlu0 %v2196_v31  ;;  %v2344_v32 = vld [vmem:[%s3039_s3 + $0x48] sm:$0xf]  ;;  %2165 = vset.pattern.permute.xlu2 %v2196_v31 }
  0x10   : > { %v1850_v29 = vor.u32 %v2103_v25, %v1849_v24  ;;  %vm683_vm5 = vcmask 1043456   ;;  %v1837_v33 = vld [vmem:[%s3037_s1 + $0x8] sm:$0xf]  ;;  %v537_v34 = vld [vmem:[%s3038_s2] sm:$0xff]  ;;  %v2102_v36 = vld [vmem:[%s3037_s1 + $0x8] sm:$0x70] }
  0x11   : > { %296 = vrot.lane.b32.xlu1 %v2267_v2, %s2183_s30  ;;  %312 = vrot.lane.b32.xlu0 %v2267_v2, %s2184_s8  ;;  %v2310_v8 = vsel %vm436_vm1, %v2267_v2, 0  ;;  %v538_v35 = vld [vmem:[%s3038_s2 + $0x8] sm:$0x1f]  ;;  %v1856_v37 = vld [vmem:[%s3037_s1 + $0x18] sm:$0xf]  ;;  %v1838_v44 = vor.u32 %v2102_v36, %v1837_v33  ;;  %vm334_vm6 = vcmask 39936  }
  0x12   : > { %344 = vrot.lane.b32.xlu2 %v2267_v2, %s2185_s9  ;;  %471 = vmatpush.bf16.msra.mxu1 %v2310_v8  ;;  %v2104_v38 = vld [vmem:[%s3037_s1 + $0x18] sm:$0x70]  ;;  %v1890_v41 = vld [vmem:[%s3039_s3 + $0x40] sm:$0xff]  ;;  %v1888_v48 = vld [vmem:[%s3039_s3 + $0x30] sm:$0xff]  ;;  %vm366_vm7 = vcmask 285696   ;;  %s2198_s20 = smov 121  }
  0x13   : > { %v1857_v45 = vor.u32 %v2104_v38, %v1856_v37  ;;  %v1889_v46 = vld [vmem:[%s3039_s3 + $0x38] sm:$0xff]  ;;  %v1877_v49 = vld [vmem:[%s3037_s1 + $0x30] sm:$0xf]  ;;  %v2107_v50 = vld [vmem:[%s3037_s1 + $0x30] sm:$0x70]  ;;  %vm398_vm8 = vcmask 244736  }
  0x14   : > { %v1887_v51 = vld [vmem:[%s3039_s3 + $0x28] sm:$0xff]  ;;  %v1878_v55 = vor.u32 %v2107_v50, %v1877_v49  ;;  %v1884_v58 = vld [vmem:[%s3037_s1 + $0x38] sm:$0xf]  ;;  %v2108_v59 = vld [vmem:[%s3037_s1 + $0x38] sm:$0x70]  ;;  %vm382_vm9 = vcmask 252928  }
  0x15   : > { %v1885_v0 = vor.u32 %v2108_v59, %v1884_v58  ;;  %vm676_vm10 = vcmask 293888   ;;  %v1923_v49 = vld [vmem:[%s3037_s1 + $0x58] sm:$0xf]  ;;  %v2112_v50 = vld [vmem:[%s3037_s1 + $0x58] sm:$0x70]  ;;  %vm414_vm11 = vcmask 236544  }
  0x16   : > { %472 = vmatpush.bf16.msra.mxu1 %v2277_v3  ;;  %vm1121_vm12 = vcmask 1045504   ;;  %vm1122_vm13 = vcmask 1046528   ;;  %vm1117_vm14 = vcmask 105472   ;;  %s2204_s28 = smov 11   ;;  %s2207_s29 = smov 118   ;;  %vm1055_vm15 = vcmask 89088  }
  0x19   : > { %300 = vrot.lane.b32.xlu1 %v2267_v2, %s2186_s10  ;;  %316 = vrot.lane.b32.xlu0 %v2267_v2, %s2187_s11 }
  0x1a   : > { %348 = vrot.lane.b32.xlu2 %v2267_v2, %s2188_s12  ;;  %602 = vmatpush.bf16.msrb.mxu1 %v2310_v8 }
  0x1b   : > { %1844 = vmatmul.msk.bf16.vlgmr.msra.gmra.mxu1 %vm432_vm2, %v1843_v11  ;;  %v557_v11 = vld [vmem:[%s3039_s3 + $0x20] sm:$0xf] }
  0x1e   : > { %603 = vmatpush.bf16.msrb.mxu1 %v2277_v3 }
  0x21   : > { %314 = vrot.lane.b32.xlu1 %v2277_v3, %s2187_s11  ;;  %310 = vrot.lane.b32.xlu0 %v2277_v3, %s2184_s8  ;;  %s2202_s11 = smov 10  }
  0x22   : > { %294 = vrot.lane.b32.xlu2 %v2277_v3, %s2183_s30  ;;  %1895 = vmatpush.msk.msra.mxu1 %vm683_vm5, %v557_v11 }
  0x29   : > { %342 = vrot.lane.b32.xlu1 %v2277_v3, %s2185_s9  ;;  %298 = vrot.lane.b32.xlu0 %v2277_v3, %s2186_s10  ;;  %s2197_s10 = smov 31   ;;  %s2205_s9 = smov 9  }
  0x2a   : > { %346 = vrot.lane.b32.xlu2 %v2277_v3, %s2188_s12 }
  0x2b   : > { %1872 = vmatmul.msk.bf16.vlgmr.msrb.gmra.mxu1 %vm432_vm2, %v1871_v23 }
  0x31   : > { %332 = vrot.lane.b32.xlu1 %v2267_v2, %s2189_s13  ;;  %328 = vrot.lane.b32.xlu0 %v2267_v2, %s2190_s14 }
  0x32   : > { %360 = vrot.lane.b32.xlu2 %v2267_v2, %s2191_s15 }
  0x39   : > { %326 = vrot.lane.b32.xlu1 %v2277_v3, %s2190_s14  ;;  %364 = vrot.lane.b32.xlu0 %v2267_v2, %s2192_s16  ;;  %s2212_s14 = smov 117  }
  0x3a   : > { %330 = vrot.lane.b32.xlu2 %v2277_v3, %s2189_s13  ;;  %s2203_s13 = smov 38  }
  0x41   : > { %362 = vrot.lane.b32.xlu1 %v2277_v3, %s2192_s16  ;;  %358 = vrot.lane.b32.xlu0 %v2277_v3, %s2191_s15  ;;  %s2098_s16 = sshll.u32 %s3045_s25, 3 }
  0x42   : > { %546 = vperm.xlu2 %2165, %v538_v35  }
  0x49   : > { %392 = vrot.lane.b32.xlu1 %v2267_v2, %s2193_s17  ;;  %541 = vperm.xlu0 %2166, %v537_v34  }
  0x4a   : > { %396 = vrot.lane.b32.xlu2 %v2267_v2, %s2195_s19 }
  0x51   : > { %376 = vrot.lane.b32.xlu1 %v2267_v2, %s2194_s18  ;;  %390 = vrot.lane.b32.xlu0 %v2277_v3, %s2193_s17 }
  0x52   : > { %380 = vrot.lane.b32.xlu2 %v2267_v2, %s2197_s10 }
  0x59   : > { %394 = vrot.lane.b32.xlu1 %v2277_v3, %s2195_s19  ;;  %378 = vrot.lane.b32.xlu0 %v2277_v3, %s2197_s10  ;;  %s2201_s10 = smov 39  }
  0x5a   : > { %374 = vrot.lane.b32.xlu2 %v2277_v3, %s2194_s18  ;;  %s2199_s18 = smov 29  }
  0x61   : > { %408 = vrot.lane.b32.xlu1 %v2267_v2, %s2198_s20  ;;  %406 = vrot.lane.b32.xlu0 %v2277_v3, %s2198_s20 }
  0x62   : > { %412 = vrot.lane.b32.xlu2 %v2267_v2, %s2199_s18  ;;  %v555_v2 = vld [vmem:[%s3039_s3 + $0x10] sm:$0xff] }
  0x69   : > { %410 = vrot.lane.b32.xlu1 %v2277_v3, %s2199_s18 }
  0x6c   : > { %v345_v4 = vpop.permute.xlu2 %344 }
  0x74   : > { %v349_v5 = vpop.permute.xlu2 %348 }
  0x75   : > { %v357_v6 = vsel %vm350_vm0, %v345_v4, %v349_v5  ;;  %v1865_v4 = vld [vmem:[%s3037_s1 + $0x28] sm:$0xf]  ;;  %v2106_v5 = vld [vmem:[%s3037_s1 + $0x28] sm:$0x70] }
  0x76   : > { %v2305_v7 = vsel %vm436_vm1, %v357_v6, 0  ;;  %v1866_v10 = vor.u32 %v2106_v5, %v1865_v4 }
  0x77   : > { %445 = vmatpush.bf16.msra.mxu0 %v2305_v7 }
  0x7c   : > { %v295_v14 = vpop.permute.xlu2 %294 }
  0x83   : > { %v297_v12 = vpop.permute.xlu1 %296  ;;  %v313_v13 = vpop.permute.xlu0 %312 }
  0x84   : > { %v347_v30 = vpop.permute.xlu2 %346 }
  0x8b   : > { %v301_v15 = vpop.permute.xlu1 %300  ;;  %v317_v16 = vpop.permute.xlu0 %316 }
  0x8c   : > { %v325_v17 = vsel %vm318_vm3, %v313_v13, %v317_v16  ;;  %v309_v18 = vsel %vm302_vm4, %v297_v12, %v301_v15  ;;  %v361_v47 = vpop.permute.xlu2 %360  ;;  %v556_v12 = vld [vmem:[%s3039_s3 + $0x18] sm:$0xff]  ;;  %v554_v13 = vld [vmem:[%s3039_s3 + $0x8] sm:$0xff]  ;;  %v553_v15 = vld [vmem:[%s3039_s3] sm:$0xff] }
  0x8d   : > { %v490_v19 = vsel %vm436_vm1, %v325_v17, 0  ;;  %v519_v20 = vsel %vm436_vm1, %v309_v18, 0  ;;  %731 = vmatpush.msra.mxu1 %v556_v12 }
  0x8e   : > { %498 = vmatpush.bf16.msra.mxu2 %v490_v19  ;;  %527 = vmatpush.bf16.msra.mxu3 %v519_v20 }
  0x8f   : > { %732 = vmatpush.msra.mxu1 %v555_v2 }
  0x91   : > { %733 = vmatpush.msra.mxu1 %v554_v13 }
  0x93   : > { %v315_v26 = vpop.permute.xlu1 %314  ;;  %v311_v27 = vpop.permute.xlu0 %310  ;;  %734 = vmatpush.msra.mxu1 %v553_v15 }
  0x94   : > { %v321_v28 = vsel %vm318_vm3, %v311_v27, %v315_v26  ;;  %v331_v57 = vpop.permute.xlu2 %330  ;;  %vm1102_vm3 = vcmask 736256  }
  0x95   : > { %499 = vmatpush.bf16.msra.mxu2 %v321_v28 }
  0x98   : > { %1851 = vmatmul.msk.bf16.vlgmr.msra.gmra.mxu2 %vm432_vm2, %v1850_v29 }
  0x99   : > { %627 = vmatpush.bf16.msrb.mxu2 %v490_v19  ;;  %v474_v19 = vpop.f32.mrf.mxu1 }
  0x9b   : > { %v343_v39 = vpop.permute.xlu1 %342  ;;  %v299_v40 = vpop.permute.xlu0 %298 }
  0x9c   : > { %v353_v42 = vsel %vm350_vm0, %v343_v39, %v347_v30  ;;  %v305_v43 = vsel %vm302_vm4, %v295_v14, %v299_v40  ;;  %v2447_v14 = vpop.permute.xlu2 %546  ;;  %vm1094_vm4 = vcmask 744448  }
  0x9d   : > { %628 = vmatpush.bf16.msrb.mxu2 %v321_v28  ;;  %446 = vmatpush.bf16.msra.mxu0 %v353_v42 }
  0x9e   : > { %528 = vmatpush.bf16.msra.mxu3 %v305_v43 }
  0xa0   : > { %1839 = vmatmul.msk.bf16.vlgmr.msra.gmra.mxu0 %vm432_vm2, %v1838_v44 }
  0xa1   : > { %2117 = vmatpush.msk.msra.mxu2 %vm683_vm5, %v2344_v32  ;;  %1858 = vmatmul.msk.bf16.vlgmr.msra.gmra.mxu3 %vm432_vm2, %v1857_v45 }
  0xa3   : > { %2118 = vmatpush.msra.mxu2 %v1890_v41  ;;  %v333_v52 = vpop.permute.xlu1 %332  ;;  %v329_v53 = vpop.permute.xlu0 %328 }
  0xa4   : > { %v341_v54 = vsel %vm334_vm6, %v329_v53, %v333_v52  ;;  %v397_v16 = vpop.permute.xlu2 %396  ;;  %v1909_v53 = vld [vmem:[%s3037_s1 + $0x40] sm:$0xf] }
  0xa5   : > { %2119 = vmatpush.msra.mxu2 %v1889_v46  ;;  %v648_v56 = vsel %vm436_vm1, %v341_v54, 0  ;;  %v2109_v54 = vld [vmem:[%s3037_s1 + $0x40] sm:$0x70] }
  0xa6   : > { %656 = vmatpush.bf16.msrb.mxu3 %v648_v56  ;;  %v1910_v58 = vor.u32 %v2109_v54, %v1909_v53 }
  0xa7   : > { %2120 = vmatpush.msra.mxu2 %v1888_v48 }
  0xa8   : > { %1879 = vmatmul.msk.bf16.vlgmr.msrb.gmra.mxu2 %vm432_vm2, %v1878_v55 }
  0xa9   : > { %2121 = vmatpush.msra.mxu2 %v1887_v51 }
  0xab   : > { %762 = vmatpush.bf16.msrb.mxu2 %v2305_v7  ;;  %v327_v60 = vpop.permute.xlu1 %326  ;;  %v365_v61 = vpop.permute.xlu0 %364 }
  0xac   : > { %v337_v62 = vsel %vm334_vm6, %v327_v60, %v331_v57  ;;  %v373_v63 = vsel %vm366_vm7, %v361_v47, %v365_v61  ;;  %v381_v20 = vpop.permute.xlu2 %380  ;;  %vm1342_vm6 = vcmask 818176  }
  0xad   : > { %657 = vmatpush.bf16.msrb.mxu3 %v337_v62  ;;  %v2408_v1 = vsel %vm436_vm1, %v373_v63, 0 }
  0xae   : > { %580 = vmatpush.bf16.msrb.mxu0 %v2408_v1 }
  0xaf   : > { %763 = vmatpush.bf16.msrb.mxu2 %v353_v42 }
  0xb1   : > { %1886 = vmatmul.msk.bf16.vlgmr.msrb.gmra.mxu3 %vm432_vm2, %v1885_v0 }
  0xb2   : > { %2122 = vmatpush.msk.msra.mxu3 %vm683_vm5, %v557_v11 }
  0xb3   : > { %v363_v6 = vpop.permute.xlu1 %362  ;;  %v359_v7 = vpop.permute.xlu0 %358 }
  0xb4   : > { %v2421_v9 = vsel %vm366_vm7, %v359_v7, %v363_v6  ;;  %2123 = vmatpush.msra.mxu3 %v556_v12  ;;  %v375_v34 = vpop.permute.xlu2 %374  ;;  %vm1110_vm7 = vcmask 728064  }
  0xb5   : > { %581 = vmatpush.bf16.msrb.mxu0 %v2421_v9 }
  0xb6   : > { %2124 = vmatpush.msra.mxu3 %v555_v2 }
  0xb8   : > { %1867 = vmatmul.msk.bf16.vlgmr.msrb.gmra.mxu0 %vm432_vm2, %v1866_v10  ;;  %2125 = vmatpush.msra.mxu3 %v554_v13  ;;  %v1916_v10 = vld [vmem:[%s3037_s1 + $0x50] sm:$0xf] }
  0xb9   : > { %1892 = vmatpush.msk.msra.mxu0 %vm683_vm5, %v2344_v32  ;;  %v476_v32 = vpop.f32.mrf.mxu1 }
  0xba   : > { %2126 = vmatpush.msra.mxu3 %v553_v15  ;;  %v1904_v15 = vld [vmem:[%s3037_s1 + $0x48] sm:$0xf] }
  0xbb   : > { %699 = vmatpush.msra.mxu0 %v1890_v41  ;;  %v2454_v17 = vpop.permute.xlu0 %541  ;;  %v393_v18 = vpop.permute.xlu1 %392 }
  0xbc   : > { %784 = vmatpush.bf16.msrb.mxu3 %v2310_v8  ;;  %v405_v25 = vsel %vm398_vm8, %v393_v18, %v397_v16  ;;  %v2110_v16 = vld [vmem:[%s3037_s1 + $0x48] sm:$0x70] }
  0xbd   : > { %700 = vmatpush.msra.mxu0 %v1889_v46  ;;  %v803_v28 = vsel %vm436_vm1, %v405_v25, 0  ;;  %v1929_v18 = vld [vmem:[%s3039_s3 + $0x68] sm:$0xff]  ;;  %v413_v25 = vpop.permute.xlu2 %412 }
  0xbf   : > { %701 = vmatpush.msra.mxu0 %v1888_v48 }
  0xc0   : > { %785 = vmatpush.bf16.msrb.mxu3 %v2277_v3 }
  0xc1   : > { %702 = vmatpush.msra.mxu0 %v1887_v51  ;;  %v1924_v51 = vor.u32 %v2112_v50, %v1923_v49  ;;  %v605_v52 = vpop.f32.mrf.mxu1 }
  0xc3   : > { %v391_v21 = vpop.permute.xlu0 %390  ;;  %v377_v26 = vpop.permute.xlu1 %376  ;;  %811 = vmatpush.bf16.msrb.mxu0 %v803_v28 }
  0xc4   : > { %v389_v29 = vsel %vm382_vm9, %v377_v26, %v381_v20  ;;  %v1927_v20 = vld [vmem:[%s3039_s3 + $0x58] sm:$0xff] }
  0xc5   : > { %v832_v30 = vsel %vm436_vm1, %v389_v29, 0 }
  0xc6   : > { %840 = vmatpush.bf16.msrb.mxu1 %v832_v30 }
  0xc9   : > { %v607_v63 = vpop.f32.mrf.mxu1 }
  0xcb   : > { %v379_v35 = vpop.permute.xlu0 %378  ;;  %v395_v42 = vpop.permute.xlu1 %394 }
  0xcc   : > { %v385_v37 = vsel %vm382_vm9, %v375_v34, %v379_v35  ;;  %v401_v43 = vsel %vm398_vm8, %v391_v21, %v395_v42  ;;  %v1952_v35 = vld [vmem:[%s3037_s1 + $0x70] sm:$0xf] }
  0xcd   : > { %841 = vmatpush.bf16.msrb.mxu1 %v385_v37  ;;  %812 = vmatpush.bf16.msrb.mxu0 %v401_v43  ;;  %v2115_v37 = vld [vmem:[%s3037_s1 + $0x70] sm:$0x70] }
  0xd3   : > { %v409_v26 = vpop.permute.xlu1 %408  ;;  %v407_v34 = vpop.permute.xlu0 %406 }
  0xd4   : > { %v421_v29 = vsel %vm414_vm11, %v409_v26, %v413_v25 }
 0x11b   : > { %v501_v23 = vpop.f32.mrf.mxu2 }
 0x11d   : > { %v448_v22 = vpop.f32.mrf.mxu0 }
 0x11e   : > { %v475_v24 = vadd.f32 %v474_v19, %v448_v22  ;;  %v1928_v19 = vld [vmem:[%s3039_s3 + $0x60] sm:$0xff] }
 0x120   : > { %v506_v27 = vadd.f32 %v501_v23, %v475_v24  ;;  %v1926_v23 = vld [vmem:[%s3039_s3 + $0x50] sm:$0xff] }
 0x123   : > { %v503_v40 = vpop.f32.mrf.mxu2 }
 0x124   : > { %v530_v31 = vpop.f32.mrf.mxu3 }
 0x125   : > { %v535_v33 = vadd.f32 %v530_v31, %v506_v27  ;;  %v450_v36 = vpop.f32.mrf.mxu0  ;;  %v1940_v27 = vld [vmem:[%s3037_s1 + $0x68] sm:$0xf]  ;;  %v982_v31 = vsel %vm436_vm1, %v421_v29, 0  ;;  %vm1063_vm1 = vcmask 80896  }
 0x126   : > { %v477_v38 = vadd.f32 %v476_v32, %v450_v36  ;;  %v1945_v32 = vld [vmem:[%s3037_s1 + $0x60] sm:$0xf] }
 0x127   : > { %v549_v39 = vadd.f32 %v2454_v17, %v535_v33  ;;  %v2113_v33 = vld [vmem:[%s3037_s1 + $0x60] sm:$0x70] }
 0x128   : > { %v507_v44 = vadd.f32 %v503_v40, %v477_v38  ;;  %v1946_v36 = vor.u32 %v2113_v33, %v1945_v32  ;;  %v411_v38 = vpop.permute.xlu1 %410 }
 0x129   : > { %v551_v41 = vmax.f32 %v549_v39, 0.0  ;;  %v1953_v39 = vor.u32 %v2115_v37, %v1952_v35 }
 0x12b   : > { %1896 = vmatmul.msk.f32.vlgmr.msra.gmra.mxu1 %vm676_vm10, %v551_v41  ;;  %v630_v55 = vpop.f32.mrf.mxu2  ;;  %v417_v41 = vsel %vm414_vm11, %v407_v34, %v411_v38 }
 0x12c   : > { %v532_v45 = vpop.f32.mrf.mxu3  ;;  %961 = vmatpush.bf16.msra.mxu1 %v803_v28  ;;  %v2114_v28 = vld [vmem:[%s3037_s1 + $0x68] sm:$0x70] }
 0x12d   : > { %v536_v46 = vadd.f32 %v532_v45, %v507_v44  ;;  %v1941_v30 = vor.u32 %v2114_v28, %v1940_v27 }
 0x12f   : > { %v550_v47 = vadd.f32 %v2447_v14, %v536_v46 }
 0x130   : > { %962 = vmatpush.bf16.msra.mxu1 %v401_v43 }
 0x131   : > { %v552_v48 = vmax.f32 %v550_v47, 0.0 }
 0x133   : > { %1897 = vmatmul.msk.f32.vlgmr.msra.gmra.mxu3 %vm676_vm10, %v552_v48  ;;  %1925 = vmatmul.msk.bf16.vlgmr.msrb.gmra.mxu1 %vm432_vm2, %v1924_v51  ;;  %v632_v5 = vpop.f32.mrf.mxu2 }
 0x134   : > { %914 = vmatpush.bf16.msra.mxu3 %v2408_v1  ;;  %v659_v59 = vpop.f32.mrf.mxu3 }
 0x135   : > { %v583_v56 = vpop.f32.mrf.mxu0 }
 0x136   : > { %v606_v57 = vadd.f32 %v605_v52, %v583_v56 }
 0x138   : > { %915 = vmatpush.bf16.msra.mxu3 %v2421_v9  ;;  %v635_v60 = vadd.f32 %v630_v55, %v606_v57  ;;  %v2111_v9 = vld [vmem:[%s3037_s1 + $0x50] sm:$0x70] }
 0x139   : > { %v1917_v2 = vor.u32 %v2111_v9, %v1916_v10 }
 0x13a   : > { %v664_v61 = vadd.f32 %v659_v59, %v635_v60 }
 0x13b   : > { %1911 = vmatmul.msk.bf16.vlgmr.msrb.gmra.mxu3 %vm432_vm2, %v1910_v58 }
 0x13c   : > { %v666_v62 = vadd.f32 %v664_v61, %v2454_v17  ;;  %v661_v7 = vpop.f32.mrf.mxu3 }
 0x13d   : > { %v585_v0 = vpop.f32.mrf.mxu0 }
 0x13e   : > { %v668_v1 = vmax.f32 %v666_v62, 0.0  ;;  %v608_v4 = vadd.f32 %v607_v63, %v585_v0  ;;  %v1959_v62 = vld [vmem:[%s3037_s1 + $0x78] sm:$0xf]  ;;  %v2116_v63 = vld [vmem:[%s3037_s1 + $0x78] sm:$0x70] }
 0x13f   : > { %v1960_v0 = vor.u32 %v2116_v63, %v1959_v62 }
 0x140   : > { %v636_v6 = vadd.f32 %v632_v5, %v608_v4  ;;  %1893 = vmatmul.msk.f32.vlgmr.msra.gmra.mxu0 %vm676_vm10, %v668_v1  ;;  %v1966_v1 = vld [vmem:[%s3039_s3 + $0x98] sm:$0xf]  ;;  %v1965_v4 = vld [vmem:[%s3039_s3 + $0x90] sm:$0xff]  ;;  %v1964_v5 = vld [vmem:[%s3039_s3 + $0x88] sm:$0xff] }
 0x141   : > { %936 = vmatpush.bf16.msra.mxu0 %v2310_v8  ;;  %v1905_v8 = vor.u32 %v2110_v16, %v1904_v15  ;;  %1967 = vmatpush.msk.msrb.mxu3 %vm683_vm5, %v1966_v1  ;;  %v1973_v1 = vld [vmem:[%s3040_s4 + $0x4] sm:$0x3] }
 0x142   : > { %v665_v11 = vadd.f32 %v661_v7, %v636_v6  ;;  %v1963_v6 = vld [vmem:[%s3039_s3 + $0x80] sm:$0xff]  ;;  %v1962_v7 = vld [vmem:[%s3039_s3 + $0x78] sm:$0xff] }
 0x143   : > { %1954 = vmatmul.msk.bf16.vlgmr.msra.gmra.mxu1 %vm432_vm2, %v1953_v39  ;;  %1031 = vmatpush.msrb.mxu3 %v1965_v4  ;;  %v1975_v4 = vld [vmem:[%s3040_s4 + $0x6] sm:$0x3] }
 0x144   : > { %v667_v12 = vadd.f32 %v665_v11, %v2447_v14 }
 0x145   : > { %937 = vmatpush.bf16.msra.mxu0 %v2277_v3  ;;  %v1930_v3 = vld [vmem:[%s3039_s3 + $0x70] sm:$0xf]  ;;  %1032 = vmatpush.msrb.mxu3 %v1964_v5 }
 0x146   : > { %v669_v13 = vmax.f32 %v667_v12, 0.0 }
 0x147   : > { %1033 = vmatpush.msrb.mxu3 %v1963_v6  ;;  %v1233_v6 = vld [vmem:[%s3042_s6 + $0xc0] sm:$0xf] }
 0x148   : > { %1894 = vmatmul.msk.f32.vlgmr.msra.gmra.mxu2 %vm676_vm10, %v669_v13  ;;  %1918 = vmatmul.msk.bf16.vlgmr.msrb.gmra.mxu0 %vm432_vm2, %v1917_v2 }
 0x149   : > { %1931 = vmatpush.msk.msra.mxu2 %vm683_vm5, %v1930_v3  ;;  %1034 = vmatpush.msrb.mxu3 %v1962_v7  ;;  %v1231_v7 = vld [vmem:[%s3042_s6 + $0xb0] sm:$0xff] }
 0x14b   : > { %881 = vmatpush.msra.mxu2 %v1929_v18  ;;  %1942 = vmatmul.msk.bf16.vlgmr.msra.gmra.mxu3 %vm432_vm2, %v1941_v30 }
 0x14d   : > { %882 = vmatpush.msra.mxu2 %v1928_v19 }
 0x14f   : > { %883 = vmatpush.msra.mxu2 %v1927_v20 }
 0x150   : > { %1906 = vmatmul.msk.bf16.vlgmr.msrb.gmra.mxu2 %vm432_vm2, %v1905_v8 }
 0x151   : > { %884 = vmatpush.msra.mxu2 %v1926_v23 }
 0x153   : > { %990 = vmatpush.bf16.msrb.mxu2 %v982_v31 }
 0x157   : > { %991 = vmatpush.bf16.msrb.mxu2 %v417_v41  ;;  %v1114_v41 = vld [vmem:[%s3040_s4] sm:$0x3] }
 0x158   : > { %1947 = vmatmul.msk.bf16.vlgmr.msra.gmra.mxu0 %vm432_vm2, %v1946_v36 }
 0x1a8   : > { %v736_v21 = vpop.f32.mrf.mxu1 }
 0x1b0   : > { %v843_v48 = vpop.f32.mrf.mxu1 }
 0x1b6   : > { %v739_v40 = vpop.f32.mrf.mxu3 }
 0x1b8   : > { %v845_v58 = vpop.f32.mrf.mxu1 }
 0x1bd   : > { %v704_v22 = vpop.f32.mrf.mxu0 }
 0x1be   : > { %v737_v24 = vadd.f32 %v736_v21, %v704_v22  ;;  %v787_v44 = vpop.f32.mrf.mxu3 }
 0x1c0   : > { %v964_v16 = vpop.f32.mrf.mxu1 }
 0x1c5   : > { %v814_v45 = vpop.f32.mrf.mxu0 }
 0x1c6   : > { %v789_v52 = vpop.f32.mrf.mxu3 }
 0x1c8   : > { %v966_v23 = vpop.f32.mrf.mxu1 }
 0x1cb   : > { %v707_v42 = vpop.f32.mrf.mxu2 }
 0x1cc   : > { %v740_v43 = vadd.f32 %v739_v40, %v707_v42  ;;  %v2010_v42 = vld [vmem:[%s3042_s6 + $0x198] sm:$0xf] }
 0x1cd   : > { %v816_v56 = vpop.f32.mrf.mxu0 }
 0x1ce   : > { %v917_v11 = vpop.f32.mrf.mxu3 }
 0x1d3   : > { %v765_v46 = vpop.f32.mrf.mxu2 }
 0x1d4   : > { %v788_v47 = vadd.f32 %v787_v44, %v765_v46  ;;  %v2006_v44 = vld [vmem:[%s3042_s6 + $0x178] sm:$0xff] }
 0x1d5   : > { %v939_v12 = vpop.f32.mrf.mxu0  ;;  %v2002_v46 = vld [vmem:[%s3042_s6 + $0x158] sm:$0xff] }
 0x1d6   : > { %v819_v49 = vadd.f32 %v814_v45, %v788_v47  ;;  %v940_v13 = vadd.f32 %v939_v12, %v917_v11  ;;  %v919_v3 = vpop.f32.mrf.mxu3  ;;  %v2004_v45 = vld [vmem:[%s3042_s6 + $0x168] sm:$0xff]  ;;  %v1229_v12 = vld [vmem:[%s3042_s6 + $0xa0] sm:$0xff] }
 0x1d7   : > { %v2000_v47 = vld [vmem:[%s3042_s6 + $0x148] sm:$0xff] }
 0x1d8   : > { %v848_v50 = vadd.f32 %v843_v48, %v819_v49  ;;  %v969_v8 = vadd.f32 %v964_v16, %v940_v13  ;;  %v1998_v48 = vld [vmem:[%s3042_s6 + $0x138] sm:$0xff]  ;;  %v1996_v49 = vld [vmem:[%s3042_s6 + $0x128] sm:$0xff]  ;;  %v1227_v13 = vld [vmem:[%s3042_s6 + $0x90] sm:$0xff] }
 0x1d9   : > { %v1225_v16 = vld [vmem:[%s3042_s6 + $0x80] sm:$0xff] }
 0x1da   : > { %v850_v51 = vadd.f32 %v848_v50, %v2454_v17  ;;  %v1977_v50 = vld [vmem:[%s3040_s4 + $0x8] sm:$0x3] }
 0x1db   : > { %v767_v53 = vpop.f32.mrf.mxu2 }
 0x1dc   : > { %v852_v54 = vmax.f32 %v850_v51, 0.0  ;;  %v790_v55 = vadd.f32 %v789_v52, %v767_v53  ;;  %v1994_v51 = vld [vmem:[%s3042_s6 + $0x118] sm:$0xff]  ;;  %v1201_v52 = vld [vmem:[%s3041_s5] sm:$0xf]  ;;  %v1992_v53 = vld [vmem:[%s3042_s6 + $0x108] sm:$0xff] }
 0x1dd   : > { %v941_v18 = vpop.f32.mrf.mxu0 }
 0x1de   : > { %v820_v57 = vadd.f32 %v816_v56, %v790_v55  ;;  %1932 = vmatmul.msk.f32.vlgmr.msra.gmra.mxu2 %vm676_vm10, %v852_v54  ;;  %v942_v21 = vadd.f32 %v941_v18, %v919_v3  ;;  %v1990_v54 = vld [vmem:[%s3042_s6 + $0xf8] sm:$0xff]  ;;  %v1988_v55 = vld [vmem:[%s3042_s6 + $0xe8] sm:$0xff]  ;;  %v1223_v3 = vld [vmem:[%s3042_s6 + $0x70] sm:$0xff] }
 0x1df   : > { %v1986_v56 = vld [vmem:[%s3042_s6 + $0xd8] sm:$0xff] }
 0x1e0   : > { %v849_v59 = vadd.f32 %v845_v58, %v820_v57  ;;  %v970_v26 = vadd.f32 %v966_v23, %v942_v21 }
 0x1e2   : > { %v851_v60 = vadd.f32 %v849_v59, %v2447_v14 }
 0x1e4   : > { %v853_v61 = vmax.f32 %v851_v60, 0.0 }
 0x1e6   : > { %1933 = vmatmul.msk.f32.gmra.mxu2 %vm676_vm10, %v853_v61 }
 0x1ee   : > { %1961 = vmatmul.msk.bf16.vlgmr.msrb.gmra.mxu2 %vm432_vm2, %v1960_v0  ;;  %vm1071_vm2 = vcmask 72704  }
 0x261   : > { %v886_v10 = vpop.f32.mrf.mxu2 }
 0x262   : > { %v892_v9 = vadd.f32 %v886_v10, %v737_v24 }
 0x269   : > { %v889_v2 = vpop.f32.mrf.mxu2 }
 0x26a   : > { %v893_v15 = vadd.f32 %v889_v2, %v740_v43  ;;  %v2008_v43 = vld [vmem:[%s3042_s6 + $0x188] sm:$0xff] }
 0x271   : > { %v993_v19 = vpop.f32.mrf.mxu2 }
 0x272   : > { %v998_v20 = vadd.f32 %v993_v19, %v969_v8 }
 0x274   : > { %v1000_v22 = vadd.f32 %v998_v20, %v2454_v17  ;;  %v2200_v17 = vmov 65535  }
 0x275   : > { %v1123_v36 = vsel %vm1121_vm12, 4294967295, %v2200_v17  ;;  %v1228_v17 = vld [vmem:[%s3042_s6 + $0x98] sm:$0xff] }
 0x276   : > { %v1002_v25 = vmax.f32 %v1000_v22, 0.0  ;;  %v2571_v39 = vsel %vm1122_vm13, %v1123_v36, 0  ;;  %v1213_v36 = vld [vmem:[%s3042_s6 + $0x20] sm:$0xff] }
 0x278   : > { %1968 = vmatmul.msk.f32.vlgmr.msrb.gmra.mxu3 %vm676_vm10, %v1002_v25  ;;  %v1221_v25 = vld [vmem:[%s3042_s6 + $0x60] sm:$0xff] }
 0x279   : > { %v995_v24 = vpop.f32.mrf.mxu2 }
 0x27a   : > { %v999_v27 = vadd.f32 %v995_v24, %v970_v26  ;;  %v2009_v26 = vld [vmem:[%s3042_s6 + $0x190] sm:$0xf]  ;;  %v1234_v24 = vld [vmem:[%s3042_s6 + $0xc8] sm:$0xf] }
 0x27c   : > { %v1001_v28 = vadd.f32 %v999_v27, %v2447_v14  ;;  %v1219_v27 = vld [vmem:[%s3042_s6 + $0x50] sm:$0xff] }
 0x27e   : > { %v1003_v29 = vmax.f32 %v1001_v28, 0.0  ;;  %v2007_v28 = vld [vmem:[%s3042_s6 + $0x180] sm:$0xff] }
 0x280   : > { %1969 = vmatmul.msk.f32.gmra.mxu3 %vm676_vm10, %v1003_v29  ;;  %v1232_v29 = vld [vmem:[%s3042_s6 + $0xb8] sm:$0xff] }
 0x2fb   : > { %v1036_v30 = vpop.f32.mrf.mxu3 }
 0x2fc   : > { %v1042_v31 = vadd.f32 %v1036_v30, %v892_v9  ;;  %v1981_v30 = vld [vmem:[%s3040_s4 + $0xc] sm:$0x3] }
 0x2fe   : > { %v1044_v33 = vpack.c.bf16 %v1042_v31, %v1042_v31  ;;  %v1217_v31 = vld [vmem:[%s3042_s6 + $0x40] sm:$0xff] }
 0x300   : > { %v1048_v37 = vunpack.c.l.b16 %v1044_v33  ;;  %v1230_v33 = vld [vmem:[%s3042_s6 + $0xa8] sm:$0xff] }
 0x303   : > { %v1039_v32 = vpop.f32.mrf.mxu3 }
 0x304   : > { %v1043_v34 = vadd.f32 %v1039_v32, %v893_v15  ;;  %v1970_v15 = vld [vmem:[%s3040_s4 + $0x2] sm:$0x3]  ;;  %v2005_v32 = vld [vmem:[%s3042_s6 + $0x170] sm:$0xff] }
 0x306   : > { %v1045_v35 = vpack.c.bf16 %v1043_v34, %v1043_v34  ;;  %v1215_v34 = vld [vmem:[%s3042_s6 + $0x30] sm:$0xff] }
 0x308   : > { %v1049_v38 = vunpack.c.l.b16 %v1045_v35  ;;  %v2003_v35 = vld [vmem:[%s3042_s6 + $0x160] sm:$0xff] }
 0x30a   : > { %v2573_v40 = vpack.c.b16 %v1049_v38, %v1048_v37  ;;  %v1983_v37 = vld [vmem:[%s3040_s4 + $0xe] sm:$0x3] }
 0x30c   : > { %1051 = vrot.lane.b32.xlu1 %v2573_v40, %s2201_s10  ;;  %1061 = vrot.lane.b32.xlu0 %v2573_v40, %s2202_s11  ;;  %v2579_v14 = vand.u32 %v2571_v39, %v2573_v40  ;;  %s2208_s10 = smov 91   ;;  %s2209_s11 = smov 119  }
 0x30d   : > { %1059 = vrot.lane.b32.xlu2 %v2573_v40, %s2203_s13  ;;  %s2206_s13 = smov 37  }
 0x30e   : > { %1153 = vmatpush.bf16.msrb.mxu1 %v2579_v14 }
 0x311   : > { %1972 = vmatmul.msk.bf16.vlgmr.msrb.gmra.mxu1 %vm1117_vm14, %v1114_v41  ;;  %v1226_v41 = vld [vmem:[%s3042_s6 + $0x88] sm:$0xff] }
 0x312   : > { %1267 = vmatpush.bf16.msra.mxu1 %v2579_v14 }
 0x314   : > { %1077 = vrot.lane.b32.xlu1 %v2573_v40, %s2188_s12  ;;  %1075 = vrot.lane.b32.xlu0 %v2573_v40, %s2199_s18 }
 0x315   : > { %1053 = vrot.lane.b32.xlu2 %v2573_v40, %s2204_s28 }
 0x316   : > { %2013 = vmatpush.msk.msrb.mxu1 %vm683_vm5, %v2010_v42  ;;  %v1211_v42 = vld [vmem:[%s3042_s6 + $0x10] sm:$0xff] }
 0x318   : > { %1376 = vmatpush.msrb.mxu1 %v2008_v43  ;;  %v1978_v43 = vld [vmem:[%s3040_s4 + $0xa] sm:$0x3] }
 0x31a   : > { %1377 = vmatpush.msrb.mxu1 %v2006_v44 }
 0x31c   : > { %1378 = vmatpush.msrb.mxu1 %v2004_v45  ;;  %1082 = vrot.lane.b32.xlu1 %v2573_v40, %s2191_s15  ;;  %s278_s15 = scalar_lea.vmem %s3043_s7, %s2098_s16 }
 0x31d   : > { %1069 = vrot.lane.b32.xlu0 %v2573_v40, %s2205_s9  ;;  %1067 = vrot.lane.b32.xlu2 %v2573_v40, %s2206_s13  ;;  %s2211_s13 = smov 89  }
 0x31e   : > { %1379 = vmatpush.msrb.mxu1 %v2002_v46  ;;  %v1999_v46 = vld [vmem:[%s3042_s6 + $0x140] sm:$0xff] }
 0x320   : > { %1380 = vmatpush.msrb.mxu1 %v2000_v47  ;;  %v1224_v47 = vld [vmem:[%s3042_s6 + $0x78] sm:$0xff] }
 0x321   : > { %1980 = vmatmul.msk.bf16.vlgmr.msra.gmra.mxu1 %vm1117_vm14, %v1977_v50  ;;  %v1997_v50 = vld [vmem:[%s3042_s6 + $0x130] sm:$0xff] }
 0x322   : > { %1381 = vmatpush.msrb.mxu1 %v1998_v48 }
 0x324   : > { %1382 = vmatpush.msrb.mxu1 %v1996_v49  ;;  %1098 = vrot.lane.b32.xlu1 %v2573_v40, %s2207_s29  ;;  %v1209_v49 = vld [vmem:[%s3042_s6] sm:$0xff] }
 0x325   : > { %1204 = vperm.xlu0 %2166, %v1201_v52   ;;  %1084 = vrot.lane.b32.xlu2 %v2573_v40, %s2183_s30  ;;  %s2210_s30 = smov 90  }
 0x326   : > { %1383 = vmatpush.msrb.mxu1 %v1994_v51  ;;  %v1222_v51 = vld [vmem:[%s3042_s6 + $0x68] sm:$0xff] }
 0x328   : > { %1384 = vmatpush.msrb.mxu1 %v1992_v53  ;;  %v1995_v53 = vld [vmem:[%s3042_s6 + $0x120] sm:$0xff] }
 0x32a   : > { %1385 = vmatpush.msrb.mxu1 %v1990_v54  ;;  %v1220_v54 = vld [vmem:[%s3042_s6 + $0x58] sm:$0xff] }
 0x32c   : > { %1386 = vmatpush.msrb.mxu1 %v1988_v55  ;;  %1092 = vrot.lane.b32.xlu1 %v2573_v40, %s2208_s10  ;;  %v1993_v55 = vld [vmem:[%s3042_s6 + $0x110] sm:$0xff] }
 0x32d   : > { %1090 = vrot.lane.b32.xlu0 %v2573_v40, %s2209_s11  ;;  %1100 = vrot.lane.b32.xlu2 %v2573_v40, %s2210_s30 }
 0x32e   : > { %1387 = vmatpush.msrb.mxu1 %v1986_v56  ;;  %v1218_v56 = vld [vmem:[%s3042_s6 + $0x48] sm:$0xff] }
 0x330   : > { %1471 = vmatpush.bf16.msra.mxu1 %v2579_v14 }
 0x335   : > { %1108 = vrot.lane.b32.xlu0 %v2573_v40, %s2211_s13  ;;  %1106 = vrot.lane.b32.xlu2 %v2573_v40, %s2212_s14  ;;  %v2001_v40 = vld [vmem:[%s3042_s6 + $0x150] sm:$0xff] }
 0x367   : > { %v1060_v57 = vpop.permute.xlu2 %1059 }
 0x36f   : > { %v1054_v58 = vpop.permute.xlu2 %1053 }
 0x377   : > { %v1068_v5 = vpop.permute.xlu2 %1067 }
 0x37e   : > { %v1052_v59 = vpop.permute.xlu1 %1051  ;;  %v1062_v60 = vpop.permute.xlu0 %1061 }
 0x37f   : > { %v1058_v61 = vsel %vm1055_vm15, %v1052_v59, %v1054_v58  ;;  %v1066_v62 = vsel %vm1063_vm1, %v1060_v57, %v1062_v60  ;;  %v1085_v8 = vpop.permute.xlu2 %1084  ;;  %v1991_v57 = vld [vmem:[%s3042_s6 + $0x100] sm:$0xff]  ;;  %v1216_v58 = vld [vmem:[%s3042_s6 + $0x38] sm:$0xff] }
 0x380   : > { %v1185_v63 = vand.u32 %v2571_v39, %v1058_v61  ;;  %v1164_v0 = vand.u32 %v2571_v39, %v1066_v62  ;;  %v1989_v61 = vld [vmem:[%s3042_s6 + $0xf0] sm:$0xff]  ;;  %v1214_v62 = vld [vmem:[%s3042_s6 + $0x28] sm:$0xff] }
 0x382   : > { %1173 = vmatpush.bf16.msra.mxu2 %v1164_v0  ;;  %1194 = vmatpush.bf16.msra.mxu3 %v1185_v63  ;;  %v1987_v63 = vld [vmem:[%s3042_s6 + $0xe0] sm:$0xff] }
 0x385   : > { %1974 = vmatmul.msk.bf16.vlgmr.msra.gmra.mxu2 %vm1117_vm14, %v1973_v1  ;;  %1976 = vmatmul.msk.bf16.vlgmr.msra.gmra.mxu3 %vm1117_vm14, %v1975_v4  ;;  %v1985_v4 = vld [vmem:[%s3042_s6 + $0xd0] sm:$0xff] }
 0x386   : > { %1285 = vmatpush.bf16.msrb.mxu2 %v1164_v0  ;;  %v1078_v10 = vpop.permute.xlu1 %1077  ;;  %v1076_v9 = vpop.permute.xlu0 %1075  ;;  %v1212_v0 = vld [vmem:[%s3042_s6 + $0x18] sm:$0xff] }
 0x387   : > { %v1081_v11 = vsel %vm350_vm0, %v1076_v9, %v1078_v10  ;;  %vm1086_vm0 = vcmask 809984   ;;  %v1101_v44 = vpop.permute.xlu2 %1100 }
 0x388   : > { %v2675_v2 = vand.u32 %v2571_v39, %v1081_v11 }
 0x38a   : > { %2015 = vmatpush.msk.msra.mxu2 %vm683_vm5, %v1233_v6  ;;  %1134 = vmatpush.bf16.msrb.mxu0 %v2675_v2 }
 0x38c   : > { %1405 = vmatpush.msra.mxu2 %v1231_v7 }
 0x38d   : > { %1971 = vmatmul.msk.bf16.vlgmr.msrb.gmra.mxu0 %vm1117_vm14, %v1970_v15 }
 0x38e   : > { %1406 = vmatpush.msra.mxu2 %v1229_v12  ;;  %v1083_v18 = vpop.permute.xlu1 %1082  ;;  %v1155_v7 = vpop.f32.mrf.mxu1 }
 0x38f   : > { %v1070_v19 = vpop.permute.xlu0 %1069  ;;  %v1089_v20 = vsel %vm1086_vm0, %v1083_v18, %v1085_v8 }
 0x390   : > { %1407 = vmatpush.msra.mxu2 %v1227_v13  ;;  %v1074_v21 = vsel %vm1071_vm2, %v1068_v5, %v1070_v19  ;;  %v2692_v22 = vand.u32 %v2571_v39, %v1089_v20  ;;  %v1210_v5 = vld [vmem:[%s3042_s6 + $0x8] sm:$0xff] }
 0x391   : > { %v1297_v23 = vand.u32 %v2571_v39, %v1074_v21 }
 0x392   : > { %1408 = vmatpush.msra.mxu2 %v1225_v16  ;;  %1251 = vmatpush.bf16.msra.mxu0 %v2692_v22 }
 0x393   : > { %1306 = vmatpush.bf16.msrb.mxu3 %v1297_v23 }
 0x394   : > { %1409 = vmatpush.msra.mxu2 %v1223_v3 }
 0x395   : > { %1982 = vmatmul.msk.bf16.vlgmr.msrb.gmra.mxu2 %vm1117_vm14, %v1981_v30 }
 0x396   : > { %1410 = vmatpush.msra.mxu2 %v1221_v25  ;;  %2011 = vmatpush.msk.msrb.mxu0 %vm683_vm5, %v2009_v26  ;;  %v1099_v38 = vpop.permute.xlu1 %1098  ;;  %v1157_v10 = vpop.f32.mrf.mxu1 }
 0x397   : > { %2017 = vmatpush.msk.msra.mxu3 %vm683_vm5, %v1234_v24  ;;  %v2756_v45 = vpop.permute.xlu0 %1204  ;;  %v1105_v48 = vsel %vm1102_vm3, %v1099_v38, %v1101_v44  ;;  %v2058_v38 = vld [vmem:[%s3040_s4 + $0x1a] sm:$0x3]  ;;  %v2052_v44 = vld [vmem:[%s3042_s6 + $0x268] sm:$0xf]  ;;  %v2089_v10 = vld [vmem:[%s3042_s6 + $0x330] sm:$0xf] }
 0x398   : > { %1411 = vmatpush.msra.mxu2 %v1219_v27  ;;  %1356 = vmatpush.msrb.mxu0 %v2007_v28  ;;  %v2776_v52 = vand.u32 %v2571_v39, %v1105_v48  ;;  %v1107_v27 = vpop.permute.xlu2 %1106  ;;  %v2047_v48 = vld [vmem:[%s3042_s6 + $0x240] sm:$0xff] }
 0x399   : > { %1425 = vmatpush.msra.mxu3 %v1232_v29 }
 0x39a   : > { %1412 = vmatpush.msra.mxu2 %v1217_v31  ;;  %1357 = vmatpush.msrb.mxu0 %v2005_v32  ;;  %v2023_v32 = vld [vmem:[%s3040_s4 + $0x14] sm:$0x3] }
 0x39b   : > { %1426 = vmatpush.msra.mxu3 %v1230_v33  ;;  %v2025_v33 = vld [vmem:[%s3040_s4 + $0x16] sm:$0x3] }
 0x39c   : > { %1413 = vmatpush.msra.mxu2 %v1215_v34  ;;  %1358 = vmatpush.msrb.mxu0 %v2003_v35 }
 0x39d   : > { %1427 = vmatpush.msra.mxu3 %v1228_v17  ;;  %1979 = vmatmul.msk.bf16.vlgmr.msra.gmra.mxu0 %vm1117_vm14, %v1978_v43  ;;  %v2051_v43 = vld [vmem:[%s3042_s6 + $0x260] sm:$0xf] }
 0x39e   : > { %1414 = vmatpush.msra.mxu2 %v1213_v36  ;;  %1984 = vmatmul.msk.bf16.vlgmr.msrb.gmra.mxu3 %vm1117_vm14, %v1983_v37  ;;  %v1093_v59 = vpop.permute.xlu1 %1092  ;;  %v1269_v9 = vpop.f32.mrf.mxu1  ;;  %v2019_v37 = vld [vmem:[%s3040_s4 + $0x10] sm:$0x3] }
 0x39f   : > { %1359 = vmatpush.msrb.mxu0 %v2001_v40  ;;  %1428 = vmatpush.msra.mxu3 %v1226_v41  ;;  %v1091_v60 = vpop.permute.xlu0 %1090  ;;  %v2057_v40 = vld [vmem:[%s3040_s4 + $0x18] sm:$0x3]  ;;  %v2061_v41 = vld [vmem:[%s3040_s4 + $0x1c] sm:$0x3] }
 0x3a0   : > { %1415 = vmatpush.msra.mxu2 %v1211_v42  ;;  %v1097_v1 = vsel %vm1094_vm4, %v1091_v60, %v1093_v59  ;;  %v2063_v42 = vld [vmem:[%s3040_s4 + $0x1e] sm:$0x3]  ;;  %v2035_v60 = vld [vmem:[%s3042_s6 + $0x1e0] sm:$0xff] }
 0x3a1   : > { %1360 = vmatpush.msrb.mxu0 %v1999_v46  ;;  %1429 = vmatpush.msra.mxu3 %v1224_v47  ;;  %v1503_v6 = vand.u32 %v2571_v39, %v1097_v1  ;;  %v2049_v46 = vld [vmem:[%s3042_s6 + $0x250] sm:$0xff]  ;;  %v2050_v47 = vld [vmem:[%s3042_s6 + $0x258] sm:$0xff]  ;;  %v2032_v1 = vld [vmem:[%s3042_s6 + $0x1c8] sm:$0xff] }
 0x3a2   : > { %1416 = vmatpush.msra.mxu2 %v1209_v49  ;;  %v2048_v49 = vld [vmem:[%s3042_s6 + $0x248] sm:$0xff]  ;;  %v2038_v59 = vld [vmem:[%s3042_s6 + $0x1f8] sm:$0xff] }
 0x3a3   : > { %1361 = vmatpush.msrb.mxu0 %v1997_v50  ;;  %1430 = vmatpush.msra.mxu3 %v1222_v51  ;;  %v2045_v50 = vld [vmem:[%s3042_s6 + $0x230] sm:$0xff]  ;;  %v2046_v51 = vld [vmem:[%s3042_s6 + $0x238] sm:$0xff] }
 0x3a4   : > { %1491 = vmatpush.bf16.msrb.mxu2 %v2776_v52 }
 0x3a5   : > { %1362 = vmatpush.msrb.mxu0 %v1995_v53  ;;  %1431 = vmatpush.msra.mxu3 %v1220_v54  ;;  %v2044_v53 = vld [vmem:[%s3042_s6 + $0x228] sm:$0xff]  ;;  %v2041_v54 = vld [vmem:[%s3042_s6 + $0x210] sm:$0xff] }
 0x3a6   : > { %v1271_v11 = vpop.f32.mrf.mxu1 }
 0x3a7   : > { %1363 = vmatpush.msrb.mxu0 %v1993_v55  ;;  %1432 = vmatpush.msra.mxu3 %v1218_v56  ;;  %v1109_v26 = vpop.permute.xlu0 %1108  ;;  %v2042_v55 = vld [vmem:[%s3042_s6 + $0x218] sm:$0xff]  ;;  %v2039_v56 = vld [vmem:[%s3042_s6 + $0x200] sm:$0xff] }
 0x3a8   : > { %v1113_v29 = vsel %vm1110_vm7, %v1107_v27, %v1109_v26  ;;  %v2087_v11 = vld [vmem:[%s3042_s6 + $0x320] sm:$0xff]  ;;  %v2077_v27 = vld [vmem:[%s3042_s6 + $0x2d0] sm:$0xff] }
 0x3a9   : > { %1364 = vmatpush.msrb.mxu0 %v1991_v57  ;;  %1433 = vmatpush.msra.mxu3 %v1216_v58  ;;  %v1659_v34 = vand.u32 %v2571_v39, %v1113_v29  ;;  %v2020_v39 = vld [vmem:[%s3040_s4 + $0x12] sm:$0x3]  ;;  %v2040_v57 = vld [vmem:[%s3042_s6 + $0x208] sm:$0xff] }
 0x3aa   : > { %v2037_v58 = vld [vmem:[%s3042_s6 + $0x1f0] sm:$0xff] }
 0x3ab   : > { %1365 = vmatpush.msrb.mxu0 %v1989_v61  ;;  %1434 = vmatpush.msra.mxu3 %v1214_v62  ;;  %v2036_v61 = vld [vmem:[%s3042_s6 + $0x1e8] sm:$0xff]  ;;  %v2033_v62 = vld [vmem:[%s3042_s6 + $0x1d0] sm:$0xff] }
 0x3ad   : > { %1366 = vmatpush.msrb.mxu0 %v1987_v63  ;;  %1435 = vmatpush.msra.mxu3 %v1212_v0  ;;  %v2034_v63 = vld [vmem:[%s3042_s6 + $0x1d8] sm:$0xff]  ;;  %v2031_v0 = vld [vmem:[%s3042_s6 + $0x1c0] sm:$0xff] }
 0x3af   : > { %1367 = vmatpush.msrb.mxu0 %v1985_v4  ;;  %1436 = vmatpush.msra.mxu3 %v1210_v5  ;;  %v2029_v4 = vld [vmem:[%s3042_s6 + $0x1b0] sm:$0xff]  ;;  %v2030_v5 = vld [vmem:[%s3042_s6 + $0x1b8] sm:$0xff] }
 0x3b1   : > { %1455 = vmatpush.bf16.msra.mxu0 %v2675_v2  ;;  %1512 = vmatpush.bf16.msrb.mxu3 %v1503_v6  ;;  %v2027_v6 = vld [vmem:[%s3042_s6 + $0x1a0] sm:$0xff] }
 0x408   : > { %v1175_v12 = vpop.f32.mrf.mxu2  ;;  %v1196_v13 = vpop.f32.mrf.mxu3 }
 0x40a   : > { %v1136_v15 = vpop.f32.mrf.mxu0 }
 0x40b   : > { %v1156_v16 = vadd.f32 %v1155_v7, %v1136_v15  ;;  %v2028_v7 = vld [vmem:[%s3042_s6 + $0x1a8] sm:$0xff] }
 0x40d   : > { %v1179_v8 = vadd.f32 %v1175_v12, %v1156_v16  ;;  %v2088_v12 = vld [vmem:[%s3042_s6 + $0x328] sm:$0xff]  ;;  %v2085_v16 = vld [vmem:[%s3042_s6 + $0x310] sm:$0xff] }
 0x40f   : > { %v1200_v3 = vadd.f32 %v1196_v13, %v1179_v8  ;;  %v2086_v8 = vld [vmem:[%s3042_s6 + $0x318] sm:$0xff] }
 0x410   : > { %v1177_v18 = vpop.f32.mrf.mxu2  ;;  %v1198_v19 = vpop.f32.mrf.mxu3 }
 0x411   : > { %v1207_v20 = vadd.f32 %v2756_v45, %v1200_v3  ;;  %v2083_v3 = vld [vmem:[%s3042_s6 + $0x300] sm:$0xff]  ;;  %v2084_v18 = vld [vmem:[%s3042_s6 + $0x308] sm:$0xff]  ;;  %v2081_v19 = vld [vmem:[%s3042_s6 + $0x2f0] sm:$0xff] }
 0x412   : > { %v1138_v21 = vpop.f32.mrf.mxu0 }
 0x413   : > { %2167 = vtanh.f32 %v1207_v20  ;;  %v2082_v20 = vld [vmem:[%s3042_s6 + $0x2f8] sm:$0xff]  ;;  %v2079_v21 = vld [vmem:[%s3042_s6 + $0x2e0] sm:$0xff] }
 0x418   : > { %v1287_v2 = vpop.f32.mrf.mxu2 }
 0x419   : > { %v2168_v23 = vpop.eup %2167 }
 0x41a   : > { %v1253_v25 = vpop.f32.mrf.mxu0  ;;  %2016 = vmatmul.msk.f32.vlgmr.msra.gmra.mxu2 %vm1342_vm6, %v2168_v23  ;;  %2018 = vmatmul.msk.f32.vlgmr.msra.gmra.mxu3 %vm1342_vm6, %v2168_v23  ;;  %v2080_v23 = vld [vmem:[%s3042_s6 + $0x2e8] sm:$0xff] }
 0x41b   : > { %v1270_v24 = vadd.f32 %v1269_v9, %v1253_v25  ;;  %1613 = vmatpush.bf16.msra.mxu2 %v2692_v22  ;;  %1629 = vmatpush.bf16.msra.mxu3 %v2579_v14  ;;  %v2090_v9 = vld [vmem:[%s3042_s6 + $0x338] sm:$0xf] }
 0x41d   : > { %v1291_v28 = vadd.f32 %v1287_v2, %v1270_v24 }
 0x420   : > { %v1289_v22 = vpop.f32.mrf.mxu2 }
 0x421   : > { %v1308_v30 = vpop.f32.mrf.mxu3 }
 0x422   : > { %v1312_v31 = vadd.f32 %v1308_v30, %v1291_v28  ;;  %2024 = vmatmul.msk.bf16.vlgmr.msrb.gmra.mxu2 %vm1117_vm14, %v2023_v32  ;;  %2026 = vmatmul.msk.bf16.vlgmr.msrb.gmra.mxu3 %vm1117_vm14, %v2025_v33  ;;  %v1255_v14 = vpop.f32.mrf.mxu0  ;;  %v2078_v28 = vld [vmem:[%s3042_s6 + $0x2d8] sm:$0xff]  ;;  %v2076_v32 = vld [vmem:[%s3042_s6 + $0x2c8] sm:$0xff]  ;;  %v2073_v33 = vld [vmem:[%s3042_s6 + $0x2b0] sm:$0xff] }
 0x423   : > { %1647 = vmatpush.bf16.msrb.mxu2 %v2776_v52  ;;  %1668 = vmatpush.bf16.msrb.mxu3 %v1659_v34  ;;  %v2043_v52 = vld [vmem:[%s3042_s6 + $0x220] sm:$0xff]  ;;  %v2074_v34 = vld [vmem:[%s3042_s6 + $0x2b8] sm:$0xff] }
 0x424   : > { %v1313_v35 = vadd.f32 %v1312_v31, %v2756_v45  ;;  %v2075_v31 = vld [vmem:[%s3042_s6 + $0x2c0] sm:$0xff] }
 0x425   : > { %v2071_v14 = vld [vmem:[%s3042_s6 + $0x2a0] sm:$0xff] }
 0x426   : > { %2169 = vtanh.f32 %v1313_v35 }
 0x429   : > { %v1310_v17 = vpop.f32.mrf.mxu3 }
 0x42a   : > { %v2072_v17 = vld [vmem:[%s3042_s6 + $0x2a8] sm:$0xff] }
 0x42c   : > { %v2170_v36 = vpop.eup %2169 }
 0x42d   : > { %2012 = vmatmul.msk.f32.vlgmr.msrb.gmra.mxu0 %vm1342_vm6, %v2170_v36  ;;  %2014 = vmatmul.msk.f32.vlgmr.msrb.gmra.mxu1 %vm1342_vm6, %v2170_v36  ;;  %v2069_v36 = vld [vmem:[%s3042_s6 + $0x290] sm:$0xff] }
 0x42e   : > { %2053 = vmatpush.msk.msrb.mxu0 %vm683_vm5, %v2051_v43  ;;  %2055 = vmatpush.msk.msrb.mxu1 %vm683_vm5, %v2052_v44  ;;  %v2065_v43 = vld [vmem:[%s3042_s6 + $0x270] sm:$0xff]  ;;  %v2066_v44 = vld [vmem:[%s3042_s6 + $0x278] sm:$0xff] }
 0x430   : > { %1561 = vmatpush.msrb.mxu0 %v2049_v46  ;;  %1581 = vmatpush.msrb.mxu1 %v2050_v47 }
 0x432   : > { %2059 = vmatmul.msk.bf16.vlgmr.msra.gmra.mxu2 %vm1117_vm14, %v2058_v38  ;;  %2060 = vmatmul.msk.bf16.vlgmr.msra.gmra.mxu3 %vm1117_vm14, %v2057_v40  ;;  %v2067_v40 = vld [vmem:[%s3042_s6 + $0x280] sm:$0xff] }
 0x433   : > { %1562 = vmatpush.msrb.mxu0 %v2047_v48  ;;  %1582 = vmatpush.msrb.mxu1 %v2048_v49 }
 0x435   : > { %2021 = vmatmul.msk.bf16.vlgmr.msra.gmra.mxu0 %vm1117_vm14, %v2020_v39  ;;  %2022 = vmatmul.msk.bf16.vlgmr.msra.gmra.mxu1 %vm1117_vm14, %v2019_v37  ;;  %v2070_v39 = vld [vmem:[%s3042_s6 + $0x298] sm:$0xff] }
 0x436   : > { %1563 = vmatpush.msrb.mxu0 %v2045_v50  ;;  %1583 = vmatpush.msrb.mxu1 %v2046_v51 }
 0x438   : > { %1564 = vmatpush.msrb.mxu0 %v2043_v52  ;;  %1584 = vmatpush.msrb.mxu1 %v2044_v53 }
 0x43a   : > { %1565 = vmatpush.msrb.mxu0 %v2041_v54  ;;  %1585 = vmatpush.msrb.mxu1 %v2042_v55 }
 0x43c   : > { %1566 = vmatpush.msrb.mxu0 %v2039_v56  ;;  %1586 = vmatpush.msrb.mxu1 %v2040_v57 }
 0x43e   : > { %1567 = vmatpush.msrb.mxu0 %v2037_v58  ;;  %1587 = vmatpush.msrb.mxu1 %v2038_v59 }
 0x440   : > { %1568 = vmatpush.msrb.mxu0 %v2035_v60  ;;  %1588 = vmatpush.msrb.mxu1 %v2036_v61 }
 0x442   : > { %2062 = vmatmul.msk.bf16.vlgmr.msrb.gmra.mxu2 %vm1117_vm14, %v2061_v41  ;;  %2064 = vmatmul.msk.bf16.vlgmr.msrb.gmra.mxu3 %vm1117_vm14, %v2063_v42  ;;  %v2068_v41 = vld [vmem:[%s3042_s6 + $0x288] sm:$0xff] }
 0x443   : > { %1569 = vmatpush.msrb.mxu0 %v2033_v62  ;;  %1589 = vmatpush.msrb.mxu1 %v2034_v63 }
 0x445   : > { %1570 = vmatpush.msrb.mxu0 %v2031_v0  ;;  %1590 = vmatpush.msrb.mxu1 %v2032_v1 }
 0x447   : > { %1571 = vmatpush.msrb.mxu0 %v2029_v4  ;;  %1591 = vmatpush.msrb.mxu1 %v2030_v5 }
 0x449   : > { %1572 = vmatpush.msrb.mxu0 %v2027_v6  ;;  %1592 = vmatpush.msrb.mxu1 %v2028_v7 }
 0x44b   : > { %2091 = vmatpush.msk.msra.mxu0 %vm683_vm5, %v2089_v10  ;;  %2093 = vmatpush.msk.msra.mxu1 %vm683_vm5, %v2090_v9 }
 0x44d   : > { %1717 = vmatpush.msra.mxu0 %v2087_v11  ;;  %1737 = vmatpush.msra.mxu1 %v2088_v12 }
 0x44f   : > { %1718 = vmatpush.msra.mxu0 %v2085_v16  ;;  %1738 = vmatpush.msra.mxu1 %v2086_v8 }
 0x451   : > { %1719 = vmatpush.msra.mxu0 %v2083_v3  ;;  %1739 = vmatpush.msra.mxu1 %v2084_v18 }
 0x453   : > { %1720 = vmatpush.msra.mxu0 %v2081_v19  ;;  %1740 = vmatpush.msra.mxu1 %v2082_v20 }
 0x455   : > { %1721 = vmatpush.msra.mxu0 %v2079_v21  ;;  %1741 = vmatpush.msra.mxu1 %v2080_v23 }
 0x457   : > { %1722 = vmatpush.msra.mxu0 %v2077_v27  ;;  %1742 = vmatpush.msra.mxu1 %v2078_v28 }
 0x459   : > { %1723 = vmatpush.msra.mxu0 %v2075_v31  ;;  %1743 = vmatpush.msra.mxu1 %v2076_v32 }
 0x45b   : > { %1724 = vmatpush.msra.mxu0 %v2073_v33  ;;  %1744 = vmatpush.msra.mxu1 %v2074_v34 }
 0x45d   : > { %1725 = vmatpush.msra.mxu0 %v2071_v14  ;;  %1745 = vmatpush.msra.mxu1 %v2072_v17 }
 0x45f   : > { %1726 = vmatpush.msra.mxu0 %v2069_v36  ;;  %1746 = vmatpush.msra.mxu1 %v2070_v39 }
 0x461   : > { %1727 = vmatpush.msra.mxu0 %v2067_v40  ;;  %1747 = vmatpush.msra.mxu1 %v2068_v41 }
 0x463   : > { %1728 = vmatpush.msra.mxu0 %v2065_v43  ;;  %1748 = vmatpush.msra.mxu1 %v2066_v44 }
 0x49d   : > { %v1418_v13 = vpop.f32.mrf.mxu2  ;;  %v1438_v15 = vpop.f32.mrf.mxu3 }
 0x4a5   : > { %v1493_v2 = vpop.f32.mrf.mxu2  ;;  %v1514_v25 = vpop.f32.mrf.mxu3 }
 0x4aa   : > { %v1369_v26 = vpop.f32.mrf.mxu0  ;;  %v1389_v24 = vpop.f32.mrf.mxu1 }
 0x4ab   : > { %v2983_v29 = vadd.f32 %v1418_v13, %v1369_v26  ;;  %v1439_v30 = vadd.f32 %v1438_v15, %v1389_v24 }
 0x4ad   : > { %v1495_v35 = vpop.f32.mrf.mxu2  ;;  %v1516_v22 = vpop.f32.mrf.mxu3 }
 0x4b2   : > { %v1457_v37 = vpop.f32.mrf.mxu0  ;;  %v1473_v38 = vpop.f32.mrf.mxu1 }
 0x4b3   : > { %v1474_v42 = vadd.f32 %v1473_v38, %v1457_v37 }
 0x4b5   : > { %v1497_v46 = vadd.f32 %v1493_v2, %v1474_v42  ;;  %v1615_v49 = vpop.f32.mrf.mxu2  ;;  %v1631_v50 = vpop.f32.mrf.mxu3 }
 0x4b6   : > { %v1632_v56 = vadd.f32 %v1631_v50, %v1615_v49 }
 0x4b7   : > { %v1518_v47 = vadd.f32 %v1514_v25, %v1497_v46 }
 0x4b9   : > { %v1519_v48 = vadd.f32 %v1518_v47, %v2756_v45 }
 0x4ba   : > { %v1459_v51 = vpop.f32.mrf.mxu0  ;;  %v1475_v52 = vpop.f32.mrf.mxu1 }
 0x4bb   : > { %2171 = vtanh.f32 %v1519_v48 }
 0x4bd   : > { %v1617_v54 = vpop.f32.mrf.mxu2  ;;  %v1633_v55 = vpop.f32.mrf.mxu3 }
 0x4c1   : > { %v2172_v53 = vpop.eup %2171 }
 0x4c2   : > { %2054 = vmatmul.msk.f32.vlgmr.msrb.gmra.mxu0 %vm1342_vm6, %v2172_v53  ;;  %2056 = vmatmul.msk.f32.vlgmr.msrb.gmra.mxu1 %vm1342_vm6, %v2172_v53 }
 0x4c5   : > { %v1649_v57 = vpop.f32.mrf.mxu2  ;;  %v1670_v58 = vpop.f32.mrf.mxu3 }
 0x4c6   : > { %v1653_v59 = vadd.f32 %v1649_v57, %v1632_v56 }
 0x4c8   : > { %v1674_v60 = vadd.f32 %v1670_v58, %v1653_v59 }
 0x4ca   : > { %v1675_v61 = vadd.f32 %v1674_v60, %v2756_v45 }
 0x4cc   : > { %2173 = vtanh.f32 %v1675_v61 }
 0x4cd   : > { %v1651_v62 = vpop.f32.mrf.mxu2  ;;  %v1672_v63 = vpop.f32.mrf.mxu3 }
 0x4d2   : > { %v2174_v0 = vpop.eup %2173 }
 0x4d3   : > { %2092 = vmatmul.msk.f32.vlgmr.msra.gmra.mxu0 %vm1342_vm6, %v2174_v0  ;;  %2094 = vmatmul.msk.f32.vlgmr.msra.gmra.mxu1 %vm1342_vm6, %v2174_v0 }
 0x53f   : > { %v1574_v1 = vpop.f32.mrf.mxu0  ;;  %v1594_v4 = vpop.f32.mrf.mxu1 }
 0x540   : > { %v1598_v5 = vadd.f32 %v1594_v4, %v1439_v30  ;;  %v1597_v10 = vadd.f32 %v1574_v1, %v2983_v29 }
 0x550   : > { %v1730_v6 = vpop.f32.mrf.mxu0  ;;  %v1750_v7 = vpop.f32.mrf.mxu1 }
 0x551   : > { %v1754_v9 = vadd.f32 %v1750_v7, %v1598_v5  ;;  %v1753_v11 = vadd.f32 %v1730_v6, %v1597_v10 }
 0x553   : > { %v1757_v45 = vrot.slane %v1754_v9, 4 }
 0x555   : > { %v1758_v12 = vsel %vm683_vm5, %v1753_v11, %v1757_v45 }
 0x556   : > { %1760 = vst [vmem:[%s278_s15] sm:$0xff] %v1758_v12 }
 0x557 PF: > { %s17_s24 = sadd.s32 1, %s2181_s24  }
 0x558   : > { %p14_p4 = scmp.ge.s32.totalorder %s17_s24, 4  }
 0x55a   :  { %16 = sbr.rel (!%p14_p4) target bundleno = 1 (0x1), region = 114 }

// kernel: autoencoder_forward.2
= control target key start
LH: loop header
LB: loop body
LE: loop exit
PB: predicated region body
PF: predicated region fallthrough
CT: control target
= control target key end

     0   :  { %s4221_s13 = smov 0   ;;  %s5193_s0 = inlined_call_operand.vmem [shape: bf16[2,4,324], index: 0, kind: input, shape index: {}]   ;;  %s5194_s1 = inlined_call_operand.vmem [shape: bf16[9,8,4], index: 1, kind: input, shape index: {}]   ;;  %s5195_s2 = inlined_call_operand.vmem [shape: f32[8,1], index: 2, kind: input, shape index: {}]   ;;  %s5196_s3 = inlined_call_operand.vmem [shape: f32[324,100], index: 3, kind: input, shape index: {}]   ;;  %s5197_s4 = inlined_call_operand.vmem [shape: bf16[9,16,8], index: 4, kind: input, shape index: {}]   ;;  %s5198_s5 = inlined_call_operand.vmem [shape: f32[16,1], index: 5, kind: input, shape index: {}]   ;;  %s5199_s6 = inlined_call_operand.vmem [shape: bf16[16,100,32], index: 6, kind: input, shape index: {}]   ;;  %s5200_s7 = inlined_call_operand.vmem [shape: f32[1,32], index: 7, kind: input, shape index: {}]   ;;  %s5201_s8 = inlined_call_operand.vmem [shape: bf16[32,936], index: 8, kind: input, shape index: {}]   ;;  %s5202_s9 = inlined_call_operand.vmem [shape: f32[1,936], index: 9, kind: input, shape index: {}]   ;;  %s5203_s10 = inlined_call_operand.vmem [shape: bf16[2,1,936], index: 10, kind: output, shape index: {}]  }
   0x1 LB: > { %s3174_s14 = sadd.s32 4294967295, %s4133_s13   ;;  %p3178_p0 = scmp.ge.s32.totalorder %s4133_s13, 1  ;;  %s4133_s13 = sphi %s4221_s13, %s20_s13  }
   0x2   : > { %p312_p1 = scmp.lt.s32.totalorder %s4133_s13, 3 }
   0x4   : > { %p313_p2 = pnand %p3178_p0, %p312_p1 }
   0x5   : > { %p349_p3 = scmp.lt.s32.totalorder (!%p313_p2), %s3174_s14, 1  ;;  %s4135_s19 = smov (!%p313_p2), 79  }
   0x6   : > { %316 = sbr.rel (%p313_p2) target bundleno = 1468 (0x5bc), region = 60  ;;  %s4136_s20 = smov (!%p313_p2), 19  }
   0x7   : > { %s4137_s21 = smov (!%p313_p2), 78   ;;  %s4138_s22 = smov (!%p313_p2), 18  }
   0x8   : > { %s4139_s23 = smov (!%p313_p2), 77   ;;  %s4140_s24 = smov (!%p313_p2), 17  }
   0x9   : > { %s4141_s25 = smov (!%p313_p2), 61   ;;  %s4142_s26 = smov (!%p313_p2), 1  }
   0xa   : > { %s4143_s27 = smov (!%p313_p2), 127   ;;  %s4144_s28 = smov (!%p313_p2), 67  }
   0xb   : > { %s5219_s14 = smov (!%p349_p3, %s3174_s14), 1  ;;  %s4145_s29 = smov 111   ;;  %vm380_vm0 = vcmask 154624   ;;  %vm418_vm1 = vcmask 1041408   ;;  %v360_v35 = vld [vmem:[%s5194_s1] sm:$0xf] }
   0xc   : > { %s4069_s15 = smul.u32 6, %s5219_s14  ;;  %s4146_s30 = smov 51   ;;  %vm414_vm2 = vcmask 31744   ;;  %vm407_vm3 = vcmask 146432   ;;  %v3181_v48 = vld [vmem:[%s5194_s1 + $0x4] sm:$0xf] }
   0xd   : > { %s4147_s11 = smov 110   ;;  %s4148_s16 = smov 50   ;;  %vm536_vm4 = vcmask 138240   ;;  %vm616_vm5 = vcmask 7168   ;;  %vm748_vm6 = vcmask 1039360   ;;  %vm756_vm7 = vcmask 547840  }
   0xe   : > { %s353_s18 = scalar_lea.vmem %s5193_s0, %s4069_s15  ;;  %s4149_s17 = smov 109   ;;  %vm836_vm8 = vcmask 416768   ;;  %vm828_vm9 = vcmask 908288   ;;  %vm908_vm10 = vcmask 900096   ;;  %vm916_vm11 = vcmask 408576  }
   0xf   : > { %v4235_v0 = vld [vmem:[%s353_s18] sm:$0x3f]  ;;  %s4150_s18 = smov 49   ;;  %vm988_vm12 = vcmask 891904   ;;  %vm996_vm13 = vcmask 400384   ;;  %vm1170_vm14 = vcmask 1043456  }
  0x10   : > { %362 = vst [vmem:[#allocation1] ss:$4 sm:$0xff] %v4235_v0  ;;  %vm1166_vm15 = vcmask 556032   ;;  %s4154_s12 = smov 38   ;;  %s4155_s15 = smov 29  }
  0x17   : > { %v363_v1 = vld.sshfl [vmem:[#allocation1 + $0x10] sm:$0xff pattern:$0x73625140] }
  0x18   : > { %367 = vst [vmem:[#allocation1] ss:$4 sm:$0xff] %v4235_v0  ;;  %365 = vrot.lane.b32.xlu2 %v363_v1, %s4135_s19  ;;  %s4157_s19 = smov 9  }
  0x1f   : > { %v368_v2 = vld.sshfl [vmem:[#allocation1] sm:$0xff pattern:$0x73625140]  ;;  %v370_v3 = vld.sshfl [vmem:[#allocation1 + $0x8] sm:$0xff pattern:$0x73625140] }
  0x20   : > { %v372_v4 = vld.sshfl [vmem:[#allocation1 + $0x10] sm:$0xff pattern:$0x73625140]  ;;  %374 = vrot.lane.b32.xlu2 %v368_v2, %s4136_s20 }
  0x21   : > { %389 = vst [vmem:[#allocation1] ss:$4 sm:$0xff] %v4235_v0 }
  0x28   : > { %v390_v5 = vld.sshfl [vmem:[#allocation1 + $0x10] sm:$0xff pattern:$0x73625140] }
  0x29   : > { %392 = vrot.lane.b32.xlu0 %v390_v5, %s4137_s21  ;;  %394 = vst [vmem:[#allocation1] ss:$4 sm:$0xff] %v4235_v0  ;;  %s4161_s21 = smov 99  }
  0x30   : > { %v397_v6 = vld.sshfl [vmem:[#allocation1 + $0x8] sm:$0xff pattern:$0x73625140]  ;;  %v395_v7 = vld.sshfl [vmem:[#allocation1] sm:$0xff pattern:$0x73625140] }
  0x31   : > { %403 = vrot.lane.b32.xlu1 %v397_v6, %s4138_s22  ;;  %401 = vrot.lane.b32.xlu0 %v395_v7, %s4138_s22  ;;  %v399_v8 = vld.sshfl [vmem:[#allocation1 + $0x10] sm:$0xff pattern:$0x73625140]  ;;  %v3188_v6 = vld [vmem:[%s5194_s1 + $0x8] sm:$0xf] }
  0x32   : > { %518 = vst [vmem:[#allocation1] ss:$4 sm:$0xff] %v4235_v0 }
  0x39   : > { %405 = vrot.lane.b32.xlu1 %v399_v8, %s4138_s22  ;;  %376 = vrot.lane.b32.xlu0 %v370_v3, %s4136_s20  ;;  %v519_v9 = vld.sshfl [vmem:[#allocation1 + $0x10] sm:$0xff pattern:$0x73625140]  ;;  %s4163_s22 = smov 91  }
  0x3a   : > { %523 = vst [vmem:[#allocation1] ss:$4 sm:$0xff] %v4235_v0  ;;  %521 = vrot.lane.b32.xlu2 %v519_v9, %s4139_s23  ;;  %s4164_s23 = smov 119  }
  0x41   : > { %378 = vrot.lane.b32.xlu1 %v372_v4, %s4136_s20  ;;  %v526_v10 = vld.sshfl [vmem:[#allocation1 + $0x8] sm:$0xff pattern:$0x73625140]  ;;  %v528_v11 = vld.sshfl [vmem:[#allocation1 + $0x10] sm:$0xff pattern:$0x73625140] }
  0x42   : > { %v524_v12 = vld.sshfl [vmem:[#allocation1] sm:$0xff pattern:$0x73625140]  ;;  %534 = vrot.lane.b32.xlu2 %v528_v11, %s4140_s24  ;;  %s4160_s20 = smov 118  }
  0x43   : > { %530 = vrot.lane.b32.xlu0 %v524_v12, %s4140_s24  ;;  %598 = vst [vmem:[#allocation1] ss:$4 sm:$0xff] %v4235_v0 }
  0x49   : > { %532 = vrot.lane.b32.xlu1 %v526_v10, %s4140_s24 }
  0x4a   : > { %v599_v13 = vld.sshfl [vmem:[#allocation1 + $0x10] sm:$0xff pattern:$0x73625140] }
  0x4b   : > { %601 = vrot.lane.b32.xlu0 %v599_v13, %s4141_s25  ;;  %603 = vst [vmem:[#allocation1] ss:$4 sm:$0xff] %v4235_v0 }
  0x52   : > { %v604_v14 = vld.sshfl [vmem:[#allocation1] sm:$0xff pattern:$0x73625140]  ;;  %v606_v15 = vld.sshfl [vmem:[#allocation1 + $0x8] sm:$0xff pattern:$0x73625140] }
  0x53   : > { %610 = vrot.lane.b32.xlu1 %v604_v14, %s4142_s26  ;;  %v608_v16 = vld.sshfl [vmem:[#allocation1 + $0x10] sm:$0xff pattern:$0x73625140]  ;;  %612 = vrot.lane.b32.xlu2 %v606_v15, %s4142_s26 }
  0x54   : > { %614 = vrot.lane.b32.xlu0 %v608_v16, %s4142_s26  ;;  %678 = vst [vmem:[#allocation1] ss:$4 sm:$0xff] %v4235_v0 }
  0x5b   : > { %v4249_v17 = vld.sshfl [vmem:[#allocation1] sm:$0xff pattern:$0x73625140]  ;;  %v4251_v18 = vld.sshfl [vmem:[#allocation1 + $0x8] sm:$0xff pattern:$0x73625140] }
  0x5c   : > { %v4253_v19 = vld.sshfl [vmem:[#allocation1 + $0x10] sm:$0xff pattern:$0x73625140]  ;;  %v685_v2 = vsel %vm418_vm1, %v4249_v17, 0  ;;  %v687_v12 = vsel %vm418_vm1, %v4251_v18, 0 }
  0x5d   : > { %735 = vst [vmem:[#allocation1] ss:$4 sm:$0xff] %v4235_v0  ;;  %v689_v16 = vsel %vm418_vm1, %v4253_v19, 0  ;;  %v3192_v17 = vld [vmem:[%s5194_s1 + $0xc] sm:$0xf] }
  0x5e   : > { %v3196_v19 = vld [vmem:[%s5194_s1 + $0x10] sm:$0xf] }
  0x64   : > { %v736_v20 = vld.sshfl [vmem:[#allocation1] sm:$0xff pattern:$0x73625140]  ;;  %v738_v21 = vld.sshfl [vmem:[#allocation1 + $0x8] sm:$0xff pattern:$0x73625140] }
  0x65   : > { %742 = vrot.lane.b32.xlu1 %v736_v20, %s4143_s27  ;;  %v740_v22 = vld.sshfl [vmem:[#allocation1 + $0x10] sm:$0xff pattern:$0x73625140]  ;;  %744 = vrot.lane.b32.xlu2 %v738_v21, %s4143_s27 }
  0x66   : > { %746 = vrot.lane.b32.xlu0 %v740_v22, %s4143_s27  ;;  %751 = vst [vmem:[#allocation1] ss:$4 sm:$0xff] %v4235_v0 }
  0x6d   : > { %v752_v23 = vld.sshfl [vmem:[#allocation1] sm:$0xff pattern:$0x73625140] }
  0x6e   : > { %754 = vrot.lane.b32.xlu1 %v752_v23, %s4144_s28  ;;  %815 = vst [vmem:[#allocation1] ss:$4 sm:$0xff] %v4235_v0 }
  0x72   : > { %v366_v27 = vpop.permute.xlu2 %365 }
  0x75   : > { %v820_v24 = vld.sshfl [vmem:[#allocation1 + $0x10] sm:$0xff pattern:$0x73625140]  ;;  %v816_v25 = vld.sshfl [vmem:[#allocation1] sm:$0xff pattern:$0x73625140] }
  0x76   : > { %826 = vrot.lane.b32.xlu1 %v820_v24, %s4145_s29  ;;  %v818_v26 = vld.sshfl [vmem:[#allocation1 + $0x8] sm:$0xff pattern:$0x73625140]  ;;  %822 = vrot.lane.b32.xlu2 %v816_v25, %s4145_s29 }
  0x77   : > { %824 = vrot.lane.b32.xlu0 %v818_v26, %s4145_s29  ;;  %831 = vst [vmem:[#allocation1] ss:$4 sm:$0xff] %v4235_v0  ;;  %s4165_s29 = smov 89  }
  0x7a   : > { %v375_v29 = vpop.permute.xlu2 %374 }
  0x7b   : > { %v386_v30 = vsel %vm380_vm0, %v366_v27, %v375_v29 }
  0x7c   : > { %v469_v31 = vsel %vm418_vm1, %v386_v30, 0 }
  0x7d   : > { %484 = vmatpush.bf16.msra.mxu3 %v469_v31 }
  0x7e   : > { %v832_v28 = vld.sshfl [vmem:[#allocation1] sm:$0xff pattern:$0x73625140] }
  0x7f   : > { %895 = vst [vmem:[#allocation1] ss:$4 sm:$0xff] %v4235_v0  ;;  %834 = vrot.lane.b32.xlu2 %v832_v28, %s4146_s30  ;;  %v3200_v28 = vld [vmem:[%s5194_s1 + $0x14] sm:$0xf] }
  0x80   : > { %3185 = vmatmul.msk.bf16.vlgmr.msra.gmra.mxu3 %vm414_vm2, %v360_v35 }
  0x86   : > { %v898_v32 = vld.sshfl [vmem:[#allocation1 + $0x8] sm:$0xff pattern:$0x73625140]  ;;  %v900_v33 = vld.sshfl [vmem:[#allocation1 + $0x10] sm:$0xff pattern:$0x73625140] }
  0x87   : > { %904 = vrot.lane.b32.xlu1 %v898_v32, %s4147_s11  ;;  %v896_v34 = vld.sshfl [vmem:[#allocation1] sm:$0xff pattern:$0x73625140]  ;;  %906 = vrot.lane.b32.xlu2 %v900_v33, %s4147_s11 }
  0x88   : > { %902 = vrot.lane.b32.xlu0 %v896_v34, %s4147_s11  ;;  %911 = vst [vmem:[#allocation1] ss:$4 sm:$0xff] %v4235_v0 }
  0x8f   : > { %v912_v36 = vld.sshfl [vmem:[#allocation1] sm:$0xff pattern:$0x73625140] }
  0x90   : > { %914 = vrot.lane.b32.xlu0 %v912_v36, %s4148_s16  ;;  %975 = vst [vmem:[#allocation1] ss:$4 sm:$0xff] %v4235_v0 }
  0x94   : > { %v522_v55 = vpop.permute.xlu2 %521 }
  0x97   : > { %v980_v37 = vld.sshfl [vmem:[#allocation1 + $0x10] sm:$0xff pattern:$0x73625140]  ;;  %v978_v38 = vld.sshfl [vmem:[#allocation1 + $0x8] sm:$0xff pattern:$0x73625140] }
  0x98   : > { %986 = vrot.lane.b32.xlu0 %v980_v37, %s4149_s17  ;;  %v976_v39 = vld.sshfl [vmem:[#allocation1] sm:$0xff pattern:$0x73625140]  ;;  %984 = vrot.lane.b32.xlu2 %v978_v38, %s4149_s17 }
  0x99   : > { %982 = vrot.lane.b32.xlu1 %v976_v39, %s4149_s17  ;;  %991 = vst [vmem:[#allocation1] ss:$4 sm:$0xff] %v4235_v0 }
  0x9b   : > { %v393_v40 = vpop.permute.xlu0 %392 }
  0x9c   : > { %v535_v62 = vpop.permute.xlu2 %534 }
  0xa0   : > { %v992_v41 = vld.sshfl [vmem:[#allocation1] sm:$0xff pattern:$0x73625140] }
  0xa1   : > { %994 = vrot.lane.b32.xlu1 %v992_v41, %s4150_s18  ;;  %v3204_v41 = vld [vmem:[%s5194_s1 + $0x18] sm:$0xf] }
  0xa3   : > { %v404_v42 = vpop.permute.xlu1 %403  ;;  %v402_v43 = vpop.permute.xlu0 %401 }
  0xa4   : > { %v413_v44 = vsel %vm407_vm3, %v393_v40, %v402_v43  ;;  %v408_v45 = vsel %vm407_vm3, %v402_v43, %v404_v42 }
  0xa5   : > { %v419_v46 = vsel %vm418_vm1, %v413_v44, 0  ;;  %v422_v47 = vsel %vm418_vm1, %v408_v45, 0 }
  0xa6   : > { %434 = vmatpush.bf16.msra.mxu0 %v419_v46  ;;  %447 = vmatpush.bf16.msra.mxu1 %v422_v47 }
  0xa9   : > { %3182 = vmatmul.msk.bf16.vlgmr.msra.gmra.mxu0 %vm414_vm2, %v3181_v48  ;;  %3183 = vmatmul.msk.bf16.vlgmr.msra.gmra.mxu1 %vm414_vm2, %v3181_v48 }
  0xab   : > { %v406_v49 = vpop.permute.xlu1 %405  ;;  %v377_v50 = vpop.permute.xlu0 %376 }
  0xac   : > { %v409_v51 = vsel %vm407_vm3, %v404_v42, %v406_v49  ;;  %v381_v52 = vsel %vm380_vm0, %v375_v29, %v377_v50  ;;  %v3208_v49 = vld [vmem:[%s5194_s1 + $0x1c] sm:$0xf]  ;;  %vm1244_vm3 = vcmask 89088  }
  0xad   : > { %v425_v53 = vsel %vm418_vm1, %v409_v51, 0  ;;  %v472_v54 = vsel %vm418_vm1, %v381_v52, 0  ;;  %v613_v7 = vpop.permute.xlu2 %612 }
  0xae   : > { %460 = vmatpush.bf16.msra.mxu2 %v425_v53  ;;  %497 = vmatpush.bf16.msrb.mxu0 %v472_v54  ;;  %v4151_v54 = vmov 0  }
  0xaf   : > { %4109 = vset.pattern.permute.xlu2 %v4151_v54  ;;  %4125 = vset.pattern.permute.xlu1 %v4151_v54 }
  0xb0   : > { %4126 = vset.pattern.permute.xlu0 %v4151_v54 }
  0xb1   : > { %3184 = vmatmul.msk.bf16.vlgmr.msra.gmra.mxu2 %vm414_vm2, %v3181_v48 }
  0xb3   : > { %v379_v56 = vpop.permute.xlu1 %378 }
  0xb4   : > { %v382_v57 = vsel %vm380_vm0, %v377_v50, %v379_v56  ;;  %vm1264_vm0 = vcmask 64512  }
  0xb5   : > { %v475_v58 = vsel %vm418_vm1, %v382_v57, 0  ;;  %v531_v59 = vpop.permute.xlu0 %530 }
  0xb6   : > { %510 = vmatpush.bf16.msrb.mxu1 %v475_v58  ;;  %v542_v60 = vsel %vm536_vm4, %v522_v55, %v531_v59 }
  0xb7   : > { %v546_v61 = vsel %vm418_vm1, %v542_v60, 0 }
  0xb8   : > { %561 = vmatpush.bf16.msrb.mxu2 %v546_v61 }
  0xb9   : > { %3186 = vmatmul.msk.bf16.vlgmr.msrb.gmra.mxu0 %vm414_vm2, %v360_v35  ;;  %3187 = vmatmul.msk.bf16.vlgmr.msrb.gmra.mxu1 %vm414_vm2, %v360_v35 }
  0xbb   : > { %v533_v63 = vpop.permute.xlu1 %532 }
  0xbc   : > { %v537_v0 = vsel %vm536_vm4, %v531_v59, %v533_v63  ;;  %v538_v1 = vsel %vm536_vm4, %v533_v63, %v535_v62  ;;  %v3212_v62 = vld [vmem:[%s5194_s1 + $0x20] sm:$0xf]  ;;  %vm1315_vm4 = vcmask 72704  }
  0xbd   : > { %v549_v3 = vsel %vm418_vm1, %v537_v0, 0  ;;  %v552_v4 = vsel %vm418_vm1, %v538_v1, 0  ;;  %v602_v5 = vpop.permute.xlu0 %601  ;;  %v1053_v63 = vld [vmem:[%s5195_s2] sm:$0xff] }
  0xbe   : > { %574 = vmatpush.bf16.msrb.mxu3 %v549_v3  ;;  %587 = vmatpush.bf16.msra.mxu0 %v552_v4 }
  0xbf   : > { %v745_v18 = vpop.permute.xlu2 %744  ;;  %1056 = vperm.xlu2 %4109, %v1053_v63  }
  0xc1   : > { %3189 = vmatmul.msk.bf16.vlgmr.msrb.gmra.mxu2 %vm414_vm2, %v3188_v6  ;;  %3190 = vmatmul.msk.bf16.vlgmr.msrb.gmra.mxu3 %vm414_vm2, %v3188_v6 }
  0xc2   : > { %698 = vmatpush.bf16.msrb.mxu0 %v685_v2 }
  0xc5   : > { %v611_v8 = vpop.permute.xlu1 %610 }
  0xc6   : > { %v622_v9 = vsel %vm616_vm5, %v602_v5, %v611_v8  ;;  %v617_v10 = vsel %vm616_vm5, %v611_v8, %v613_v7  ;;  %v615_v11 = vpop.permute.xlu0 %614 }
  0xc7   : > { %v626_v13 = vsel %vm418_vm1, %v622_v9, 0  ;;  %v629_v14 = vsel %vm418_vm1, %v617_v10, 0  ;;  %v618_v15 = vsel %vm616_vm5, %v613_v7, %v615_v11 }
  0xc8   : > { %641 = vmatpush.bf16.msra.mxu1 %v626_v13  ;;  %654 = vmatpush.bf16.msra.mxu2 %v629_v14  ;;  %v632_v20 = vsel %vm418_vm1, %v618_v15, 0 }
  0xc9   : > { %3191 = vmatmul.msk.bf16.vlgmr.msra.gmra.mxu0 %vm414_vm2, %v3188_v6  ;;  %667 = vmatpush.bf16.msra.mxu3 %v632_v20 }
  0xcb   : > { %3193 = vmatmul.msk.bf16.vlgmr.msra.gmra.mxu1 %vm414_vm2, %v3192_v17 }
  0xcc   : > { %711 = vmatpush.bf16.msrb.mxu1 %v687_v12  ;;  %724 = vmatpush.bf16.msrb.mxu2 %v689_v16 }
  0xd0   : > { %v823_v27 = vpop.permute.xlu2 %822 }
  0xd1   : > { %3194 = vmatmul.msk.bf16.vlgmr.msra.gmra.mxu2 %vm414_vm2, %v3192_v17  ;;  %3195 = vmatmul.msk.bf16.vlgmr.msra.gmra.mxu3 %vm414_vm2, %v3192_v17 }
  0xd7   : > { %v743_v21 = vpop.permute.xlu1 %742 }
  0xd8   : > { %v749_v22 = vsel %vm748_vm6, %v743_v21, %v745_v18  ;;  %v747_v23 = vpop.permute.xlu0 %746 }
  0xd9   : > { %3197 = vmatmul.msk.bf16.vlgmr.msrb.gmra.mxu0 %vm414_vm2, %v3196_v19  ;;  %v764_v24 = vsel %vm418_vm1, %v749_v22, 0  ;;  %v750_v25 = vsel %vm748_vm6, %v745_v18, %v747_v23  ;;  %v835_v32 = vpop.permute.xlu2 %834 }
  0xda   : > { %778 = vmatpush.bf16.msrb.mxu3 %v764_v24  ;;  %v767_v26 = vsel %vm418_vm1, %v750_v25, 0 }
  0xdb   : > { %3198 = vmatmul.msk.bf16.vlgmr.msrb.gmra.mxu1 %vm414_vm2, %v3196_v19  ;;  %791 = vmatpush.bf16.msra.mxu0 %v767_v26 }
  0xe0   : > { %v755_v29 = vpop.permute.xlu1 %754 }
  0xe1   : > { %3199 = vmatmul.msk.bf16.vlgmr.msrb.gmra.mxu2 %vm414_vm2, %v3196_v19  ;;  %3201 = vmatmul.msk.bf16.vlgmr.msrb.gmra.mxu3 %vm414_vm2, %v3200_v28  ;;  %v759_v30 = vsel %vm756_vm7, %v747_v23, %v755_v29  ;;  %v907_v42 = vpop.permute.xlu2 %906 }
  0xe2   : > { %v769_v31 = vsel %vm418_vm1, %v759_v30, 0 }
  0xe3   : > { %804 = vmatpush.bf16.msra.mxu1 %v769_v31 }
  0xe8   : > { %v827_v33 = vpop.permute.xlu1 %826 }
  0xe9   : > { %3202 = vmatmul.msk.bf16.vlgmr.msra.gmra.mxu0 %vm414_vm2, %v3200_v28  ;;  %v825_v34 = vpop.permute.xlu0 %824  ;;  %v839_v35 = vsel %vm836_vm8, %v827_v33, %v835_v32  ;;  %vm1529_vm8 = vcmask 728064  }
  0xea   : > { %v829_v36 = vsel %vm828_vm9, %v823_v27, %v825_v34  ;;  %v830_v37 = vsel %vm828_vm9, %v825_v34, %v827_v33  ;;  %v849_v38 = vsel %vm418_vm1, %v839_v35, 0  ;;  %vm1680_vm9 = vcmask 818176  }
  0xeb   : > { %3203 = vmatmul.msk.bf16.vlgmr.msra.gmra.mxu1 %vm414_vm2, %v3200_v28  ;;  %v844_v39 = vsel %vm418_vm1, %v829_v36, 0  ;;  %v847_v40 = vsel %vm418_vm1, %v830_v37, 0  ;;  %884 = vmatpush.bf16.msrb.mxu0 %v849_v38 }
  0xec   : > { %858 = vmatpush.bf16.msra.mxu2 %v844_v39  ;;  %871 = vmatpush.bf16.msra.mxu3 %v847_v40 }
  0xf1   : > { %3205 = vmatmul.msk.bf16.vlgmr.msra.gmra.mxu2 %vm414_vm2, %v3204_v41  ;;  %3206 = vmatmul.msk.bf16.vlgmr.msra.gmra.mxu3 %vm414_vm2, %v3204_v41 }
  0xf2   : > { %v985_v53 = vpop.permute.xlu2 %984 }
  0xf9   : > { %v905_v43 = vpop.permute.xlu1 %904  ;;  %3207 = vmatmul.msk.bf16.vlgmr.msrb.gmra.mxu0 %vm414_vm2, %v3204_v41 }
  0xfa   : > { %v903_v44 = vpop.permute.xlu0 %902  ;;  %v910_v45 = vsel %vm908_vm10, %v905_v43, %v907_v42 }
  0xfb   : > { %v909_v46 = vsel %vm908_vm10, %v903_v44, %v905_v43  ;;  %v927_v47 = vsel %vm418_vm1, %v910_v45, 0 }
  0xfc   : > { %v924_v48 = vsel %vm418_vm1, %v909_v46, 0  ;;  %951 = vmatpush.bf16.msrb.mxu2 %v927_v47 }
  0xfd   : > { %938 = vmatpush.bf16.msrb.mxu1 %v924_v48 }
 0x100   : > { %3209 = vmatmul.msk.bf16.vlgmr.msrb.gmra.mxu1 %vm414_vm2, %v3208_v49 }
 0x101   : > { %3210 = vmatmul.msk.bf16.vlgmr.msrb.gmra.mxu2 %vm414_vm2, %v3208_v49 }
 0x102   : > { %v915_v50 = vpop.permute.xlu0 %914 }
 0x103   : > { %v919_v51 = vsel %vm916_vm11, %v907_v42, %v915_v50  ;;  %v486_v60 = vpop.f32.mrf.mxu3 }
 0x104   : > { %v929_v52 = vsel %vm418_vm1, %v919_v51, 0 }
 0x105   : > { %964 = vmatpush.bf16.msrb.mxu3 %v929_v52 }
 0x108   : > { %3211 = vmatmul.msk.bf16.vlgmr.msrb.gmra.mxu3 %vm414_vm2, %v3208_v49 }
 0x10a   : > { %v987_v55 = vpop.permute.xlu0 %986 }
 0x10b   : > { %v990_v56 = vsel %vm988_vm12, %v985_v53, %v987_v55  ;;  %v983_v57 = vpop.permute.xlu1 %982  ;;  %v488_v2 = vpop.f32.mrf.mxu3 }
 0x10c   : > { %v1007_v58 = vsel %vm418_vm1, %v990_v56, 0  ;;  %v989_v59 = vsel %vm988_vm12, %v983_v57, %v985_v53 }
 0x10d   : > { %v1004_v61 = vsel %vm418_vm1, %v989_v59, 0  ;;  %1031 = vmatpush.bf16.msra.mxu1 %v1007_v58 }
 0x10e   : > { %1018 = vmatpush.bf16.msra.mxu0 %v1004_v61 }
 0x110   : > { %3214 = vmatmul.msk.bf16.vlgmr.msra.gmra.mxu1 %vm414_vm2, %v3212_v62 }
 0x111   : > { %3213 = vmatmul.msk.bf16.vlgmr.msra.gmra.mxu0 %vm414_vm2, %v3212_v62 }
 0x113   : > { %v995_v0 = vpop.permute.xlu1 %994 }
 0x114   : > { %v999_v1 = vsel %vm996_vm13, %v987_v55, %v995_v0 }
 0x115   : > { %v1009_v3 = vsel %vm418_vm1, %v999_v1, 0 }
 0x116   : > { %1044 = vmatpush.bf16.msra.mxu2 %v1009_v3 }
 0x119   : > { %3215 = vmatmul.msk.bf16.vlgmr.msra.gmra.mxu2 %vm414_vm2, %v3212_v62  ;;  %v1057_v1 = vpop.permute.xlu2 %1056  ;;  %vm1255_vm2 = vcmask 80896  }
 0x126   : > { %v436_v4 = vpop.f32.mrf.mxu0  ;;  %v449_v5 = vpop.f32.mrf.mxu1 }
 0x127   : > { %v487_v44 = vadd.f32 %v486_v60, %v436_v4 }
 0x12e   : > { %v438_v6 = vpop.f32.mrf.mxu0  ;;  %v451_v7 = vpop.f32.mrf.mxu1 }
 0x134   : > { %v462_v8 = vpop.f32.mrf.mxu2 }
 0x136   : > { %v499_v9 = vpop.f32.mrf.mxu0  ;;  %v512_v10 = vpop.f32.mrf.mxu1 }
 0x137   : > { %v500_v41 = vadd.f32 %v499_v9, %v449_v5  ;;  %v513_v63 = vadd.f32 %v512_v10, %v462_v8 }
 0x13c   : > { %v464_v11 = vpop.f32.mrf.mxu2 }
 0x13e   : > { %v501_v12 = vpop.f32.mrf.mxu0  ;;  %v514_v13 = vpop.f32.mrf.mxu1 }
 0x144   : > { %v563_v14 = vpop.f32.mrf.mxu2  ;;  %v576_v15 = vpop.f32.mrf.mxu3 }
 0x145   : > { %v594_v46 = vadd.f32 %v576_v15, %v500_v41  ;;  %v593_v48 = vadd.f32 %v563_v14, %v487_v44  ;;  %v1129_v41 = vld [vmem:[%s5196_s3 + $0x20] sm:$0xff] }
 0x146   : > { %v589_v16 = vpop.f32.mrf.mxu0  ;;  %v1149_v44 = vld [vmem:[%s5196_s3 + $0xc0] sm:$0xff] }
 0x147   : > { %v595_v4 = vadd.f32 %v589_v16, %v513_v63  ;;  %v1159_v63 = vld [vmem:[%s5196_s3 + $0x110] sm:$0xff] }
 0x148   : > { %v643_v17 = vpop.f32.mrf.mxu1 }
 0x149   : > { %v673_v50 = vadd.f32 %v643_v17, %v593_v48  ;;  %v1147_v48 = vld [vmem:[%s5196_s3 + $0xb0] sm:$0xff] }
 0x14c   : > { %v565_v20 = vpop.f32.mrf.mxu2  ;;  %v578_v18 = vpop.f32.mrf.mxu3 }
 0x14e   : > { %v591_v19 = vpop.f32.mrf.mxu0 }
 0x150   : > { %v645_v21 = vpop.f32.mrf.mxu1 }
 0x154   : > { %v656_v22 = vpop.f32.mrf.mxu2  ;;  %v669_v23 = vpop.f32.mrf.mxu3 }
 0x155   : > { %v674_v49 = vadd.f32 %v656_v22, %v594_v46  ;;  %v675_v7 = vadd.f32 %v669_v23, %v595_v4  ;;  %v1148_v46 = vld [vmem:[%s5196_s3 + $0xb8] sm:$0xff] }
 0x156   : > { %v700_v24 = vpop.f32.mrf.mxu0 }
 0x157   : > { %v730_v53 = vadd.f32 %v700_v24, %v673_v50  ;;  %v1140_v24 = vld [vmem:[%s5196_s3 + $0x78] sm:$0xff]  ;;  %v1146_v50 = vld [vmem:[%s5196_s3 + $0xa8] sm:$0xff] }
 0x158   : > { %v713_v25 = vpop.f32.mrf.mxu1  ;;  %1174 = vmatpush.msra.mxu3 %v1140_v24 }
 0x159   : > { %v731_v51 = vadd.f32 %v713_v25, %v674_v49  ;;  %v1139_v25 = vld [vmem:[%s5196_s3 + $0x70] sm:$0xff]  ;;  %v1125_v49 = vld [vmem:[%s5196_s3] sm:$0xff] }
 0x15a   : > { %1175 = vmatpush.msra.mxu3 %v1139_v25 }
 0x15c   : > { %v658_v26 = vpop.f32.mrf.mxu2  ;;  %v671_v27 = vpop.f32.mrf.mxu3 }
 0x15d   : > { %v1138_v26 = vld [vmem:[%s5196_s3 + $0x68] sm:$0xff]  ;;  %v1156_v27 = vld [vmem:[%s5196_s3 + $0xf8] sm:$0xff] }
 0x15e   : > { %v702_v28 = vpop.f32.mrf.mxu0  ;;  %1194 = vmatpush.msrb.mxu0 %v1156_v27  ;;  %1176 = vmatpush.msra.mxu3 %v1138_v26 }
 0x15f   : > { %v1137_v28 = vld [vmem:[%s5196_s3 + $0x60] sm:$0xff] }
 0x160   : > { %v715_v29 = vpop.f32.mrf.mxu1  ;;  %1177 = vmatpush.msra.mxu3 %v1137_v28 }
 0x161   : > { %v1136_v29 = vld [vmem:[%s5196_s3 + $0x58] sm:$0xff] }
 0x162   : > { %1178 = vmatpush.msra.mxu3 %v1136_v29 }
 0x164   : > { %v726_v30 = vpop.f32.mrf.mxu2  ;;  %v780_v31 = vpop.f32.mrf.mxu3 }
 0x165   : > { %v810_v56 = vadd.f32 %v780_v31, %v730_v53  ;;  %v732_v12 = vadd.f32 %v726_v30, %v675_v7  ;;  %v1135_v30 = vld [vmem:[%s5196_s3 + $0x50] sm:$0xff]  ;;  %v1134_v31 = vld [vmem:[%s5196_s3 + $0x48] sm:$0xff]  ;;  %v1144_v53 = vld [vmem:[%s5196_s3 + $0x98] sm:$0xff] }
 0x166   : > { %v793_v32 = vpop.f32.mrf.mxu0  ;;  %1179 = vmatpush.msra.mxu3 %v1135_v30 }
 0x167   : > { %v811_v55 = vadd.f32 %v793_v32, %v731_v51  ;;  %v1155_v32 = vld [vmem:[%s5196_s3 + $0xf0] sm:$0xff]  ;;  %v1145_v51 = vld [vmem:[%s5196_s3 + $0xa0] sm:$0xff] }
 0x168   : > { %v806_v33 = vpop.f32.mrf.mxu1  ;;  %1180 = vmatpush.msra.mxu3 %v1134_v31  ;;  %1195 = vmatpush.msrb.mxu0 %v1155_v32 }
 0x169   : > { %v812_v17 = vadd.f32 %v806_v33, %v732_v12  ;;  %v1133_v33 = vld [vmem:[%s5196_s3 + $0x40] sm:$0xff] }
 0x16a   : > { %1181 = vmatpush.msra.mxu3 %v1133_v33 }
 0x16c   : > { %v728_v34 = vpop.f32.mrf.mxu2  ;;  %v782_v35 = vpop.f32.mrf.mxu3 }
 0x16d   : > { %v1154_v34 = vld [vmem:[%s5196_s3 + $0xe8] sm:$0xff]  ;;  %v1132_v35 = vld [vmem:[%s5196_s3 + $0x38] sm:$0xff] }
 0x16e   : > { %v795_v36 = vpop.f32.mrf.mxu0  ;;  %1196 = vmatpush.msrb.mxu0 %v1154_v34  ;;  %1182 = vmatpush.msra.mxu3 %v1132_v35 }
 0x16f   : > { %v1153_v36 = vld [vmem:[%s5196_s3 + $0xe0] sm:$0xff] }
 0x170   : > { %v808_v37 = vpop.f32.mrf.mxu1  ;;  %1197 = vmatpush.msrb.mxu0 %v1153_v36 }
 0x171   : > { %v1131_v37 = vld [vmem:[%s5196_s3 + $0x30] sm:$0xff] }
 0x172   : > { %1183 = vmatpush.msra.mxu3 %v1131_v37 }
 0x174   : > { %v860_v38 = vpop.f32.mrf.mxu2  ;;  %v873_v39 = vpop.f32.mrf.mxu3 }
 0x175   : > { %v891_v57 = vadd.f32 %v873_v39, %v811_v55  ;;  %v890_v58 = vadd.f32 %v860_v38, %v810_v56  ;;  %v1152_v38 = vld [vmem:[%s5196_s3 + $0xd8] sm:$0xff]  ;;  %v1130_v39 = vld [vmem:[%s5196_s3 + $0x28] sm:$0xff]  ;;  %v1143_v55 = vld [vmem:[%s5196_s3 + $0x90] sm:$0xff] }
 0x176   : > { %v886_v40 = vpop.f32.mrf.mxu0  ;;  %1198 = vmatpush.msrb.mxu0 %v1152_v38  ;;  %1184 = vmatpush.msra.mxu3 %v1130_v39  ;;  %v1163_v56 = vld [vmem:[%s5196_s3 + $0x130] sm:$0xff] }
 0x177   : > { %v892_v16 = vadd.f32 %v886_v40, %v812_v17  ;;  %v1151_v40 = vld [vmem:[%s5196_s3 + $0xd0] sm:$0xff] }
 0x178   : > { %1199 = vmatpush.msrb.mxu0 %v1151_v40  ;;  %1185 = vmatpush.msra.mxu3 %v1129_v41 }
 0x17c   : > { %v862_v42 = vpop.f32.mrf.mxu2  ;;  %v875_v43 = vpop.f32.mrf.mxu3 }
 0x17d   : > { %v940_v45 = vpop.f32.mrf.mxu1  ;;  %v1150_v42 = vld [vmem:[%s5196_s3 + $0xc8] sm:$0xff]  ;;  %v1128_v43 = vld [vmem:[%s5196_s3 + $0x18] sm:$0xff] }
 0x17e   : > { %v888_v47 = vpop.f32.mrf.mxu0  ;;  %v970_v0 = vadd.f32 %v940_v45, %v890_v58  ;;  %1200 = vmatpush.msrb.mxu0 %v1150_v42  ;;  %1186 = vmatpush.msra.mxu3 %v1128_v43  ;;  %v1127_v45 = vld [vmem:[%s5196_s3 + $0x10] sm:$0xff]  ;;  %v1162_v58 = vld [vmem:[%s5196_s3 + $0x128] sm:$0xff] }
 0x17f   : > { %v1126_v47 = vld [vmem:[%s5196_s3 + $0x8] sm:$0xff] }
 0x180   : > { %1201 = vmatpush.msrb.mxu0 %v1149_v44  ;;  %1187 = vmatpush.msra.mxu3 %v1127_v45  ;;  %v3952_v44 = vld [vmem:[%s5197_s4 + $0x20] sm:$0xff] }
 0x182   : > { %1202 = vmatpush.msrb.mxu0 %v1148_v46  ;;  %1188 = vmatpush.msra.mxu3 %v1126_v47 }
 0x184   : > { %v953_v52 = vpop.f32.mrf.mxu2  ;;  %1203 = vmatpush.msrb.mxu0 %v1147_v48  ;;  %1189 = vmatpush.msra.mxu3 %v1125_v49 }
 0x185   : > { %v942_v54 = vpop.f32.mrf.mxu1  ;;  %v971_v59 = vadd.f32 %v953_v52, %v891_v57  ;;  %v1165_v52 = vld [vmem:[%s5196_s3 + $0x140] sm:$0xf]  ;;  %v1142_v57 = vld [vmem:[%s5196_s3 + $0x88] sm:$0xff] }
 0x186   : > { %1204 = vmatpush.msrb.mxu0 %v1146_v50  ;;  %3216 = vmatpush.msk.msrb.mxu1 %vm1170_vm14, %v1165_v52  ;;  %v1164_v54 = vld [vmem:[%s5196_s3 + $0x138] sm:$0xff]  ;;  %v3949_v50 = vld [vmem:[%s5197_s4 + $0x8] sm:$0xff] }
 0x188   : > { %1205 = vmatpush.msrb.mxu0 %v1145_v51  ;;  %1222 = vmatpush.msrb.mxu1 %v1164_v54 }
 0x18a   : > { %1206 = vmatpush.msrb.mxu0 %v1144_v53  ;;  %1223 = vmatpush.msrb.mxu1 %v1163_v56 }
 0x18b   : > { %v966_v61 = vpop.f32.mrf.mxu3 }
 0x18c   : > { %v955_v62 = vpop.f32.mrf.mxu2  ;;  %v972_v20 = vadd.f32 %v966_v61, %v892_v16  ;;  %1207 = vmatpush.msrb.mxu0 %v1143_v55  ;;  %1224 = vmatpush.msrb.mxu1 %v1162_v58  ;;  %v1161_v61 = vld [vmem:[%s5196_s3 + $0x120] sm:$0xff] }
 0x18d   : > { %v1033_v60 = vpop.f32.mrf.mxu1  ;;  %v1160_v62 = vld [vmem:[%s5196_s3 + $0x118] sm:$0xff]  ;;  %v3948_v58 = vld [vmem:[%s5197_s4] sm:$0xff] }
 0x18e   : > { %v1020_v2 = vpop.f32.mrf.mxu0  ;;  %v1051_v3 = vadd.f32 %v1033_v60, %v971_v59  ;;  %1208 = vmatpush.msrb.mxu0 %v1142_v57  ;;  %v1141_v59 = vld [vmem:[%s5196_s3 + $0x80] sm:$0xff]  ;;  %1225 = vmatpush.msrb.mxu1 %v1161_v61 }
 0x18f   : > { %v1050_v5 = vadd.f32 %v1020_v2, %v970_v0  ;;  %v1158_v0 = vld [vmem:[%s5196_s3 + $0x108] sm:$0xff]  ;;  %v1157_v60 = vld [vmem:[%s5196_s3 + $0x100] sm:$0xff] }
 0x190   : > { %v4377_v6 = vadd.f32 %v1057_v1, %v1051_v3  ;;  %1209 = vmatpush.msrb.mxu0 %v1141_v59  ;;  %1226 = vmatpush.msrb.mxu1 %v1160_v62  ;;  %v1559_v61 = vld [vmem:[%s5198_s5] sm:$0xff] }
 0x191   : > { %v1059_v9 = vadd.f32 %v1057_v1, %v1050_v5 }
 0x192   : > { %v1063_v11 = vmax.f32 %v4377_v6, 0.0  ;;  %1227 = vmatpush.msrb.mxu1 %v1159_v63 }
 0x193   : > { %v4380_v13 = vmax.f32 %v1059_v9, 0.0  ;;  %v968_v14 = vpop.f32.mrf.mxu3 }
 0x194   : > { %1228 = vmatpush.msrb.mxu1 %v1158_v0 }
 0x195   : > { %v1035_v15 = vpop.f32.mrf.mxu1  ;;  %v4120_v8 = vpack.i.bf16 %v1063_v11, %v4380_v13 }
 0x196   : > { %v1022_v10 = vpop.f32.mrf.mxu0  ;;  %1229 = vmatpush.msrb.mxu1 %v1157_v60 }
 0x197   : > { %4121 = vrot.lane.b32.xlu2 %v4120_v8, %s4149_s17  ;;  %4116 = vrot.lane.b32.xlu1 %v4120_v8, %s4147_s11 }
 0x198   : > { %4111 = vrot.lane.b32.xlu0 %v4120_v8, %s4143_s27 }
 0x19c   : > { %v1046_v18 = vpop.f32.mrf.mxu2 }
 0x19d   : > { %v1052_v19 = vadd.f32 %v1046_v18, %v972_v20 }
 0x19f   : > { %v1061_v21 = vadd.f32 %v1057_v1, %v1052_v19 }
 0x1a1   : > { %v4388_v22 = vmax.f32 %v1061_v21, 0.0 }
 0x1a3   : > { %1107 = vrot.lane.b32.xlu2 %v4388_v22, %s4149_s17  ;;  %1091 = vrot.lane.b32.xlu1 %v4388_v22, %s4147_s11  ;;  %s4152_s17 = smov 39   ;;  %s4153_s11 = smov 10  }
 0x1a4   : > { %1072 = vrot.lane.b32.xlu0 %v4388_v22, %s4143_s27  ;;  %v1048_v23 = vpop.f32.mrf.mxu2 }
 0x1ab   : > { %1115 = vrot.lane.b32.xlu2 %v4380_v13, %s4150_s18  ;;  %1099 = vrot.lane.b32.xlu1 %v4380_v13, %s4148_s16  ;;  %s4156_s18 = smov 11   ;;  %s4158_s16 = smov 37  }
 0x1ac   : > { %1080 = vrot.lane.b32.xlu0 %v4380_v13, %s4144_s28  ;;  %s4159_s28 = smov 90  }
 0x1f1   : > { %v4122_v1 = vpop.permute.xlu2 %4121 }
 0x1f2   : > { %v4124_v2 = vunpack.i.h.bf16 %v4122_v1  ;;  %v4123_v3 = vunpack.i.l.bf16 %v4122_v1  ;;  %v3950_v1 = vld [vmem:[%s5197_s4 + $0x10] sm:$0xff] }
 0x1f4   : > { %v1110_v15 = vsel %vm988_vm12, %v4123_v3, %v4124_v2 }
 0x1fd   : > { %v1108_v18 = vpop.permute.xlu2 %1107 }
 0x1fe   : > { %v1111_v21 = vsel %vm988_vm12, %v4124_v2, %v1108_v18  ;;  %v3951_v2 = vld [vmem:[%s5197_s4 + $0x18] sm:$0xff]  ;;  %vm3090_vm12 = vcmask 1041409  }
 0x205   : > { %v1116_v29 = vpop.permute.xlu2 %1115 }
 0x209   : > { %v4117_v4 = vpop.permute.xlu1 %4116 }
 0x20a   : > { %v4119_v5 = vunpack.i.h.bf16 %v4117_v4  ;;  %v4118_v7 = vunpack.i.l.bf16 %v4117_v4  ;;  %v4112_v9 = vpop.permute.xlu0 %4111 }
 0x20b   : > { %v4114_v12 = vunpack.i.h.bf16 %v4112_v9  ;;  %v4113_v14 = vunpack.i.l.bf16 %v4112_v9 }
 0x20c   : > { %v1094_v8 = vsel %vm908_vm10, %v4118_v7, %v4119_v5 }
 0x20d   : > { %v1119_v10 = vmax.f32 %v1094_v8, %v1110_v15  ;;  %v1075_v17 = vsel %vm748_vm6, %v4113_v14, %v4114_v12  ;;  %v3953_v15 = vld [vmem:[%s5197_s4 + $0x28] sm:$0xff] }
 0x20e   : > { %v1084_v16 = vmax.f32 %v4380_v13, %v1075_v17  ;;  %v1118_v13 = vsel %vm996_vm13, %v1108_v18, %v1116_v29  ;;  %v3955_v18 = vld [vmem:[%s5197_s4 + $0x38] sm:$0xff]  ;;  %vm3091_vm13 = vsmask.f32 1280 }
 0x210   : > { %v1122_v20 = vmax.f32 %v1084_v16, %v1119_v10 }
 0x212   : > { %1190 = vmatmul.f32.vlgmr.msra.gmra.mxu3 %v1122_v20  ;;  %v3954_v20 = vld [vmem:[%s5197_s4 + $0x30] sm:$0xff] }
 0x215   : > { %v1092_v19 = vpop.permute.xlu1 %1091 }
 0x216   : > { %v1095_v23 = vsel %vm908_vm10, %v4119_v5, %v1092_v19  ;;  %v1073_v24 = vpop.permute.xlu0 %1072  ;;  %vm2935_vm10 = vcmask 261120  }
 0x217   : > { %v1120_v25 = vmax.f32 %v1095_v23, %v1111_v21  ;;  %v1076_v26 = vsel %vm748_vm6, %v4114_v12, %v1073_v24  ;;  %vm1418_vm6 = vcmask 809984  }
 0x218   : > { %v1085_v27 = vmax.f32 %v1063_v11, %v1076_v26 }
 0x21a   : > { %v1123_v28 = vmax.f32 %v1085_v27, %v1120_v25  ;;  %v3956_v25 = vld [vmem:[%s5197_s4 + $0x40] sm:$0xff] }
 0x21c   : > { %1210 = vmatmul.f32.vlgmr.msrb.gmra.mxu0 %v1123_v28 }
 0x21d   : > { %v1100_v30 = vpop.permute.xlu1 %1099 }
 0x21e   : > { %v1102_v31 = vsel %vm916_vm11, %v1092_v19, %v1100_v30  ;;  %v1081_v32 = vpop.permute.xlu0 %1080  ;;  %vm3088_vm11 = vsmask.f32 256 }
 0x21f   : > { %v1121_v33 = vmax.f32 %v1102_v31, %v1118_v13  ;;  %v1083_v34 = vsel %vm756_vm7, %v1073_v24, %v1081_v32  ;;  %vm1455_vm7 = vcmask 744448  }
 0x220   : > { %v1086_v35 = vmax.f32 %v4388_v22, %v1083_v34  ;;  %v1560_v22 = vld [vmem:[%s5198_s5 + $0x8] sm:$0xff] }
 0x222   : > { %v1124_v36 = vmax.f32 %v1086_v35, %v1121_v33 }
 0x224   : > { %3217 = vmatmul.msk.f32.vlgmr.msrb.gmra.mxu1 %vm1166_vm15, %v1124_v36  ;;  %vm3066_vm15 = vcmask 1040384  }
 0x295   : > { %v1191_v6 = vpop.f32.mrf.mxu3 }
 0x299   : > { %v1211_v37 = vpop.f32.mrf.mxu0 }
 0x29a   : > { %v1212_v11 = vadd.f32 %v1211_v37, %v1191_v6 }
 0x2a1   : > { %v1231_v38 = vpop.f32.mrf.mxu1 }
 0x2a2   : > { %v1232_v39 = vadd.f32 %v1231_v38, %v1212_v11 }
 0x2a4   : > { %v1234_v40 = vpack.c.bf16 %v1232_v39, %v1232_v39 }
 0x2a6   : > { %v1238_v41 = vunpack.c.l.b16 %v1234_v40  ;;  %v1393_v42 = vsel %vm1170_vm14, %v1234_v40, 0 }
 0x2a7   : > { %1402 = vmatpush.bf16.msra.mxu0 %v1393_v42 }
 0x2a8   : > { %v1239_v43 = vpack.c.b16 %v1238_v41, %v1238_v41 }
 0x2aa   : > { %1240 = vrot.lane.b32.xlu2 %v1239_v43, %s4152_s17  ;;  %1253 = vrot.lane.b32.xlu1 %v1239_v43, %s4153_s11 }
 0x2ab   : > { %1251 = vrot.lane.b32.xlu0 %v1239_v43, %s4154_s12  ;;  %3250 = vmatmul.msk.bf16.vlgmr.msra.gmra.mxu0 %vm1264_vm0, %v3952_v44 }
 0x2b2   : > { %1350 = vrot.lane.b32.xlu2 %v1239_v43, %s4142_s26  ;;  %1348 = vrot.lane.b32.xlu1 %v1239_v43, %s4155_s15  ;;  %s4162_s26 = smov 117  }
 0x2b3   : > { %1242 = vrot.lane.b32.xlu0 %v1239_v43, %s4156_s18 }
 0x2ba   : > { %1414 = vrot.lane.b32.xlu2 %v1239_v43, %s4143_s27  ;;  %1313 = vrot.lane.b32.xlu1 %v1239_v43, %s4157_s19 }
 0x2bb   : > { %1311 = vrot.lane.b32.xlu0 %v1239_v43, %s4158_s16 }
 0x2c2   : > { %1490 = vrot.lane.b32.xlu2 %v1239_v43, %s4159_s28  ;;  %1488 = vrot.lane.b32.xlu1 %v1239_v43, %s4160_s20 }
 0x2c3   : > { %1416 = vrot.lane.b32.xlu0 %v1239_v43, %s4161_s21 }
 0x2ca   : > { %1525 = vrot.lane.b32.xlu2 %v1239_v43, %s4162_s26  ;;  %1453 = vrot.lane.b32.xlu1 %v1239_v43, %s4163_s22 }
 0x2cb   : > { %1451 = vrot.lane.b32.xlu0 %v1239_v43, %s4164_s23 }
 0x2d2   : > { %1568 = vperm.xlu2 %4109, %v1560_v22   ;;  %1563 = vperm.xlu1 %4125, %v1559_v61  }
 0x2d3   : > { %1527 = vrot.lane.b32.xlu0 %v1239_v43, %s4165_s29 }
 0x304   : > { %v1241_v45 = vpop.permute.xlu2 %1240 }
 0x30c   : > { %v1351_v51 = vpop.permute.xlu2 %1350 }
 0x314   : > { %v1415_v59 = vpop.permute.xlu2 %1414 }
 0x31c   : > { %v1254_v46 = vpop.permute.xlu1 %1253  ;;  %v1491_v3 = vpop.permute.xlu2 %1490 }
 0x31d   : > { %v1252_v47 = vpop.permute.xlu0 %1251 }
 0x31e   : > { %v1258_v48 = vsel %vm1255_vm2, %v1252_v47, %v1254_v46  ;;  %vm5130_vm2 = vmand %vm3090_vm12, %vm3091_vm13  ;;  %vm3103_vm12 = vsmask.f32 4352 }
 0x31f   : > { %v1268_v49 = vsel %vm1170_vm14, %v1258_v48, 0  ;;  %v1640_v48 = vld [vmem:[%s5199_s6 + $0x30] sm:$0x3] }
 0x320   : > { %1277 = vmatpush.bf16.msrb.mxu2 %v1268_v49  ;;  %v3316_v49 = vld [vmem:[%s5199_s6 + $0x64] sm:$0x3] }
 0x323   : > { %3224 = vmatmul.msk.bf16.vlgmr.msrb.gmra.mxu2 %vm1264_vm0, %v3949_v50 }
 0x324   : > { %v1349_v52 = vpop.permute.xlu1 %1348  ;;  %v1526_v19 = vpop.permute.xlu2 %1525 }
 0x325   : > { %v1354_v53 = vsel %vm616_vm5, %v1349_v52, %v1351_v51  ;;  %v1243_v54 = vpop.permute.xlu0 %1242  ;;  %vm1492_vm5 = vcmask 736256   ;;  %v1666_v52 = vunpack.c.l.b16 %v1640_v48 }
 0x326   : > { %v1363_v55 = vsel %vm1170_vm14, %v1354_v53, 0  ;;  %v1247_v56 = vsel %vm1244_vm3, %v1241_v45, %v1243_v54  ;;  %v1746_v53 = vunpack.c.l.b16 %v3316_v49  ;;  %v3354_v54 = vld [vmem:[%s5199_s6 + $0x98] sm:$0x3]  ;;  %vm3095_vm3 = vsmask.f32 2304 }
 0x327   : > { %v1292_v57 = vsel %vm1170_vm14, %v1247_v56, 0  ;;  %1372 = vmatpush.bf16.msra.mxu2 %v1363_v55  ;;  %v3392_v55 = vld [vmem:[%s5199_s6 + $0xcc] sm:$0x3]  ;;  %v1820_v56 = vunpack.c.l.b16 %v3354_v54  ;;  %v1673_v61 = vpack.c.b16 %v1666_v52, %v1666_v52 }
 0x328   : > { %1301 = vmatpush.bf16.msrb.mxu3 %v1292_v57  ;;  %v1404_v13 = vpop.f32.mrf.mxu0  ;;  %v1894_v57 = vunpack.c.l.b16 %v3392_v55 }
 0x32b   : > { %3229 = vmatmul.msk.bf16.vlgmr.msrb.gmra.mxu3 %vm1264_vm0, %v3948_v58 }
 0x32c   : > { %v1314_v62 = vpop.permute.xlu1 %1313 }
 0x32d   : > { %v1312_v63 = vpop.permute.xlu0 %1311 }
 0x32e   : > { %v1318_v0 = vsel %vm1315_vm4, %v1312_v63, %v1314_v62  ;;  %v1753_v62 = vpack.c.b16 %v1746_v53, %v1746_v53 }
 0x32f   : > { %v1327_v60 = vsel %vm1170_vm14, %v1318_v0, 0  ;;  %v1827_v0 = vpack.c.b16 %v1820_v56, %v1820_v56  ;;  %v3992_v56 = vld [vmem:[%s5199_s6 + $0x12c] sm:$0xff] }
 0x330   : > { %1336 = vmatpush.bf16.msra.mxu1 %v1327_v60  ;;  %v1406_v38 = vpop.f32.mrf.mxu0  ;;  %v1901_v60 = vpack.c.b16 %v1894_v57, %v1894_v57  ;;  %v3998_v57 = vld [vmem:[%s5199_s6 + $0x160] sm:$0xff] }
 0x333   : > { %3236 = vmatmul.msk.bf16.vlgmr.msra.gmra.mxu1 %vm1264_vm0, %v3950_v1  ;;  %3243 = vmatmul.msk.bf16.vlgmr.msra.gmra.mxu2 %vm1264_vm0, %v3951_v2  ;;  %v1685_v2 = vsel %vm418_vm1, %v1673_v61, 0  ;;  %v3991_v61 = vld [vmem:[%s5199_s6 + $0x124] sm:$0xff] }
 0x334   : > { %v1489_v4 = vpop.permute.xlu1 %1488 }
 0x335   : > { %v1495_v5 = vsel %vm1492_vm5, %v1489_v4, %v1491_v3  ;;  %v1417_v7 = vpop.permute.xlu0 %1416  ;;  %v1764_v3 = vsel %vm418_vm1, %v1753_v62, 0  ;;  %v3997_v62 = vld [vmem:[%s5199_s6 + $0x158] sm:$0xff] }
 0x336   : > { %v1504_v9 = vsel %vm1170_vm14, %v1495_v5, 0  ;;  %v1421_v12 = vsel %vm1418_vm6, %v1415_v59, %v1417_v7  ;;  %v3962_v5 = vld [vmem:[%s5199_s6 + $0x28] sm:$0xff]  ;;  %v1838_v7 = vsel %vm418_vm1, %v1827_v0, 0 }
 0x337   : > { %v1430_v14 = vsel %vm1170_vm14, %v1421_v12, 0  ;;  %1513 = vmatpush.bf16.msrb.mxu2 %v1504_v9  ;;  %v1912_v9 = vsel %vm418_vm1, %v1901_v60, 0  ;;  %v3968_v12 = vld [vmem:[%s5199_s6 + $0x5c] sm:$0xff]  ;;  %v4003_v0 = vld [vmem:[%s5199_s6 + $0x18c] sm:$0xff] }
 0x338   : > { %1439 = vmatpush.bf16.msra.mxu3 %v1430_v14  ;;  %v3990_v60 = vld [vmem:[%s5199_s6 + $0x11c] sm:$0xff] }
 0x33b   : > { %3257 = vmatmul.msk.bf16.vlgmr.msra.gmra.mxu3 %vm1264_vm0, %v3953_v15  ;;  %1841 = vmatpush.bf16.msra.mxu2 %v1838_v7  ;;  %v3974_v15 = vld [vmem:[%s5199_s6 + $0x90] sm:$0xff]  ;;  %v3995_v7 = vld [vmem:[%s5199_s6 + $0x148] sm:$0xff] }
 0x33c   : > { %v1454_v8 = vpop.permute.xlu1 %1453  ;;  %1688 = vmatpush.bf16.msrb.mxu3 %v1685_v2  ;;  %v3996_v2 = vld [vmem:[%s5199_s6 + $0x150] sm:$0xff] }
 0x33d   : > { %v1452_v10 = vpop.permute.xlu0 %1451 }
 0x33e   : > { %v1458_v17 = vsel %vm1455_vm7, %v1452_v10, %v1454_v8  ;;  %vm3098_vm7 = vcmask 1043459  }
 0x33f   : > { %v1467_v16 = vsel %vm1170_vm14, %v1458_v17, 0  ;;  %v3961_v17 = vld [vmem:[%s5199_s6 + $0x20] sm:$0xff]  ;;  %1842 = vmatpush.bf16.msra.mxu2 %v3974_v15 }
 0x340   : > { %1476 = vmatpush.bf16.msrb.mxu1 %v1467_v16  ;;  %1689 = vmatpush.bf16.msrb.mxu3 %v3962_v5  ;;  %v3989_v5 = vld [vmem:[%s5199_s6 + $0x114] sm:$0xff]  ;;  %v3994_v15 = vld [vmem:[%s5199_s6 + $0x140] sm:$0xff] }
 0x343   : > { %3264 = vmatmul.msk.bf16.vlgmr.msrb.gmra.mxu1 %vm1264_vm0, %v3954_v20  ;;  %3271 = vmatmul.msk.bf16.vlgmr.msrb.gmra.mxu2 %vm1264_vm0, %v3955_v18  ;;  %v1569_v20 = vpop.permute.xlu2 %1568 }
 0x344   : > { %v1564_v45 = vpop.permute.xlu1 %1563  ;;  %1767 = vmatpush.bf16.msra.mxu1 %v1764_v3  ;;  %1690 = vmatpush.bf16.msrb.mxu3 %v3961_v17  ;;  %v3982_v3 = vld [vmem:[%s5199_s6 + $0xd8] sm:$0xff] }
 0x345   : > { %v1528_v21 = vpop.permute.xlu0 %1527  ;;  %v3993_v17 = vld [vmem:[%s5199_s6 + $0x138] sm:$0xff] }
 0x346   : > { %v1532_v23 = vsel %vm1529_vm8, %v1526_v19, %v1528_v21  ;;  %v3960_v21 = vld [vmem:[%s5199_s6 + $0x18] sm:$0xff] }
 0x347   : > { %v1541_v24 = vsel %vm1170_vm14, %v1532_v23, 0  ;;  %v3980_v23 = vld [vmem:[%s5199_s6 + $0xc4] sm:$0xff] }
 0x348   : > { %1550 = vmatpush.bf16.msrb.mxu0 %v1541_v24  ;;  %1768 = vmatpush.bf16.msra.mxu1 %v3968_v12  ;;  %v3967_v24 = vld [vmem:[%s5199_s6 + $0x54] sm:$0xff]  ;;  %v4001_v12 = vld [vmem:[%s5199_s6 + $0x17c] sm:$0xff] }
 0x349   : > { %1691 = vmatpush.bf16.msrb.mxu3 %v3960_v21 }
 0x34b   : > { %3278 = vmatmul.msk.bf16.vlgmr.msrb.gmra.mxu0 %vm1264_vm0, %v3956_v25  ;;  %v3973_v25 = vld [vmem:[%s5199_s6 + $0x88] sm:$0xff]  ;;  %vm5126_vm0 = vmand %vm3066_vm15, %vm3088_vm11  ;;  %vm3075_vm11 = vcmask 1044484  }
 0x34c   : > { %1915 = vmatpush.bf16.msra.mxu0 %v1912_v9  ;;  %1769 = vmatpush.bf16.msra.mxu1 %v3967_v24  ;;  %v3981_v9 = vld [vmem:[%s5199_s6 + $0xd0] sm:$0xff]  ;;  %vm3093_vm4 = vmor %vm5130_vm2, %vm5126_vm0  ;;  %vm3106_vm2 = vcmask 1045509  }
 0x34d   : > { %1843 = vmatpush.bf16.msra.mxu2 %v3973_v25  ;;  %vm3104_vm0 = vmand %vm3075_vm11, %vm3103_vm12 }
 0x350   : > { %1916 = vmatpush.bf16.msra.mxu0 %v3980_v23  ;;  %v3582_v23 = vld [vmem:[%s5199_s6 + $0x1d0] sm:$0x3] }
 0x351   : > { %v2263_v24 = vunpack.c.l.b16 %v3582_v23 }
 0x3a6   : > { %v1279_v26 = vpop.f32.mrf.mxu2 }
 0x3ae   : > { %v1281_v27 = vpop.f32.mrf.mxu2  ;;  %v1303_v28 = vpop.f32.mrf.mxu3 }
 0x3af   : > { %v1304_v30 = vadd.f32 %v1303_v28, %v1279_v26  ;;  %v3959_v26 = vld [vmem:[%s5199_s6 + $0x10] sm:$0xff] }
 0x3b0   : > { %v1338_v29 = vpop.f32.mrf.mxu1  ;;  %v3966_v28 = vld [vmem:[%s5199_s6 + $0x4c] sm:$0xff]  ;;  %1692 = vmatpush.bf16.msrb.mxu3 %v3959_v26 }
 0x3b1   : > { %v1343_v34 = vadd.f32 %v1338_v29, %v1304_v30  ;;  %v3972_v29 = vld [vmem:[%s5199_s6 + $0x80] sm:$0xff]  ;;  %1770 = vmatpush.bf16.msra.mxu1 %v3966_v28  ;;  %v3958_v30 = vld [vmem:[%s5199_s6 + $0x8] sm:$0xff] }
 0x3b2   : > { %1844 = vmatpush.bf16.msra.mxu2 %v3972_v29 }
 0x3b4   : > { %1693 = vmatpush.bf16.msrb.mxu3 %v3958_v30 }
 0x3b6   : > { %v1305_v31 = vpop.f32.mrf.mxu3  ;;  %v1374_v32 = vpop.f32.mrf.mxu2 }
 0x3b7   : > { %v1379_v35 = vadd.f32 %v1374_v32, %v1343_v34  ;;  %v1306_v6 = vadd.f32 %v1305_v31, %v1281_v27  ;;  %v3979_v27 = vld [vmem:[%s5199_s6 + $0xbc] sm:$0xff]  ;;  %v3965_v31 = vld [vmem:[%s5199_s6 + $0x44] sm:$0xff]  ;;  %v3977_v34 = vld [vmem:[%s5199_s6 + $0xac] sm:$0xff] }
 0x3b8   : > { %v1340_v33 = vpop.f32.mrf.mxu1  ;;  %1917 = vmatpush.bf16.msra.mxu0 %v3979_v27  ;;  %v3971_v32 = vld [vmem:[%s5199_s6 + $0x78] sm:$0xff]  ;;  %1771 = vmatpush.bf16.msra.mxu1 %v3965_v31 }
 0x3b9   : > { %v1409_v11 = vadd.f32 %v1404_v13, %v1379_v35  ;;  %v1344_v41 = vadd.f32 %v1340_v33, %v1306_v6  ;;  %v3978_v13 = vld [vmem:[%s5199_s6 + $0xb4] sm:$0xff]  ;;  %v3957_v33 = vld [vmem:[%s5199_s6] sm:$0xff]  ;;  %1845 = vmatpush.bf16.msra.mxu2 %v3971_v32 }
 0x3ba   : > { %v3430_v35 = vld [vmem:[%s5199_s6 + $0x100] sm:$0x3]  ;;  %v3970_v6 = vld [vmem:[%s5199_s6 + $0x70] sm:$0xff]  ;;  %1694 = vmatpush.bf16.msrb.mxu3 %v3957_v33  ;;  %v3658_v31 = vld [vmem:[%s5199_s6 + $0x238] sm:$0x3] }
 0x3bc   : > { %1918 = vmatpush.bf16.msra.mxu0 %v3978_v13  ;;  %v3620_v13 = vld [vmem:[%s5199_s6 + $0x204] sm:$0x3] }
 0x3bd   : > { %1846 = vmatpush.bf16.msra.mxu2 %v3970_v6  ;;  %v2416_v6 = vunpack.c.l.b16 %v3658_v31 }
 0x3be   : > { %v1376_v36 = vpop.f32.mrf.mxu2  ;;  %v1441_v37 = vpop.f32.mrf.mxu3 }
 0x3bf   : > { %v1446_v39 = vadd.f32 %v1441_v37, %v1409_v11  ;;  %v1380_v42 = vadd.f32 %v1376_v36, %v1344_v41  ;;  %v1968_v36 = vunpack.c.l.b16 %v3430_v35  ;;  %v3964_v37 = vld [vmem:[%s5199_s6 + $0x3c] sm:$0xff]  ;;  %v3963_v41 = vld [vmem:[%s5199_s6 + $0x34] sm:$0xff]  ;;  %v3696_v35 = vld [vmem:[%s5199_s6 + $0x26c] sm:$0x3] }
 0x3c0   : > { %v1478_v40 = vpop.f32.mrf.mxu1  ;;  %1919 = vmatpush.bf16.msra.mxu0 %v3977_v34  ;;  %1772 = vmatpush.bf16.msra.mxu1 %v3964_v37  ;;  %v2270_v34 = vpack.c.b16 %v2263_v24, %v2263_v24  ;;  %v2342_v37 = vunpack.c.l.b16 %v3620_v13 }
 0x3c1   : > { %v1483_v43 = vadd.f32 %v1478_v40, %v1446_v39  ;;  %v1410_v50 = vadd.f32 %v1406_v38, %v1380_v42  ;;  %v1975_v11 = vpack.c.b16 %v1968_v36, %v1968_v36  ;;  %v3976_v39 = vld [vmem:[%s5199_s6 + $0xa4] sm:$0xff]  ;;  %v3986_v40 = vld [vmem:[%s5199_s6 + $0xf8] sm:$0xff] }
 0x3c2   : > { %v3969_v42 = vld [vmem:[%s5199_s6 + $0x68] sm:$0xff] }
 0x3c3   : > { %v1986_v38 = vsel %vm418_vm1, %v1975_v11, 0  ;;  %1847 = vmatpush.bf16.msra.mxu2 %v3969_v42 }
 0x3c4   : > { %1989 = vmatpush.bf16.msra.mxu3 %v1986_v38  ;;  %1920 = vmatpush.bf16.msra.mxu0 %v3976_v39  ;;  %v2281_v38 = vsel %vm418_vm1, %v2270_v34, 0  ;;  %v2490_v39 = vunpack.c.l.b16 %v3696_v35  ;;  %v4018_v34 = vld [vmem:[%s5199_s6 + $0x210] sm:$0xff] }
 0x3c5   : > { %1773 = vmatpush.bf16.msra.mxu1 %v3963_v41 }
 0x3c6   : > { %v1515_v22 = vpop.f32.mrf.mxu2  ;;  %v1443_v46 = vpop.f32.mrf.mxu3 }
 0x3c7   : > { %v1520_v44 = vadd.f32 %v1515_v22, %v1483_v43  ;;  %v1447_v58 = vadd.f32 %v1443_v46, %v1410_v50  ;;  %v3468_v43 = vld [vmem:[%s5199_s6 + $0x134] sm:$0x3]  ;;  %v3506_v22 = vld [vmem:[%s5199_s6 + $0x168] sm:$0x3]  ;;  %v3975_v46 = vld [vmem:[%s5199_s6 + $0x9c] sm:$0xff] }
 0x3c8   : > { %v1552_v47 = vpop.f32.mrf.mxu0  ;;  %v1480_v63 = vpop.f32.mrf.mxu1  ;;  %1990 = vmatpush.bf16.msra.mxu3 %v3986_v40  ;;  %1921 = vmatpush.bf16.msra.mxu0 %v3975_v46  ;;  %v2497_v46 = vpack.c.b16 %v2490_v39, %v2490_v39  ;;  %v4011_v39 = vld [vmem:[%s5199_s6 + $0x1d4] sm:$0xff] }
 0x3c9   : > { %v1557_v51 = vadd.f32 %v1552_v47, %v1520_v44  ;;  %v1484_v14 = vadd.f32 %v1480_v63, %v1447_v58  ;;  %v2042_v44 = vunpack.c.l.b16 %v3468_v43  ;;  %v3544_v47 = vld [vmem:[%s5199_s6 + $0x19c] sm:$0x3]  ;;  %v3984_v58 = vld [vmem:[%s5199_s6 + $0xe8] sm:$0xff]  ;;  %v3983_v63 = vld [vmem:[%s5199_s6 + $0xe0] sm:$0xff]  ;;  %v2423_v43 = vpack.c.b16 %v2416_v6, %v2416_v6 }
 0x3ca   : > { %v2190_v48 = vunpack.c.l.b16 %v3544_v47 }
 0x3cb   : > { %v1571_v59 = vadd.f32 %v1564_v45, %v1557_v51  ;;  %v2116_v45 = vunpack.c.l.b16 %v3506_v22  ;;  %v2049_v49 = vpack.c.b16 %v2042_v44, %v2042_v44  ;;  %v3985_v51 = vld [vmem:[%s5199_s6 + $0xf0] sm:$0xff]  ;;  %v4010_v44 = vld [vmem:[%s5199_s6 + $0x1c8] sm:$0xff] }
 0x3cc   : > { %v2197_v52 = vpack.c.b16 %v2190_v48, %v2190_v48  ;;  %1991 = vmatpush.bf16.msra.mxu3 %v3985_v51  ;;  %v4009_v51 = vld [vmem:[%s5199_s6 + $0x1c0] sm:$0xff] }
 0x3cd   : > { %v4613_v1 = vmax.f32 %v1571_v59, 0.0  ;;  %v2123_v50 = vpack.c.b16 %v2116_v45, %v2116_v45  ;;  %v2060_v53 = vsel %vm418_vm1, %v2049_v49, 0  ;;  %v4004_v59 = vld [vmem:[%s5199_s6 + $0x194] sm:$0xff] }
 0x3ce   : > { %v1517_v4 = vpop.f32.mrf.mxu2  ;;  %2063 = vmatpush.bf16.msrb.mxu1 %v2060_v53  ;;  %v2208_v55 = vsel %vm418_vm1, %v2197_v52, 0  ;;  %v2508_v53 = vsel %vm418_vm1, %v2497_v46, 0  ;;  %v4040_v46 = vld [vmem:[%s5199_s6 + $0x2cc] sm:$0xff] }
 0x3cf   : > { %1593 = vrot.lane.b32.xlu2 %v4613_v1, %s4160_s20  ;;  %1583 = vrot.lane.b32.xlu1 %v4613_v1, %s4161_s21  ;;  %v1521_v8 = vadd.f32 %v1517_v4, %v1484_v14  ;;  %v2134_v54 = vsel %vm418_vm1, %v2123_v50, 0  ;;  %v4002_v4 = vld [vmem:[%s5199_s6 + $0x184] sm:$0xff]  ;;  %v3988_v14 = vld [vmem:[%s5199_s6 + $0x10c] sm:$0xff]  ;;  %v2434_v50 = vsel %vm418_vm1, %v2423_v43, 0 }
 0x3d0   : > { %1577 = vrot.lane.b32.xlu0 %v4613_v1, %s4143_s27  ;;  %v1554_v10 = vpop.f32.mrf.mxu0  ;;  %2137 = vmatpush.bf16.msrb.mxu2 %v2134_v54  ;;  %v4016_v54 = vld [vmem:[%s5199_s6 + $0x1fc] sm:$0xff] }
 0x3d1   : > { %v1558_v16 = vadd.f32 %v1554_v10, %v1521_v8  ;;  %2211 = vmatpush.bf16.msrb.mxu0 %v2208_v55  ;;  %1992 = vmatpush.bf16.msra.mxu3 %v3984_v58  ;;  %v4000_v8 = vld [vmem:[%s5199_s6 + $0x174] sm:$0xff]  ;;  %v3987_v10 = vld [vmem:[%s5199_s6 + $0x104] sm:$0xff]  ;;  %v4023_v43 = vld [vmem:[%s5199_s6 + $0x23c] sm:$0xff] }
 0x3d2   : > { %2064 = vmatpush.bf16.msrb.mxu1 %v3992_v56  ;;  %v4022_v55 = vld [vmem:[%s5199_s6 + $0x230] sm:$0xff]  ;;  %v4008_v58 = vld [vmem:[%s5199_s6 + $0x1b8] sm:$0xff] }
 0x3d3   : > { %v1572_v18 = vadd.f32 %v1569_v20, %v1558_v16  ;;  %v3999_v16 = vld [vmem:[%s5199_s6 + $0x16c] sm:$0xff] }
 0x3d4   : > { %2138 = vmatpush.bf16.msrb.mxu2 %v3998_v57 }
 0x3d5   : > { %v4643_v19 = vmax.f32 %v1572_v18, 0.0  ;;  %2212 = vmatpush.bf16.msrb.mxu0 %v4004_v59  ;;  %1993 = vmatpush.bf16.msra.mxu3 %v3983_v63  ;;  %v4028_v59 = vld [vmem:[%s5199_s6 + $0x264] sm:$0xff] }
 0x3d6   : > { %2065 = vmatpush.bf16.msrb.mxu1 %v3991_v61  ;;  %v4021_v63 = vld [vmem:[%s5199_s6 + $0x228] sm:$0xff] }
 0x3d7   : > { %1613 = vrot.lane.b32.xlu2 %v4613_v1, %s4165_s29  ;;  %1607 = vrot.lane.b32.xlu1 %v4613_v1, %s4162_s26 }
 0x3d8   : > { %1599 = vrot.lane.b32.xlu0 %v4613_v1, %s4159_s28  ;;  %2139 = vmatpush.bf16.msrb.mxu2 %v3997_v62  ;;  %v4015_v62 = vld [vmem:[%s5199_s6 + $0x1f4] sm:$0xff] }
 0x3d9   : > { %2213 = vmatpush.bf16.msrb.mxu0 %v4003_v0  ;;  %1994 = vmatpush.bf16.msra.mxu3 %v3982_v3  ;;  %v4007_v3 = vld [vmem:[%s5199_s6 + $0x1b0] sm:$0xff] }
 0x3da   : > { %2066 = vmatpush.bf16.msrb.mxu1 %v3990_v60 }
 0x3dc   : > { %2140 = vmatpush.bf16.msrb.mxu2 %v3996_v2  ;;  %v3734_v2 = vld [vmem:[%s5199_s6 + $0x2a0] sm:$0x3] }
 0x3dd   : > { %2214 = vmatpush.bf16.msrb.mxu0 %v4002_v4  ;;  %1995 = vmatpush.bf16.msra.mxu3 %v3981_v9  ;;  %v4027_v4 = vld [vmem:[%s5199_s6 + $0x25c] sm:$0xff] }
 0x3de   : > { %2067 = vmatpush.bf16.msrb.mxu1 %v3989_v5 }
 0x3df   : > { %1595 = vrot.lane.b32.xlu2 %v4643_v19, %s4160_s20  ;;  %1585 = vrot.lane.b32.xlu1 %v4643_v19, %s4161_s21 }
 0x3e0   : > { %1579 = vrot.lane.b32.xlu0 %v4643_v19, %s4143_s27  ;;  %2141 = vmatpush.bf16.msrb.mxu2 %v3995_v7  ;;  %s3180_s27 = sshll.u32 %s5219_s14, 3 }
 0x3e1   : > { %2215 = vmatpush.bf16.msrb.mxu0 %v4001_v12  ;;  %v4014_v12 = vld [vmem:[%s5199_s6 + $0x1ec] sm:$0xff] }
 0x3e2   : > { %2068 = vmatpush.bf16.msrb.mxu1 %v3988_v14  ;;  %v4020_v14 = vld [vmem:[%s5199_s6 + $0x220] sm:$0xff] }
 0x3e4   : > { %2142 = vmatpush.bf16.msrb.mxu2 %v3994_v15  ;;  %v2564_v15 = vunpack.c.l.b16 %v3734_v2  ;;  %v4036_v2 = vld [vmem:[%s5199_s6 + $0x2ac] sm:$0xff] }
 0x3e5   : > { %2216 = vmatpush.bf16.msrb.mxu0 %v4000_v8 }
 0x3e6   : > { %2069 = vmatpush.bf16.msrb.mxu1 %v3987_v10  ;;  %v4006_v10 = vld [vmem:[%s5199_s6 + $0x1a8] sm:$0xff]  ;;  %v2571_v23 = vpack.c.b16 %v2564_v15, %v2564_v15 }
 0x3e7   : > { %1615 = vrot.lane.b32.xlu2 %v4643_v19, %s4165_s29  ;;  %1609 = vrot.lane.b32.xlu1 %v4643_v19, %s4162_s26 }
 0x3e8   : > { %1601 = vrot.lane.b32.xlu0 %v4643_v19, %s4159_s28  ;;  %2143 = vmatpush.bf16.msrb.mxu2 %v3993_v17  ;;  %v4026_v17 = vld [vmem:[%s5199_s6 + $0x254] sm:$0xff]  ;;  %s357_s28 = scalar_lea.vmem %s5203_s10, %s3180_s27 }
 0x3e9   : > { %2217 = vmatpush.bf16.msrb.mxu0 %v3999_v16  ;;  %v3772_v16 = vld [vmem:[%s5199_s6 + $0x2d4] sm:$0x3] }
 0x429   : > { %v1594_v20 = vpop.permute.xlu2 %1593 }
 0x431   : > { %v1614_v25 = vpop.permute.xlu2 %1613 }
 0x439   : > { %v1596_v22 = vpop.permute.xlu2 %1595 }
 0x441   : > { %v1584_v18 = vpop.permute.xlu1 %1583  ;;  %v1616_v61 = vpop.permute.xlu2 %1615 }
 0x442   : > { %v1578_v21 = vpop.permute.xlu0 %1577 }
 0x443   : > { %v1589_v26 = vsel %vm1418_vm6, %v1578_v21, %v1584_v18  ;;  %v4019_v21 = vld [vmem:[%s5199_s6 + $0x218] sm:$0xff] }
 0x444   : > { %v1591_v32 = vmax.f32 %v4613_v1, %v1589_v26  ;;  %v2349_v1 = vpack.c.b16 %v2342_v37, %v2342_v37  ;;  %v3848_v26 = vld [vmem:[%s5199_s6 + $0x33c] sm:$0x3] }
 0x445   : > { %v2786_v35 = vunpack.c.l.b16 %v3848_v26 }
 0x446   : > { %v2360_v49 = vsel %vm418_vm1, %v2349_v1, 0 }
 0x449   : > { %v1608_v27 = vpop.permute.xlu1 %1607 }
 0x44a   : > { %v1619_v28 = vsel %vm1529_vm8, %v1608_v27, %v1614_v25  ;;  %v1600_v29 = vpop.permute.xlu0 %1599  ;;  %v4005_v27 = vld [vmem:[%s5199_s6 + $0x1a0] sm:$0xff] }
 0x44b   : > { %v1605_v30 = vsel %vm1492_vm5, %v1594_v20, %v1600_v29  ;;  %v3810_v20 = vld [vmem:[%s5199_s6 + $0x308] sm:$0x3]  ;;  %v2638_v29 = vunpack.c.l.b16 %v3772_v16 }
 0x44c   : > { %v1621_v33 = vmax.f32 %v1605_v30, %v1619_v28  ;;  %v4025_v28 = vld [vmem:[%s5199_s6 + $0x24c] sm:$0xff]  ;;  %v2712_v30 = vunpack.c.l.b16 %v3810_v20 }
 0x44d   : > { %v2645_v37 = vpack.c.b16 %v2638_v29, %v2638_v29 }
 0x44e   : > { %v1623_v36 = vmax.f32 %v1591_v32, %v1621_v33  ;;  %v2582_v32 = vsel %vm418_vm1, %v2571_v23, 0  ;;  %v4012_v33 = vld [vmem:[%s5199_s6 + $0x1dc] sm:$0xff]  ;;  %v2719_v6 = vpack.c.b16 %v2712_v30, %v2712_v30 }
 0x450   : > { %v1625_v11 = vpack.c.bf16 %v1623_v36, %v1623_v36  ;;  %v4024_v36 = vld [vmem:[%s5199_s6 + $0x244] sm:$0xff]  ;;  %v2730_v1 = vsel %vm418_vm1, %v2719_v6, 0 }
 0x451   : > { %v1586_v40 = vpop.permute.xlu1 %1585  ;;  %v3916_v6 = vld [vmem:[%s5201_s8 + $0x48] sm:$0xf] }
 0x452   : > { %v1716_v41 = vunpack.c.l.b16 %v1625_v11  ;;  %3303 = vmatmul.msk.bf16.vlgmr.msrb.gmra.mxu3 %vm1680_vm9, %v1625_v11  ;;  %v1580_v42 = vpop.permute.xlu0 %1579  ;;  %v4034_v11 = vld [vmem:[%s5199_s6 + $0x298] sm:$0xff] }
 0x453   : > { %2284 = vmatpush.bf16.msrb.mxu3 %v2281_v38  ;;  %v1590_v5 = vsel %vm1418_vm6, %v1580_v42, %v1586_v40  ;;  %v4017_v40 = vld [vmem:[%s5199_s6 + $0x208] sm:$0xff]  ;;  %v2656_v42 = vsel %vm418_vm1, %v2645_v37, 0  ;;  %v3910_v37 = vld [vmem:[%s5201_s8 + $0x60] sm:$0xf0] }
 0x454   : > { %v4826_v45 = vpack.c.b16 %v1716_v41, %v1716_v41  ;;  %v1592_v8 = vmax.f32 %v4643_v19, %v1590_v5  ;;  %v4013_v19 = vld [vmem:[%s5199_s6 + $0x1e4] sm:$0xff]  ;;  %v2793_v41 = vpack.c.b16 %v2786_v35, %v2786_v35 }
 0x455   : > { %v4061_v35 = vld [vmem:[%s5201_s8 + $0x44] sm:$0xf] }
 0x456   : > { %v4829_v47 = vshrl.u32 %v4826_v45, 16  ;;  %v1794_v48 = vrot.slane %v4826_v45, 1  ;;  %v1942_v7 = vrot.slane %v4826_v45, 2  ;;  %v2090_v25 = vrot.slane %v4826_v45, 3 }
 0x457   : > { %2285 = vmatpush.bf16.msrb.mxu3 %v4010_v44  ;;  %v2804_v45 = vsel %vm418_vm1, %v2793_v41, 0  ;;  %v4062_v41 = vld [vmem:[%s5201_s8 + $0x4c] sm:$0xf] }
 0x458   : > { %3341 = vmatmul.msk.bf16.vlgmr.msra.gmra.mxu1 %vm1680_vm9, %v4829_v47  ;;  %3379 = vmatmul.msk.bf16.vlgmr.msra.gmra.mxu2 %vm1680_vm9, %v1794_v48  ;;  %v1868_v52 = vrot.slane %v4829_v47, 1  ;;  %v2016_v24 = vrot.slane %v4829_v47, 2  ;;  %v2164_v13 = vrot.slane %v4829_v47, 3  ;;  %v4046_v47 = vld [vmem:[%s5199_s6 + $0x300] sm:$0xff]  ;;  %v4032_v48 = vld [vmem:[%s5199_s6 + $0x288] sm:$0xff] }
 0x459   : > { %2363 = vmatpush.bf16.msra.mxu1 %v2360_v49  ;;  %2437 = vmatpush.bf16.msra.mxu2 %v2434_v50  ;;  %v1610_v56 = vpop.permute.xlu1 %1609  ;;  %v4052_v49 = vld [vmem:[%s5199_s6 + $0x334] sm:$0xff] }
 0x45a   : > { %3417 = vmatmul.msk.bf16.vlgmr.msra.gmra.mxu0 %vm1680_vm9, %v1868_v52  ;;  %v1602_v57 = vpop.permute.xlu0 %1601  ;;  %v1620_v0 = vsel %vm1529_vm8, %v1610_v56, %v1616_v61  ;;  %v4045_v52 = vld [vmem:[%s5199_s6 + $0x2f8] sm:$0xff]  ;;  %v4050_v61 = vld [vmem:[%s5199_s6 + $0x324] sm:$0xff]  ;;  %vm3099_vm8 = vsmask.f32 3328 }
 0x45b   : > { %2286 = vmatpush.bf16.msrb.mxu3 %v4009_v51  ;;  %2511 = vmatpush.bf16.msra.mxu0 %v2508_v53  ;;  %v1606_v60 = vsel %vm1492_vm5, %v1596_v22, %v1602_v57  ;;  %v4033_v22 = vld [vmem:[%s5199_s6 + $0x290] sm:$0xff]  ;;  %v4039_v51 = vld [vmem:[%s5199_s6 + $0x2c4] sm:$0xff]  ;;  %v4038_v57 = vld [vmem:[%s5199_s6 + $0x2bc] sm:$0xff]  ;;  %vm3070_vm5 = vcmask 1042434  }
 0x45c   : > { %v1622_v9 = vmax.f32 %v1606_v60, %v1620_v0  ;;  %v4029_v0 = vld [vmem:[%s5199_s6 + $0x270] sm:$0xff]  ;;  %v4049_v60 = vld [vmem:[%s5199_s6 + $0x31c] sm:$0xff]  ;;  %vm3096_vm6 = vmand %vm3070_vm5, %vm3095_vm3  ;;  %vm3107_vm3 = vsmask.f32 5376 }
 0x45d   : > { %2364 = vmatpush.bf16.msra.mxu1 %v4016_v54  ;;  %2438 = vmatpush.bf16.msra.mxu2 %v4022_v55  ;;  %v4031_v54 = vld [vmem:[%s5199_s6 + $0x280] sm:$0xff]  ;;  %v4051_v55 = vld [vmem:[%s5199_s6 + $0x32c] sm:$0xff] }
 0x45e   : > { %v1624_v18 = vmax.f32 %v1592_v8, %v1622_v9  ;;  %v4041_v9 = vld [vmem:[%s5199_s6 + $0x2d8] sm:$0xff] }
 0x45f   : > { %2287 = vmatpush.bf16.msrb.mxu3 %v4008_v58  ;;  %2512 = vmatpush.bf16.msra.mxu0 %v4028_v59  ;;  %v4044_v58 = vld [vmem:[%s5199_s6 + $0x2f0] sm:$0xff]  ;;  %v4030_v59 = vld [vmem:[%s5199_s6 + $0x278] sm:$0xff] }
 0x460   : > { %v1626_v31 = vpack.c.bf16 %v1624_v18, %v1624_v18 }
 0x461   : > { %2365 = vmatpush.bf16.msra.mxu1 %v4015_v62  ;;  %2439 = vmatpush.bf16.msra.mxu2 %v4021_v63  ;;  %v4037_v62 = vld [vmem:[%s5199_s6 + $0x2b4] sm:$0xff]  ;;  %v4043_v63 = vld [vmem:[%s5199_s6 + $0x2e8] sm:$0xff] }
 0x462   : > { %3455 = vmatmul.msk.bf16.vlgmr.msra.gmra.mxu3 %vm1680_vm9, %v1942_v7  ;;  %v2312_v38 = vunpack.c.l.b16 %v1626_v31  ;;  %v4035_v7 = vld [vmem:[%s5199_s6 + $0x2a4] sm:$0xff] }
 0x463   : > { %2288 = vmatpush.bf16.msrb.mxu3 %v4007_v3  ;;  %2513 = vmatpush.bf16.msra.mxu0 %v4027_v4  ;;  %v4042_v3 = vld [vmem:[%s5199_s6 + $0x2e0] sm:$0xff]  ;;  %v4048_v4 = vld [vmem:[%s5199_s6 + $0x314] sm:$0xff] }
 0x464   : > { %v4942_v44 = vpack.c.b16 %v2312_v38, %v2312_v38 }
 0x465   : > { %2366 = vmatpush.bf16.msra.mxu1 %v4014_v12  ;;  %2440 = vmatpush.bf16.msra.mxu2 %v4020_v14  ;;  %v4047_v12 = vld [vmem:[%s5199_s6 + $0x30c] sm:$0xff] }
 0x466   : > { %v2315_v50 = vshrl.u32 %v4942_v44, 16  ;;  %v2390_v53 = vrot.slane %v4942_v44, 1  ;;  %v2538_v5 = vrot.slane %v4942_v44, 2  ;;  %v2686_v14 = vrot.slane %v4942_v44, 3  ;;  %v4057_v44 = vld [vmem:[%s5201_s8 + $0x1c] sm:$0xf0] }
 0x467   : > { %2289 = vmatpush.bf16.msrb.mxu3 %v4006_v10  ;;  %2514 = vmatpush.bf16.msra.mxu0 %v4026_v17 }
 0x468   : > { %3493 = vmatmul.msk.bf16.vlgmr.msrb.gmra.mxu1 %vm1680_vm9, %v2016_v24  ;;  %3531 = vmatmul.msk.bf16.vlgmr.msrb.gmra.mxu2 %vm1680_vm9, %v2090_v25  ;;  %v2464_v56 = vrot.slane %v2315_v50, 1  ;;  %v2612_v15 = vrot.slane %v2315_v50, 2  ;;  %v2760_v8 = vrot.slane %v2315_v50, 3  ;;  %v1627_v24 = vld [vmem:[%s5200_s7] sm:$0x1] }
 0x469   : > { %2367 = vmatpush.bf16.msra.mxu1 %v4013_v19  ;;  %2441 = vmatpush.bf16.msra.mxu2 %v4019_v21 }
 0x46a   : > { %3569 = vmatmul.msk.bf16.vlgmr.msrb.gmra.mxu0 %vm1680_vm9, %v2164_v13 }
 0x46b   : > { %2290 = vmatpush.bf16.msrb.mxu3 %v4005_v27  ;;  %2515 = vmatpush.bf16.msra.mxu0 %v4025_v28 }
 0x46d   : > { %2368 = vmatpush.bf16.msra.mxu1 %v4012_v33  ;;  %2442 = vmatpush.bf16.msra.mxu2 %v4018_v34  ;;  %v3908_v33 = vld [vmem:[%s5201_s8 + $0x40] sm:$0xf] }
 0x46e   : > { %v4065_v34 = vld [vmem:[%s5201_s8 + $0x5c] sm:$0xf0] }
 0x46f   : > { %2585 = vmatpush.bf16.msra.mxu3 %v2582_v32  ;;  %2516 = vmatpush.bf16.msra.mxu0 %v4024_v36  ;;  %v3909_v36 = vor.u32 %v4065_v34, %v3908_v33 }
 0x471   : > { %2369 = vmatpush.bf16.msra.mxu1 %v4011_v39  ;;  %2443 = vmatpush.bf16.msra.mxu2 %v4017_v40  ;;  %v3913_v39 = vor.u32 %v4061_v35, %v3910_v37 }
 0x472   : > { %3607 = vmatmul.msk.bf16.vlgmr.msrb.gmra.mxu3 %vm1680_vm9, %v1626_v31 }
 0x473   : > { %2586 = vmatpush.bf16.msra.mxu3 %v4034_v11  ;;  %2517 = vmatpush.bf16.msra.mxu0 %v4023_v43  ;;  %v4066_v11 = vld [vmem:[%s5201_s8 + $0x64] sm:$0xf0] }
 0x474   : > { %v3917_v40 = vor.u32 %v4066_v11, %v3916_v6 }
 0x475   : > { %2659 = vmatpush.bf16.msrb.mxu1 %v2656_v42  ;;  %2733 = vmatpush.bf16.msrb.mxu2 %v2730_v1  ;;  %v3918_v42 = vld [vmem:[%s5201_s8 + $0x68] sm:$0xf0] }
 0x476   : > { %v3921_v1 = vor.u32 %v4062_v41, %v3918_v42 }
 0x477   : > { %2587 = vmatpush.bf16.msra.mxu3 %v4033_v22  ;;  %2807 = vmatpush.bf16.msrb.mxu0 %v2804_v45  ;;  %v3876_v22 = vld [vmem:[%s5201_s8] sm:$0xf]  ;;  %v4053_v45 = vld [vmem:[%s5201_s8 + $0x4] sm:$0xf] }
 0x478   : > { %3645 = vmatmul.msk.bf16.vlgmr.msra.gmra.mxu1 %vm1680_vm9, %v2315_v50  ;;  %3683 = vmatmul.msk.bf16.vlgmr.msra.gmra.mxu2 %vm1680_vm9, %v2390_v53 }
 0x479   : > { %2660 = vmatpush.bf16.msrb.mxu1 %v4040_v46  ;;  %2734 = vmatpush.bf16.msrb.mxu2 %v4046_v47  ;;  %v3877_v46 = vor.u32 %v4057_v44, %v3876_v22  ;;  %v3878_v47 = vld [vmem:[%s5201_s8 + $0x20] sm:$0xf0] }
 0x47a   : > { %3721 = vmatmul.msk.bf16.vlgmr.msra.gmra.mxu0 %vm1680_vm9, %v2464_v56 }
 0x47b   : > { %2588 = vmatpush.bf16.msra.mxu3 %v4032_v48  ;;  %2808 = vmatpush.bf16.msrb.mxu0 %v4052_v49  ;;  %v3884_v48 = vld [vmem:[%s5201_s8 + $0x8] sm:$0xf] }
 0x47c   : > { %v4058_v49 = vld [vmem:[%s5201_s8 + $0x24] sm:$0xf0] }
 0x47d   : > { %2661 = vmatpush.bf16.msrb.mxu1 %v4039_v51  ;;  %2735 = vmatpush.bf16.msrb.mxu2 %v4045_v52  ;;  %v3881_v52 = vor.u32 %v4053_v45, %v3878_v47  ;;  %v3885_v53 = vor.u32 %v4058_v49, %v3884_v48 }
 0x47f   : > { %2589 = vmatpush.bf16.msra.mxu3 %v4031_v54  ;;  %2809 = vmatpush.bf16.msrb.mxu0 %v4051_v55  ;;  %v4054_v54 = vld [vmem:[%s5201_s8 + $0xc] sm:$0xf] }
 0x480   : > { %v3886_v55 = vld [vmem:[%s5201_s8 + $0x28] sm:$0xf0] }
 0x481   : > { %2662 = vmatpush.bf16.msrb.mxu1 %v4038_v57  ;;  %2736 = vmatpush.bf16.msrb.mxu2 %v4044_v58  ;;  %v3889_v56 = vor.u32 %v4054_v54, %v3886_v55 }
 0x483   : > { %2590 = vmatpush.bf16.msra.mxu3 %v4030_v59  ;;  %2810 = vmatpush.bf16.msrb.mxu0 %v4050_v61 }
 0x485   : > { %2663 = vmatpush.bf16.msrb.mxu1 %v4037_v62  ;;  %2737 = vmatpush.bf16.msrb.mxu2 %v4043_v63  ;;  %v3924_v62 = vld [vmem:[%s5201_s8 + $0x50] sm:$0xf] }
 0x486   : > { %v4067_v63 = vld [vmem:[%s5201_s8 + $0x6c] sm:$0xf0] }
 0x487   : > { %2591 = vmatpush.bf16.msra.mxu3 %v4029_v0  ;;  %2811 = vmatpush.bf16.msrb.mxu0 %v4049_v60  ;;  %v4063_v0 = vld [vmem:[%s5201_s8 + $0x54] sm:$0xf] }
 0x489   : > { %2664 = vmatpush.bf16.msrb.mxu1 %v4036_v2  ;;  %2738 = vmatpush.bf16.msrb.mxu2 %v4042_v3  ;;  %v3925_v2 = vor.u32 %v4067_v63, %v3924_v62  ;;  %v3926_v3 = vld [vmem:[%s5201_s8 + $0x70] sm:$0xf0] }
 0x48a   : > { %3759 = vmatmul.msk.bf16.vlgmr.msra.gmra.mxu3 %vm1680_vm9, %v2538_v5  ;;  %v4068_v5 = vld [vmem:[%s5201_s8 + $0x74] sm:$0xf0] }
 0x48b   : > { %2812 = vmatpush.bf16.msrb.mxu0 %v4048_v4  ;;  %2945 = vmatpush.bf16.msrb.mxu3 %v3909_v36  ;;  %v3932_v4 = vld [vmem:[%s5201_s8 + $0x58] sm:$0xf] }
 0x48d   : > { %2665 = vmatpush.bf16.msrb.mxu1 %v4035_v7  ;;  %2739 = vmatpush.bf16.msrb.mxu2 %v4041_v9  ;;  %v3929_v7 = vor.u32 %v4063_v0, %v3926_v3  ;;  %v3933_v9 = vor.u32 %v4068_v5, %v3932_v4 }
 0x48f   : > { %2813 = vmatpush.bf16.msrb.mxu0 %v4047_v12  ;;  %2946 = vmatpush.bf16.msrb.mxu3 %v3877_v46  ;;  %v4064_v12 = vld [vmem:[%s5201_s8 + $0x5c] sm:$0xf] }
 0x490   : > { %3797 = vmatmul.msk.bf16.vlgmr.msrb.gmra.mxu1 %vm1680_vm9, %v2612_v15  ;;  %3835 = vmatmul.msk.bf16.vlgmr.msrb.gmra.mxu2 %vm1680_vm9, %v2686_v14  ;;  %v3934_v14 = vld [vmem:[%s5201_s8 + $0x78] sm:$0xf0]  ;;  %v3892_v15 = vld [vmem:[%s5201_s8 + $0x10] sm:$0xf] }
 0x491   : > { %2958 = vmatpush.bf16.msra.mxu1 %v3913_v39  ;;  %2971 = vmatpush.bf16.msra.mxu2 %v3917_v40 }
 0x492   : > { %3873 = vmatmul.msk.bf16.vlgmr.msrb.gmra.mxu0 %vm1680_vm9, %v2760_v8  ;;  %v3937_v8 = vor.u32 %v4064_v12, %v3934_v14  ;;  %vm5142_vm9 = vmor %vm3096_vm6, %vm3093_vm4 }
 0x493   : > { %2984 = vmatpush.bf16.msra.mxu0 %v3921_v1  ;;  %2997 = vmatpush.bf16.msra.mxu3 %v3925_v2  ;;  %vm5159_vm6 = vmand %vm3106_vm2, %vm3107_vm3  ;;  %vm3083_vm2 = vcmask 1045508  }
 0x495   : > { %2959 = vmatpush.bf16.msra.mxu1 %v3881_v52  ;;  %2972 = vmatpush.bf16.msra.mxu2 %v3885_v53 }
 0x497   : > { %2985 = vmatpush.bf16.msra.mxu0 %v3889_v56 }
 0x499   : > { %3010 = vmatpush.bf16.msrb.mxu1 %v3929_v7  ;;  %3023 = vmatpush.bf16.msrb.mxu2 %v3933_v9 }
 0x49b   : > { %3036 = vmatpush.bf16.msrb.mxu0 %v3937_v8 }
 0x4d5   : > { %v1696_v10 = vpop.f32.mrf.mxu3  ;;  %v1775_v17 = vpop.f32.mrf.mxu1 }
 0x4d6   : > { %v1700_v27 = vadd.f32 %v1696_v10, %v1627_v24  ;;  %v4059_v10 = vld [vmem:[%s5201_s8 + $0x2c] sm:$0xf0]  ;;  %v4056_v24 = vld [vmem:[%s5201_s8 + $0x1c] sm:$0xf] }
 0x4d7   : > { %v1923_v16 = vpop.f32.mrf.mxu0 }
 0x4d8   : > { %v1779_v29 = vadd.f32 %v1775_v17, %v1700_v27  ;;  %v4055_v17 = vld [vmem:[%s5201_s8 + $0x14] sm:$0xf]  ;;  %v3902_v27 = vld [vmem:[%s5201_s8 + $0x38] sm:$0xf0] }
 0x4db   : > { %v1849_v20 = vpop.f32.mrf.mxu2 }
 0x4dc   : > { %v1853_v13 = vadd.f32 %v1849_v20, %v1779_v29 }
 0x4dd   : > { %v1698_v18 = vpop.f32.mrf.mxu3  ;;  %v1777_v19 = vpop.f32.mrf.mxu1 }
 0x4de   : > { %v1927_v43 = vadd.f32 %v1923_v16, %v1853_v13  ;;  %v3894_v16 = vld [vmem:[%s5201_s8 + $0x30] sm:$0xf0]  ;;  %v3893_v18 = vor.u32 %v4059_v10, %v3892_v15  ;;  %v3905_v13 = vor.u32 %v4056_v24, %v3902_v27 }
 0x4df   : > { %v1925_v21 = vpop.f32.mrf.mxu0  ;;  %v3897_v19 = vor.u32 %v4055_v17, %v3894_v16 }
 0x4e0   : > { %v3900_v21 = vld [vmem:[%s5201_s8 + $0x18] sm:$0xf]  ;;  %2998 = vmatpush.bf16.msra.mxu3 %v3893_v18  ;;  %3037 = vmatpush.bf16.msrb.mxu0 %v3905_v13 }
 0x4e1   : > { %3011 = vmatpush.bf16.msrb.mxu1 %v3897_v19 }
 0x4e3   : > { %v1851_v23 = vpop.f32.mrf.mxu2 }
 0x4e4   : > { %v4060_v23 = vld [vmem:[%s5201_s8 + $0x34] sm:$0xf0] }
 0x4e5   : > { %v1997_v25 = vpop.f32.mrf.mxu3  ;;  %v2071_v26 = vpop.f32.mrf.mxu1 }
 0x4e6   : > { %v2001_v50 = vadd.f32 %v1997_v25, %v1927_v43 }
 0x4e7   : > { %v5026_v28 = vpop.f32.mrf.mxu0 }
 0x4e8   : > { %v2075_v59 = vadd.f32 %v2071_v26, %v2001_v50  ;;  %v3901_v26 = vor.u32 %v4060_v23, %v3900_v21 }
 0x4ea   : > { %3024 = vmatpush.bf16.msrb.mxu2 %v3901_v26 }
 0x4eb   : > { %v2145_v30 = vpop.f32.mrf.mxu2 }
 0x4ec   : > { %v2149_v60 = vadd.f32 %v2145_v30, %v2075_v59 }
 0x4ed   : > { %v1999_v31 = vpop.f32.mrf.mxu3  ;;  %v2073_v32 = vpop.f32.mrf.mxu1 }
 0x4ee   : > { %v2223_v25 = vadd.f32 %v5026_v28, %v2149_v60 }
 0x4ef   : > { %v2221_v38 = vpop.f32.mrf.mxu0 }
 0x4f3   : > { %v2147_v51 = vpop.f32.mrf.mxu2 }
 0x4f4   : > { %v2837_v51 = vld [vmem:[%s5202_s9] sm:$0xff] }
 0x4f5   : > { %v2292_v57 = vpop.f32.mrf.mxu3  ;;  %v2371_v58 = vpop.f32.mrf.mxu1  ;;  %v2919_v53 = vperm.slane %v2837_v51, 0  ;;  %v2921_v55 = vperm.slane %v2837_v51, 2  ;;  %v2920_v56 = vperm.slane %v2837_v51, 1  ;;  %v2924_v5 = vperm.slane %v2837_v51, 5 }
 0x4f6   : > { %v2296_v31 = vadd.f32 %v2292_v57, %v2223_v25  ;;  %v2922_v57 = vperm.slane %v2837_v51, 3  ;;  %v2926_v12 = vperm.slane %v2837_v51, 7  ;;  %v2923_v15 = vperm.slane %v2837_v51, 4 }
 0x4f7   : > { %v2519_v61 = vpop.f32.mrf.mxu0  ;;  %v2925_v17 = vperm.slane %v2837_v51, 6 }
 0x4f8   : > { %v2375_v33 = vadd.f32 %v2371_v58, %v2296_v31 }
 0x4fb   : > { %v2445_v20 = vpop.f32.mrf.mxu2 }
 0x4fc   : > { %v2449_v35 = vadd.f32 %v2445_v20, %v2375_v33 }
 0x4fd   : > { %v2294_v29 = vpop.f32.mrf.mxu3  ;;  %v2373_v30 = vpop.f32.mrf.mxu1 }
 0x4fe   : > { %v2523_v36 = vadd.f32 %v2519_v61, %v2449_v35 }
 0x4ff   : > { %v2521_v32 = vpop.f32.mrf.mxu0 }
 0x503   : > { %v2447_v34 = vpop.f32.mrf.mxu2 }
 0x50d   : > { %v2593_v28 = vpop.f32.mrf.mxu3  ;;  %v2667_v37 = vpop.f32.mrf.mxu1 }
 0x50e   : > { %v2597_v6 = vadd.f32 %v2593_v28, %v2523_v36 }
 0x50f   : > { %v2815_v11 = vpop.f32.mrf.mxu0 }
 0x510   : > { %v2671_v38 = vadd.f32 %v2667_v37, %v2597_v6 }
 0x513   : > { %v2741_v39 = vpop.f32.mrf.mxu2 }
 0x514   : > { %v2745_v40 = vadd.f32 %v2741_v39, %v2671_v38 }
 0x515   : > { %v2595_v41 = vpop.f32.mrf.mxu3  ;;  %v2669_v42 = vpop.f32.mrf.mxu1 }
 0x516   : > { %v2819_v1 = vadd.f32 %v2815_v11, %v2745_v40 }
 0x517   : > { %v2817_v43 = vpop.f32.mrf.mxu0 }
 0x518   : > { %v2820_v22 = vpack.c.bf16 %v2819_v1, %v2819_v1 }
 0x51a   : > { %3938 = vmatmul.msk.bf16.vlgmr.msrb.gmra.mxu3 %vm2935_vm10, %v2820_v22  ;;  %3939 = vmatmul.msk.bf16.vlgmr.msra.gmra.mxu1 %vm2935_vm10, %v2820_v22 }
 0x51b   : > { %3940 = vmatmul.msk.bf16.vlgmr.msra.gmra.mxu2 %vm2935_vm10, %v2820_v22  ;;  %3941 = vmatmul.msk.bf16.vlgmr.msra.gmra.mxu0 %vm2935_vm10, %v2820_v22  ;;  %v2743_v44 = vpop.f32.mrf.mxu2 }
 0x51c   : > { %v3118_v44 = vld [vmem:[%s357_s28] sm:$0xff] }
 0x52a   : > { %3942 = vmatmul.msk.bf16.vlgmr.msra.gmra.mxu3 %vm2935_vm10, %v2820_v22  ;;  %3943 = vmatmul.msk.bf16.vlgmr.msrb.gmra.mxu1 %vm2935_vm10, %v2820_v22 }
 0x52b   : > { %3944 = vmatmul.msk.bf16.vlgmr.msrb.gmra.mxu2 %vm2935_vm10, %v2820_v22  ;;  %3945 = vmatmul.msk.bf16.vlgmr.msrb.gmra.mxu0 %vm2935_vm10, %v2820_v22  ;;  %vm5146_vm10 = vmand %vm3098_vm7, %vm3099_vm8  ;;  %vm3079_vm7 = vcmask 1046534   ;;  %vm3111_vm8 = vsmask.f32 6400 }
 0x52c   : > { %vm3101_vm13 = vmor %vm5146_vm10, %vm5142_vm9  ;;  %vm3114_vm10 = vcmask 326663  }
 0x52d   : > { %vm5155_vm4 = vmor %vm3104_vm0, %vm3101_vm13  ;;  %vm3115_vm13 = vsmask.f32 7424 }
 0x52e   : > { %vm3109_vm9 = vmor %vm5159_vm6, %vm5155_vm4 }
 0x52f   : > { %vm3112_vm12 = vmand %vm3079_vm7, %vm3111_vm8 }
 0x530   : > { %vm5174_vm0 = vmor %vm3112_vm12, %vm3109_vm9 }
 0x531   : > { %vm3116_vm3 = vmand %vm3114_vm10, %vm3115_vm13 }
 0x532   : > { %vm3117_vm4 = vmor %vm3116_vm3, %vm5174_vm0 }
 0x597   : > { %v2961_v45 = vpop.f32.mrf.mxu1 }
 0x598   : > { %v2987_v46 = vpop.f32.mrf.mxu0  ;;  %v2962_v0 = vadd.f32 %v2961_v45, %v2920_v56 }
 0x599   : > { %v2988_v2 = vadd.f32 %v2987_v46, %v2922_v57 }
 0x59a   : > { %v3044_v14 = vmax.f32 %v2962_v0, 0.0 }
 0x59b   : > { %v3046_v8 = vmax.f32 %v2988_v2, 0.0 }
 0x59d   : > { %v2948_v49 = vpop.f32.mrf.mxu3 }
 0x59e   : > { %v2974_v50 = vpop.f32.mrf.mxu2  ;;  %v2949_v59 = vadd.f32 %v2948_v49, %v2919_v53 }
 0x59f   : > { %v2963_v52 = vpop.f32.mrf.mxu1  ;;  %v2975_v62 = vadd.f32 %v2974_v50, %v2921_v55 }
 0x5a0   : > { %v2989_v54 = vpop.f32.mrf.mxu0  ;;  %v3043_v4 = vmax.f32 %v2949_v59, 0.0 }
 0x5a1   : > { %v3045_v9 = vmax.f32 %v2975_v62, 0.0 }
 0x5a2   : > { %v3051_v16 = vpack.c.bf16 %v3044_v14, %v3043_v4 }
 0x5a3   : > { %v3052_v19 = vpack.c.bf16 %v3046_v8, %v3045_v9 }
 0x5a4   : > { %v3059_v29 = vrot.slane %v3051_v16, 3 }
 0x5a5   : > { %v2950_v63 = vpop.f32.mrf.mxu3  ;;  %v3060_v32 = vrot.slane %v3052_v19, 6  ;;  %v3061_v33 = vrot.slane %v3052_v19, 1 }
 0x5a6   : > { %v2976_v60 = vpop.f32.mrf.mxu2  ;;  %v3069_v38 = vsel %vm3066_vm15, %v3051_v16, %v3059_v29 }
 0x5a7   : > { %v3013_v3 = vpop.f32.mrf.mxu1  ;;  %v3073_v39 = vsel %vm3070_vm5, %v3060_v32, %v3061_v33 }
 0x5a8   : > { %v3039_v7 = vpop.f32.mrf.mxu0  ;;  %v3014_v20 = vadd.f32 %v3013_v3, %v2924_v5  ;;  %v3074_v45 = vsel %vm418_vm1, %v3069_v38, %v3073_v39 }
 0x5a9   : > { %v3040_v21 = vadd.f32 %v3039_v7, %v2926_v12 }
 0x5aa   : > { %v3048_v30 = vmax.f32 %v3014_v20, 0.0 }
 0x5ab   : > { %v3050_v34 = vmax.f32 %v3040_v21, 0.0 }
 0x5ad   : > { %v3000_v23 = vpop.f32.mrf.mxu3 }
 0x5ae   : > { %v3001_v24 = vadd.f32 %v3000_v23, %v2923_v15  ;;  %v3026_v25 = vpop.f32.mrf.mxu2 }
 0x5af   : > { %v3027_v26 = vadd.f32 %v3026_v25, %v2925_v17  ;;  %v3015_v27 = vpop.f32.mrf.mxu1 }
 0x5b0   : > { %v3047_v13 = vmax.f32 %v3001_v24, 0.0  ;;  %v3041_v31 = vpop.f32.mrf.mxu0 }
 0x5b1   : > { %v3049_v35 = vmax.f32 %v3027_v26, 0.0 }
 0x5b2   : > { %v3053_v36 = vpack.c.bf16 %v3048_v30, %v3047_v13 }
 0x5b3   : > { %v3054_v28 = vpack.c.bf16 %v3050_v34, %v3049_v35 }
 0x5b4   : > { %v3062_v6 = vrot.slane %v3053_v36, 4  ;;  %v3063_v11 = vrot.slane %v3053_v36, 7 }
 0x5b5   : > { %v3064_v40 = vrot.slane %v3054_v28, 2  ;;  %v3065_v41 = vrot.slane %v3054_v28, 5  ;;  %v3002_v42 = vpop.f32.mrf.mxu3 }
 0x5b6   : > { %v3078_v1 = vsel %vm3075_vm11, %v3062_v6, %v3063_v11  ;;  %v3028_v43 = vpop.f32.mrf.mxu2 }
 0x5b7   : > { %v3082_v22 = vsel %vm3079_vm7, %v3064_v40, %v3065_v41 }
 0x5b8   : > { %v3084_v46 = vsel %vm3083_vm2, %v3078_v1, %v3082_v22 }
 0x5b9   : > { %v3085_v47 = vsel %vm1170_vm14, %v3074_v45, %v3084_v46 }
 0x5ba   : > { %v3119_v48 = vsel %vm3117_vm4, %v3085_v47, %v3118_v44 }
 0x5bb   : > { %3120 = vst [vmem:[%s357_s28] sm:$0xff] %v3119_v48 }
 0x5bc PF: > { %s20_s13 = sadd.s32 1, %s4133_s13  }
 0x5bd   : > { %p17_p4 = scmp.ge.s32.totalorder %s20_s13, 4  }
 0x5bf   :  { %19 = sbr.rel (!%p17_p4) target bundleno = 1 (0x1), region = 121 }

</bundles_post_ra>
